<compile_context>
chip_gen: v6e
topology: v6e:2x2x1
jax: 0.10.0
libtpu: 0.0.40
codegen_flags: <defaults>
</compile_context>

<pallas_src>
import numpy as np
import jax
import jax.numpy as jnp
from jax.experimental import pallas as pl


# ----------------------------- Pallas kernels -----------------------------

def conv_relu_pool_kernel(p_ref, w_ref, b_ref, o_ref):
    # p_ref: (4, M, K) bf16 im2col patches, one slab per 2x2 pool-window corner.
    # w_ref: (K, Cout) bf16, b_ref: (1, Cout) f32, o_ref: (M, Cout) bf16.
    # pool(relu(conv)) == relu(max_c(dot_c) + b) because ReLU is monotone and
    # the bias is shared across the four corners.
    w = w_ref[...]
    acc = jnp.dot(p_ref[0], w, preferred_element_type=jnp.float32)
    for c in range(1, 4):
        acc = jnp.maximum(acc, jnp.dot(p_ref[c], w,
                                       preferred_element_type=jnp.float32))
    y = jnp.maximum(acc + b_ref[...], 0.0)
    o_ref[...] = y.astype(o_ref.dtype)


def fc_tail_kernel(x_ref, m1_ref, w1_ref, b1_ref, m2_ref, w2_ref, b2_ref, o_ref):
    # Fused: dropout -> fc1 -> ReLU -> dropout -> fc2.
    # m1/m2 are pre-scaled keep masks (0 or 1/(1-p)), f32.
    x = (x_ref[...] * m1_ref[...]).astype(jnp.bfloat16)
    h = jnp.dot(x, w1_ref[...], preferred_element_type=jnp.float32) + b1_ref[...]
    h = jnp.maximum(h, 0.0)
    h = (h * m2_ref[...]).astype(jnp.bfloat16)
    y = jnp.dot(h, w2_ref[...], preferred_element_type=jnp.float32) + b2_ref[...]
    o_ref[...] = y


# ------------------------------ JAX wrappers -------------------------------

def _im2col_pooled(x, kh=3, kw=3):
    # x: (N, H, W, C) NHWC.  Valid conv stride 1 -> (Ho, Wo); pool 2x2 floor ->
    # (Hp, Wp).  Returns patches grouped by pool-window corner:
    #   (4, N*Hp*Wp, kh*kw*C) bf16, plus (Hp, Wp).
    x = x.astype(jnp.bfloat16)
    N, H, W, C = x.shape
    Ho, Wo = H - kh + 1, W - kw + 1
    Hp, Wp = Ho // 2, Wo // 2
    corners = []
    for dy in range(2):
        for dx in range(2):
            slabs = []
            for ki in range(kh):
                for kj in range(kw):
                    r0, c0 = dy + ki, dx + kj
                    slabs.append(x[:, r0:r0 + 2 * Hp:2, c0:c0 + 2 * Wp:2, :])
            p = jnp.stack(slabs, axis=3)                    # (N, Hp, Wp, 9, C)
            corners.append(p.reshape(N * Hp * Wp, kh * kw * C))
    return jnp.stack(corners, axis=0), Hp, Wp


def conv_relu_pool(x, w_mat, b, cout_true):
    # x: (N, H, W, Cin) NHWC; w_mat: (K, Cout_pad) bf16; b: (1, Cout_pad) f32.
    # Returns the pooled activation (N, Hp, Wp, cout_true) in bf16.
    N = x.shape[0]
    patches, Hp, Wp = _im2col_pooled(x)
    _, M, K = patches.shape
    Cout = w_mat.shape[1]
    out = pl.pallas_call(
        conv_relu_pool_kernel,
        out_shape=jax.ShapeDtypeStruct((M, Cout), jnp.bfloat16),
        grid=(1,),
        in_specs=[pl.BlockSpec((4, M, K), lambda i: (0, 0, 0)),
                  pl.BlockSpec((K, Cout), lambda i: (0, 0)),
                  pl.BlockSpec((1, Cout), lambda i: (0, 0))],
        out_specs=pl.BlockSpec((M, Cout), lambda i: (0, 0)),
    )(patches, w_mat, b)
    out = out.reshape(N, Hp, Wp, Cout)
    if cout_true < Cout:                      # drop the lane-padding channels
        out = out[..., :cout_true]
    return out


def fc_tail(x, m1, w1, b1, m2, w2, b2):
    # x: (N, 512) bf16; masks (N, 512) f32; w1 (512,512) bf16; w2 (512,10) bf16.
    N, F = x.shape
    H = w1.shape[1]
    O = w2.shape[1]
    return pl.pallas_call(
        fc_tail_kernel,
        out_shape=jax.ShapeDtypeStruct((N, O), jnp.float32),
        grid=(1,),
        in_specs=[pl.BlockSpec((N, F), lambda i: (0, 0)),
                  pl.BlockSpec((N, F), lambda i: (0, 0)),
                  pl.BlockSpec((F, H), lambda i: (0, 0)),
                  pl.BlockSpec((1, H), lambda i: (0, 0)),
                  pl.BlockSpec((N, H), lambda i: (0, 0)),
                  pl.BlockSpec((H, O), lambda i: (0, 0)),
                  pl.BlockSpec((1, O), lambda i: (0, 0))],
        out_specs=pl.BlockSpec((N, O), lambda i: (0, 0)),
    )(x, m1, w1, b1, m2, w2, b2)


# --------------------------- parameter handling ----------------------------

def _uniform(key, shape, fan_in):
    bound = 1.0 / float(np.sqrt(fan_in))
    return jax.random.uniform(key, shape, jnp.float32, -bound, bound)


def _conv_w_to_mat(w_oihw, cout_pad):
    # PyTorch OIHW -> (kh*kw*Cin, Cout_pad) bf16, matching the im2col
    # (kh, kw, Cin) ordering; output channels zero-padded to `cout_pad`
    # so conv stores are lane-dense (128-wide).
    O, I, kh, kw = w_oihw.shape
    m = jnp.transpose(w_oihw, (2, 3, 1, 0)).reshape(kh * kw * I, O)
    if cout_pad > O:
        m = jnp.pad(m, ((0, 0), (0, cout_pad - O)))
    return m.astype(jnp.bfloat16)


def _pad_bias(b, cout_pad):
    O = b.shape[0]
    if cout_pad > O:
        b = jnp.pad(b, (0, cout_pad - O))
    return b.reshape(1, cout_pad).astype(jnp.float32)


def init_params(key):
    ks = jax.random.split(key, 10)
    # Same shapes as the PyTorch module (input_shape=(3,32,32) -> n_size=512).
    w1 = _uniform(ks[0], (32, 3, 3, 3), 3 * 9)
    b1 = _uniform(ks[1], (32,), 3 * 9)
    w2 = _uniform(ks[2], (64, 32, 3, 3), 32 * 9)
    b2 = _uniform(ks[3], (64,), 32 * 9)
    w3 = _uniform(ks[4], (128, 64, 3, 3), 64 * 9)
    b3 = _uniform(ks[5], (128,), 64 * 9)
    fc1_w = _uniform(ks[6], (512, 512), 512)   # torch Linear layout: (out, in)
    fc1_b = _uniform(ks[7], (512,), 512)
    fc2_w = _uniform(ks[8], (10, 512), 512)
    fc2_b = _uniform(ks[9], (10,), 512)

    # Permute fc1 weight rows ONCE so the NHWC-flattened conv3 output
    # (feature index hw*128 + c) sees the same weights torch's NCHW flatten
    # (feature index c*4 + hw) would -> no runtime transpose before fc1.
    q = np.arange(512)
    perm = (q % 128) * 4 + (q // 128)
    fc1_w_mat = fc1_w.T[perm, :]               # (512_in_nhwc, 512_out)

    return {
        "w1": _conv_w_to_mat(w1, 128), "b1": _pad_bias(b1, 128),
        "w2": _conv_w_to_mat(w2, 128), "b2": _pad_bias(b2, 128),
        "w3": _conv_w_to_mat(w3, 128), "b3": _pad_bias(b3, 128),
        "fc1_w": fc1_w_mat.astype(jnp.bfloat16),
        "fc1_b": fc1_b.reshape(1, 512).astype(jnp.float32),
        "fc2_w": fc2_w.T.astype(jnp.bfloat16),
        "fc2_b": fc2_b.reshape(1, 10).astype(jnp.float32),
    }


# ------------------------------- forward pass ------------------------------

def net_forward(x_nchw, params, *, training=True, rng=None, drop_rate=0.25):
    # x_nchw: (N, 3, 32, 32) float32 (PyTorch convention).
    x = jnp.transpose(x_nchw, (0, 2, 3, 1))                       # NCHW -> NHWC
    x = conv_relu_pool(x, params["w1"], params["b1"], 32)         # (N,15,15, 32)
    x = conv_relu_pool(x, params["w2"], params["b2"], 64)         # (N, 6, 6, 64)
    x = conv_relu_pool(x, params["w3"], params["b3"], 128)        # (N, 2, 2,128)

    N = x.shape[0]
    x = x.reshape(N, 512)       # NHWC flatten; fc1_w rows were pre-permuted.

    if training:
        keep = 1.0 - drop_rate
        k1, k2 = jax.random.split(rng)
        m1 = jax.random.bernoulli(k1, keep, (N, 512)).astype(jnp.float32) / keep
        m2 = jax.random.bernoulli(k2, keep, (N, 512)).astype(jnp.float32) / keep
    else:
        m1 = jnp.ones((N, 512), jnp.float32)
        m2 = jnp.ones((N, 512), jnp.float32)

    return fc_tail(x, m1, params["fc1_w"], params["fc1_b"],
                   m2, params["fc2_w"], params["fc2_b"])


# ----------------------------------- main -----------------------------------

if __name__ == "__main__":
    key = jax.random.PRNGKey(0)
    kx, kp, kd = jax.random.split(key, 3)
    x = jax.random.normal(kx, (2, 3, 32, 32), dtype=jnp.float32)
    params = init_params(kp)

    fwd = jax.jit(lambda xx, pp, kk: net_forward(xx, pp, training=True, rng=kk))
    out = jax.block_until_ready(fwd(x, params, kd))

    assert out.shape == (2, 10) and out.dtype == jnp.float32
    assert bool(jnp.all(jnp.isfinite(out)))
    print("KERNEL_OK")
</pallas_src>

<mosaic_0001>
module attributes {stable_mosaic.version = 11 : i64} {
  func.func @conv_relu_pool_kernel(%arg0: i32, %arg1: memref<4x450x27xbf16, #tpu.memory_space<vmem>>, %arg2: memref<27x128xbf16, #tpu.memory_space<vmem>>, %arg3: memref<1x128xf32, #tpu.memory_space<vmem>>, %arg4: memref<450x128xbf16, #tpu.memory_space<vmem>>) attributes {dimension_semantics = [#tpu.dimension_semantics<arbitrary>], iteration_bounds = array<i64: 1>, scalar_prefetch = 0 : i64, scratch_operands = 0 : i64, tpu.core_type = #tpu.core_type<tc>, window_params = [{pipeline_mode = #tpu.pipeline_mode<synchronous>, transform_indices = @transform_0, window_bounds = array<i64: 4, 450, 27>}, {pipeline_mode = #tpu.pipeline_mode<synchronous>, transform_indices = @transform_1, window_bounds = array<i64: 27, 128>}, {pipeline_mode = #tpu.pipeline_mode<synchronous>, transform_indices = @transform_2, window_bounds = array<i64: 1, 128>}, {pipeline_mode = #tpu.pipeline_mode<synchronous>, transform_indices = @transform_3, window_bounds = array<i64: 450, 128>}]} {
    %c0 = arith.constant 0 : index
    %c0_0 = arith.constant 0 : index
    %0 = vector.load %arg2[%c0, %c0_0] : memref<27x128xbf16, #tpu.memory_space<vmem>>, vector<27x128xbf16>
    %c0_1 = arith.constant 0 : index
    %c0_2 = arith.constant 0 : index
    %c0_3 = arith.constant 0 : index
    %1 = vector.load %arg1[%c0_1, %c0_2, %c0_3] : memref<4x450x27xbf16, #tpu.memory_space<vmem>>, vector<1x450x27xbf16>
    %2 = vector.shape_cast %1 : vector<1x450x27xbf16> to vector<450x27xbf16>
    %cst = arith.constant dense<0.000000e+00> : vector<450x128xf32>
    %3 = tpu.matmul %2, %0, %cst {dimension_numbers = #tpu.dot_dimension_numbers<[1], [0], [0], [1], [0, 0, 1, 1], [], []>} : vector<450x27xbf16>, vector<27x128xbf16>, vector<450x128xf32> -> vector<450x128xf32>
    %c1 = arith.constant 1 : index
    %c0_4 = arith.constant 0 : index
    %c0_5 = arith.constant 0 : index
    %4 = vector.load %arg1[%c1, %c0_4, %c0_5] : memref<4x450x27xbf16, #tpu.memory_space<vmem>>, vector<1x450x27xbf16>
    %5 = vector.shape_cast %4 : vector<1x450x27xbf16> to vector<450x27xbf16>
    %cst_6 = arith.constant dense<0.000000e+00> : vector<450x128xf32>
    %6 = tpu.matmul %5, %0, %cst_6 {dimension_numbers = #tpu.dot_dimension_numbers<[1], [0], [0], [1], [0, 0, 1, 1], [], []>} : vector<450x27xbf16>, vector<27x128xbf16>, vector<450x128xf32> -> vector<450x128xf32>
    %7 = arith.maximumf %3, %6 : vector<450x128xf32>
    %c2 = arith.constant 2 : index
    %c0_7 = arith.constant 0 : index
    %c0_8 = arith.constant 0 : index
    %8 = vector.load %arg1[%c2, %c0_7, %c0_8] : memref<4x450x27xbf16, #tpu.memory_space<vmem>>, vector<1x450x27xbf16>
    %9 = vector.shape_cast %8 : vector<1x450x27xbf16> to vector<450x27xbf16>
    %cst_9 = arith.constant dense<0.000000e+00> : vector<450x128xf32>
    %10 = tpu.matmul %9, %0, %cst_9 {dimension_numbers = #tpu.dot_dimension_numbers<[1], [0], [0], [1], [0, 0, 1, 1], [], []>} : vector<450x27xbf16>, vector<27x128xbf16>, vector<450x128xf32> -> vector<450x128xf32>
    %11 = arith.maximumf %7, %10 : vector<450x128xf32>
    %c3 = arith.constant 3 : index
    %c0_10 = arith.constant 0 : index
    %c0_11 = arith.constant 0 : index
    %12 = vector.load %arg1[%c3, %c0_10, %c0_11] : memref<4x450x27xbf16, #tpu.memory_space<vmem>>, vector<1x450x27xbf16>
    %13 = vector.shape_cast %12 : vector<1x450x27xbf16> to vector<450x27xbf16>
    %cst_12 = arith.constant dense<0.000000e+00> : vector<450x128xf32>
    %14 = tpu.matmul %13, %0, %cst_12 {dimension_numbers = #tpu.dot_dimension_numbers<[1], [0], [0], [1], [0, 0, 1, 1], [], []>} : vector<450x27xbf16>, vector<27x128xbf16>, vector<450x128xf32> -> vector<450x128xf32>
    %15 = arith.maximumf %11, %14 : vector<450x128xf32>
    %c0_13 = arith.constant 0 : index
    %c0_14 = arith.constant 0 : index
    %16 = vector.load %arg3[%c0_13, %c0_14] : memref<1x128xf32, #tpu.memory_space<vmem>>, vector<1x128xf32>
    %17 = vector.broadcast %16 : vector<1x128xf32> to vector<450x128xf32>
    %18 = arith.addf %15, %17 : vector<450x128xf32>
    %cst_15 = arith.constant 0.000000e+00 : f32
    %19 = vector.broadcast %cst_15 : f32 to vector<450x128xf32>
    %20 = arith.maximumf %18, %19 : vector<450x128xf32>
    %21 = arith.truncf %20 : vector<450x128xf32> to vector<450x128xbf16>
    %c0_16 = arith.constant 0 : index
    %c0_17 = arith.constant 0 : index
    %22 = vector.load %arg4[%c0_16, %c0_17] : memref<450x128xbf16, #tpu.memory_space<vmem>>, vector<450x128xbf16>
    tpu.vector_store %arg4[%c0_16, %c0_17], %21 {strides = array<i32>} : memref<450x128xbf16, #tpu.memory_space<vmem>>, vector<450x128xbf16>,
    return
  }
  func.func @transform_0(%arg0: i32) -> (i32, i32, i32) {
    %c0_i32 = arith.constant 0 : i32
    %c0_i32_0 = arith.constant 0 : i32
    %c0_i32_1 = arith.constant 0 : i32
    %c0_i32_2 = arith.constant 0 : i32
    return %c0_i32, %c0_i32_0, %c0_i32_1 : i32, i32, i32
  }
  func.func @transform_1(%arg0: i32) -> (i32, i32) {
    %c0_i32 = arith.constant 0 : i32
    %c0_i32_0 = arith.constant 0 : i32
    %c0_i32_1 = arith.constant 0 : i32
    return %c0_i32, %c0_i32_0 : i32, i32
  }
  func.func @transform_2(%arg0: i32) -> (i32, i32) {
    %c0_i32 = arith.constant 0 : i32
    %c0_i32_0 = arith.constant 0 : i32
    %c0_i32_1 = arith.constant 0 : i32
    return %c0_i32, %c0_i32_0 : i32, i32
  }
  func.func @transform_3(%arg0: i32) -> (i32, i32) {
    %c0_i32 = arith.constant 0 : i32
    %c0_i32_0 = arith.constant 0 : i32
    %c0_i32_1 = arith.constant 0 : i32
    return %c0_i32, %c0_i32_0 : i32, i32
  }
}

module attributes {stable_mosaic.version = 11 : i64} {
  func.func @conv_relu_pool_kernel(%arg0: i32, %arg1: memref<4x72x288xbf16, #tpu.memory_space<vmem>>, %arg2: memref<288x128xbf16, #tpu.memory_space<vmem>>, %arg3: memref<1x128xf32, #tpu.memory_space<vmem>>, %arg4: memref<72x128xbf16, #tpu.memory_space<vmem>>) attributes {dimension_semantics = [#tpu.dimension_semantics<arbitrary>], iteration_bounds = array<i64: 1>, scalar_prefetch = 0 : i64, scratch_operands = 0 : i64, tpu.core_type = #tpu.core_type<tc>, window_params = [{pipeline_mode = #tpu.pipeline_mode<synchronous>, transform_indices = @transform_0, window_bounds = array<i64: 4, 72, 288>}, {pipeline_mode = #tpu.pipeline_mode<synchronous>, transform_indices = @transform_1, window_bounds = array<i64: 288, 128>}, {pipeline_mode = #tpu.pipeline_mode<synchronous>, transform_indices = @transform_2, window_bounds = array<i64: 1, 128>}, {pipeline_mode = #tpu.pipeline_mode<synchronous>, transform_indices = @transform_3, window_bounds = array<i64: 72, 128>}]} {
    %c0 = arith.constant 0 : index
    %c0_0 = arith.constant 0 : index
    %0 = vector.load %arg2[%c0, %c0_0] : memref<288x128xbf16, #tpu.memory_space<vmem>>, vector<288x128xbf16>
    %c0_1 = arith.constant 0 : index
    %c0_2 = arith.constant 0 : index
    %c0_3 = arith.constant 0 : index
    %1 = vector.load %arg1[%c0_1, %c0_2, %c0_3] : memref<4x72x288xbf16, #tpu.memory_space<vmem>>, vector<1x72x288xbf16>
    %2 = vector.shape_cast %1 : vector<1x72x288xbf16> to vector<72x288xbf16>
    %cst = arith.constant dense<0.000000e+00> : vector<72x128xf32>
    %3 = tpu.matmul %2, %0, %cst {dimension_numbers = #tpu.dot_dimension_numbers<[1], [0], [0], [1], [0, 0, 1, 1], [], []>} : vector<72x288xbf16>, vector<288x128xbf16>, vector<72x128xf32> -> vector<72x128xf32>
    %c1 = arith.constant 1 : index
    %c0_4 = arith.constant 0 : index
    %c0_5 = arith.constant 0 : index
    %4 = vector.load %arg1[%c1, %c0_4, %c0_5] : memref<4x72x288xbf16, #tpu.memory_space<vmem>>, vector<1x72x288xbf16>
    %5 = vector.shape_cast %4 : vector<1x72x288xbf16> to vector<72x288xbf16>
    %cst_6 = arith.constant dense<0.000000e+00> : vector<72x128xf32>
    %6 = tpu.matmul %5, %0, %cst_6 {dimension_numbers = #tpu.dot_dimension_numbers<[1], [0], [0], [1], [0, 0, 1, 1], [], []>} : vector<72x288xbf16>, vector<288x128xbf16>, vector<72x128xf32> -> vector<72x128xf32>
    %7 = arith.maximumf %3, %6 : vector<72x128xf32>
    %c2 = arith.constant 2 : index
    %c0_7 = arith.constant 0 : index
    %c0_8 = arith.constant 0 : index
    %8 = vector.load %arg1[%c2, %c0_7, %c0_8] : memref<4x72x288xbf16, #tpu.memory_space<vmem>>, vector<1x72x288xbf16>
    %9 = vector.shape_cast %8 : vector<1x72x288xbf16> to vector<72x288xbf16>
    %cst_9 = arith.constant dense<0.000000e+00> : vector<72x128xf32>
    %10 = tpu.matmul %9, %0, %cst_9 {dimension_numbers = #tpu.dot_dimension_numbers<[1], [0], [0], [1], [0, 0, 1, 1], [], []>} : vector<72x288xbf16>, vector<288x128xbf16>, vector<72x128xf32> -> vector<72x128xf32>
    %11 = arith.maximumf %7, %10 : vector<72x128xf32>
    %c3 = arith.constant 3 : index
    %c0_10 = arith.constant 0 : index
    %c0_11 = arith.constant 0 : index
    %12 = vector.load %arg1[%c3, %c0_10, %c0_11] : memref<4x72x288xbf16, #tpu.memory_space<vmem>>, vector<1x72x288xbf16>
    %13 = vector.shape_cast %12 : vector<1x72x288xbf16> to vector<72x288xbf16>
    %cst_12 = arith.constant dense<0.000000e+00> : vector<72x128xf32>
    %14 = tpu.matmul %13, %0, %cst_12 {dimension_numbers = #tpu.dot_dimension_numbers<[1], [0], [0], [1], [0, 0, 1, 1], [], []>} : vector<72x288xbf16>, vector<288x128xbf16>, vector<72x128xf32> -> vector<72x128xf32>
    %15 = arith.maximumf %11, %14 : vector<72x128xf32>
    %c0_13 = arith.constant 0 : index
    %c0_14 = arith.constant 0 : index
    %16 = vector.load %arg3[%c0_13, %c0_14] : memref<1x128xf32, #tpu.memory_space<vmem>>, vector<1x128xf32>
    %17 = vector.broadcast %16 : vector<1x128xf32> to vector<72x128xf32>
    %18 = arith.addf %15, %17 : vector<72x128xf32>
    %cst_15 = arith.constant 0.000000e+00 : f32
    %19 = vector.broadcast %cst_15 : f32 to vector<72x128xf32>
    %20 = arith.maximumf %18, %19 : vector<72x128xf32>
    %21 = arith.truncf %20 : vector<72x128xf32> to vector<72x128xbf16>
    %c0_16 = arith.constant 0 : index
    %c0_17 = arith.constant 0 : index
    %22 = vector.load %arg4[%c0_16, %c0_17] : memref<72x128xbf16, #tpu.memory_space<vmem>>, vector<72x128xbf16>
    tpu.vector_store %arg4[%c0_16, %c0_17], %21 {strides = array<i32>} : memref<72x128xbf16, #tpu.memory_space<vmem>>, vector<72x128xbf16>,
    return
  }
  func.func @transform_0(%arg0: i32) -> (i32, i32, i32) {
    %c0_i32 = arith.constant 0 : i32
    %c0_i32_0 = arith.constant 0 : i32
    %c0_i32_1 = arith.constant 0 : i32
    %c0_i32_2 = arith.constant 0 : i32
    return %c0_i32, %c0_i32_0, %c0_i32_1 : i32, i32, i32
  }
  func.func @transform_1(%arg0: i32) -> (i32, i32) {
    %c0_i32 = arith.constant 0 : i32
    %c0_i32_0 = arith.constant 0 : i32
    %c0_i32_1 = arith.constant 0 : i32
    return %c0_i32, %c0_i32_0 : i32, i32
  }
  func.func @transform_2(%arg0: i32) -> (i32, i32) {
    %c0_i32 = arith.constant 0 : i32
    %c0_i32_0 = arith.constant 0 : i32
    %c0_i32_1 = arith.constant 0 : i32
    return %c0_i32, %c0_i32_0 : i32, i32
  }
  func.func @transform_3(%arg0: i32) -> (i32, i32) {
    %c0_i32 = arith.constant 0 : i32
    %c0_i32_0 = arith.constant 0 : i32
    %c0_i32_1 = arith.constant 0 : i32
    return %c0_i32, %c0_i32_0 : i32, i32
  }
}

module attributes {stable_mosaic.version = 11 : i64} {
  func.func @conv_relu_pool_kernel(%arg0: i32, %arg1: memref<4x8x576xbf16, #tpu.memory_space<vmem>>, %arg2: memref<576x128xbf16, #tpu.memory_space<vmem>>, %arg3: memref<1x128xf32, #tpu.memory_space<vmem>>, %arg4: memref<8x128xbf16, #tpu.memory_space<vmem>>) attributes {dimension_semantics = [#tpu.dimension_semantics<arbitrary>], iteration_bounds = array<i64: 1>, scalar_prefetch = 0 : i64, scratch_operands = 0 : i64, tpu.core_type = #tpu.core_type<tc>, window_params = [{pipeline_mode = #tpu.pipeline_mode<synchronous>, transform_indices = @transform_0, window_bounds = array<i64: 4, 8, 576>}, {pipeline_mode = #tpu.pipeline_mode<synchronous>, transform_indices = @transform_1, window_bounds = array<i64: 576, 128>}, {pipeline_mode = #tpu.pipeline_mode<synchronous>, transform_indices = @transform_2, window_bounds = array<i64: 1, 128>}, {pipeline_mode = #tpu.pipeline_mode<synchronous>, transform_indices = @transform_3, window_bounds = array<i64: 8, 128>}]} {
    %c0 = arith.constant 0 : index
    %c0_0 = arith.constant 0 : index
    %0 = vector.load %arg2[%c0, %c0_0] : memref<576x128xbf16, #tpu.memory_space<vmem>>, vector<576x128xbf16>
    %c0_1 = arith.constant 0 : index
    %c0_2 = arith.constant 0 : index
    %c0_3 = arith.constant 0 : index
    %1 = vector.load %arg1[%c0_1, %c0_2, %c0_3] : memref<4x8x576xbf16, #tpu.memory_space<vmem>>, vector<1x8x576xbf16>
    %2 = vector.shape_cast %1 : vector<1x8x576xbf16> to vector<8x576xbf16>
    %cst = arith.constant dense<0.000000e+00> : vector<8x128xf32>
    %3 = tpu.matmul %2, %0, %cst {dimension_numbers = #tpu.dot_dimension_numbers<[1], [0], [0], [1], [0, 0, 1, 1], [], []>} : vector<8x576xbf16>, vector<576x128xbf16>, vector<8x128xf32> -> vector<8x128xf32>
    %c1 = arith.constant 1 : index
    %c0_4 = arith.constant 0 : index
    %c0_5 = arith.constant 0 : index
    %4 = vector.load %arg1[%c1, %c0_4, %c0_5] : memref<4x8x576xbf16, #tpu.memory_space<vmem>>, vector<1x8x576xbf16>
    %5 = vector.shape_cast %4 : vector<1x8x576xbf16> to vector<8x576xbf16>
    %cst_6 = arith.constant dense<0.000000e+00> : vector<8x128xf32>
    %6 = tpu.matmul %5, %0, %cst_6 {dimension_numbers = #tpu.dot_dimension_numbers<[1], [0], [0], [1], [0, 0, 1, 1], [], []>} : vector<8x576xbf16>, vector<576x128xbf16>, vector<8x128xf32> -> vector<8x128xf32>
    %7 = arith.maximumf %3, %6 : vector<8x128xf32>
    %c2 = arith.constant 2 : index
    %c0_7 = arith.constant 0 : index
    %c0_8 = arith.constant 0 : index
    %8 = vector.load %arg1[%c2, %c0_7, %c0_8] : memref<4x8x576xbf16, #tpu.memory_space<vmem>>, vector<1x8x576xbf16>
    %9 = vector.shape_cast %8 : vector<1x8x576xbf16> to vector<8x576xbf16>
    %cst_9 = arith.constant dense<0.000000e+00> : vector<8x128xf32>
    %10 = tpu.matmul %9, %0, %cst_9 {dimension_numbers = #tpu.dot_dimension_numbers<[1], [0], [0], [1], [0, 0, 1, 1], [], []>} : vector<8x576xbf16>, vector<576x128xbf16>, vector<8x128xf32> -> vector<8x128xf32>
    %11 = arith.maximumf %7, %10 : vector<8x128xf32>
    %c3 = arith.constant 3 : index
    %c0_10 = arith.constant 0 : index
    %c0_11 = arith.constant 0 : index
    %12 = vector.load %arg1[%c3, %c0_10, %c0_11] : memref<4x8x576xbf16, #tpu.memory_space<vmem>>, vector<1x8x576xbf16>
    %13 = vector.shape_cast %12 : vector<1x8x576xbf16> to vector<8x576xbf16>
    %cst_12 = arith.constant dense<0.000000e+00> : vector<8x128xf32>
    %14 = tpu.matmul %13, %0, %cst_12 {dimension_numbers = #tpu.dot_dimension_numbers<[1], [0], [0], [1], [0, 0, 1, 1], [], []>} : vector<8x576xbf16>, vector<576x128xbf16>, vector<8x128xf32> -> vector<8x128xf32>
    %15 = arith.maximumf %11, %14 : vector<8x128xf32>
    %c0_13 = arith.constant 0 : index
    %c0_14 = arith.constant 0 : index
    %16 = vector.load %arg3[%c0_13, %c0_14] : memref<1x128xf32, #tpu.memory_space<vmem>>, vector<1x128xf32>
    %17 = vector.broadcast %16 : vector<1x128xf32> to vector<8x128xf32>
    %18 = arith.addf %15, %17 : vector<8x128xf32>
    %cst_15 = arith.constant 0.000000e+00 : f32
    %19 = vector.broadcast %cst_15 : f32 to vector<8x128xf32>
    %20 = arith.maximumf %18, %19 : vector<8x128xf32>
    %21 = arith.truncf %20 : vector<8x128xf32> to vector<8x128xbf16>
    %c0_16 = arith.constant 0 : index
    %c0_17 = arith.constant 0 : index
    %22 = vector.load %arg4[%c0_16, %c0_17] : memref<8x128xbf16, #tpu.memory_space<vmem>>, vector<8x128xbf16>
    tpu.vector_store %arg4[%c0_16, %c0_17], %21 {strides = array<i32>} : memref<8x128xbf16, #tpu.memory_space<vmem>>, vector<8x128xbf16>,
    return
  }
  func.func @transform_0(%arg0: i32) -> (i32, i32, i32) {
    %c0_i32 = arith.constant 0 : i32
    %c0_i32_0 = arith.constant 0 : i32
    %c0_i32_1 = arith.constant 0 : i32
    %c0_i32_2 = arith.constant 0 : i32
    return %c0_i32, %c0_i32_0, %c0_i32_1 : i32, i32, i32
  }
  func.func @transform_1(%arg0: i32) -> (i32, i32) {
    %c0_i32 = arith.constant 0 : i32
    %c0_i32_0 = arith.constant 0 : i32
    %c0_i32_1 = arith.constant 0 : i32
    return %c0_i32, %c0_i32_0 : i32, i32
  }
  func.func @transform_2(%arg0: i32) -> (i32, i32) {
    %c0_i32 = arith.constant 0 : i32
    %c0_i32_0 = arith.constant 0 : i32
    %c0_i32_1 = arith.constant 0 : i32
    return %c0_i32, %c0_i32_0 : i32, i32
  }
  func.func @transform_3(%arg0: i32) -> (i32, i32) {
    %c0_i32 = arith.constant 0 : i32
    %c0_i32_0 = arith.constant 0 : i32
    %c0_i32_1 = arith.constant 0 : i32
    return %c0_i32, %c0_i32_0 : i32, i32
  }
}

module attributes {stable_mosaic.version = 11 : i64} {
  func.func @fc_tail_kernel(%arg0: i32, %arg1: memref<2x512xbf16, #tpu.memory_space<vmem>>, %arg2: memref<2x512xf32, #tpu.memory_space<vmem>>, %arg3: memref<512x512xbf16, #tpu.memory_space<vmem>>, %arg4: memref<1x512xf32, #tpu.memory_space<vmem>>, %arg5: memref<2x512xf32, #tpu.memory_space<vmem>>, %arg6: memref<512x10xbf16, #tpu.memory_space<vmem>>, %arg7: memref<1x10xf32, #tpu.memory_space<vmem>>, %arg8: memref<2x10xf32, #tpu.memory_space<vmem>>) attributes {dimension_semantics = [#tpu.dimension_semantics<arbitrary>], iteration_bounds = array<i64: 1>, scalar_prefetch = 0 : i64, scratch_operands = 0 : i64, tpu.core_type = #tpu.core_type<tc>, window_params = [{pipeline_mode = #tpu.pipeline_mode<synchronous>, transform_indices = @transform_0, window_bounds = array<i64: 2, 512>}, {pipeline_mode = #tpu.pipeline_mode<synchronous>, transform_indices = @transform_1, window_bounds = array<i64: 2, 512>}, {pipeline_mode = #tpu.pipeline_mode<synchronous>, transform_indices = @transform_2, window_bounds = array<i64: 512, 512>}, {pipeline_mode = #tpu.pipeline_mode<synchronous>, transform_indices = @transform_3, window_bounds = array<i64: 1, 512>}, {pipeline_mode = #tpu.pipeline_mode<synchronous>, transform_indices = @transform_4, window_bounds = array<i64: 2, 512>}, {pipeline_mode = #tpu.pipeline_mode<synchronous>, transform_indices = @transform_5, window_bounds = array<i64: 512, 10>}, {pipeline_mode = #tpu.pipeline_mode<synchronous>, transform_indices = @transform_6, window_bounds = array<i64: 1, 10>}, {pipeline_mode = #tpu.pipeline_mode<synchronous>, transform_indices = @transform_7, window_bounds = array<i64: 2, 10>}]} {
    %c0 = arith.constant 0 : index
    %c0_0 = arith.constant 0 : index
    %0 = vector.load %arg1[%c0, %c0_0] : memref<2x512xbf16, #tpu.memory_space<vmem>>, vector<2x512xbf16>
    %c0_1 = arith.constant 0 : index
    %c0_2 = arith.constant 0 : index
    %1 = vector.load %arg2[%c0_1, %c0_2] : memref<2x512xf32, #tpu.memory_space<vmem>>, vector<2x512xf32>
    %2 = arith.extf %0 : vector<2x512xbf16> to vector<2x512xf32>
    %3 = arith.mulf %2, %1 : vector<2x512xf32>
    %4 = arith.truncf %3 : vector<2x512xf32> to vector<2x512xbf16>
    %c0_3 = arith.constant 0 : index
    %c0_4 = arith.constant 0 : index
    %5 = vector.load %arg3[%c0_3, %c0_4] : memref<512x512xbf16, #tpu.memory_space<vmem>>, vector<512x512xbf16>
    %cst = arith.constant dense<0.000000e+00> : vector<2x512xf32>
    %6 = tpu.matmul %4, %5, %cst {dimension_numbers = #tpu.dot_dimension_numbers<[1], [0], [0], [1], [0, 0, 1, 1], [], []>} : vector<2x512xbf16>, vector<512x512xbf16>, vector<2x512xf32> -> vector<2x512xf32>
    %c0_5 = arith.constant 0 : index
    %c0_6 = arith.constant 0 : index
    %7 = vector.load %arg4[%c0_5, %c0_6] : memref<1x512xf32, #tpu.memory_space<vmem>>, vector<1x512xf32>
    %8 = vector.broadcast %7 : vector<1x512xf32> to vector<2x512xf32>
    %9 = arith.addf %6, %8 : vector<2x512xf32>
    %cst_7 = arith.constant 0.000000e+00 : f32
    %10 = vector.broadcast %cst_7 : f32 to vector<2x512xf32>
    %11 = arith.maximumf %9, %10 : vector<2x512xf32>
    %c0_8 = arith.constant 0 : index
    %c0_9 = arith.constant 0 : index
    %12 = vector.load %arg5[%c0_8, %c0_9] : memref<2x512xf32, #tpu.memory_space<vmem>>, vector<2x512xf32>
    %13 = arith.mulf %11, %12 : vector<2x512xf32>
    %14 = arith.truncf %13 : vector<2x512xf32> to vector<2x512xbf16>
    %c0_10 = arith.constant 0 : index
    %c0_11 = arith.constant 0 : index
    %15 = vector.load %arg6[%c0_10, %c0_11] : memref<512x10xbf16, #tpu.memory_space<vmem>>, vector<512x10xbf16>
    %cst_12 = arith.constant dense<0.000000e+00> : vector<2x10xf32>
    %16 = tpu.matmul %14, %15, %cst_12 {dimension_numbers = #tpu.dot_dimension_numbers<[1], [0], [0], [1], [0, 0, 1, 1], [], []>} : vector<2x512xbf16>, vector<512x10xbf16>, vector<2x10xf32> -> vector<2x10xf32>
    %c0_13 = arith.constant 0 : index
    %c0_14 = arith.constant 0 : index
    %17 = vector.load %arg7[%c0_13, %c0_14] : memref<1x10xf32, #tpu.memory_space<vmem>>, vector<1x10xf32>
    %18 = vector.broadcast %17 : vector<1x10xf32> to vector<2x10xf32>
    %19 = arith.addf %16, %18 : vector<2x10xf32>
    %c0_15 = arith.constant 0 : index
    %c0_16 = arith.constant 0 : index
    %20 = vector.load %arg8[%c0_15, %c0_16] : memref<2x10xf32, #tpu.memory_space<vmem>>, vector<2x10xf32>
    tpu.vector_store %arg8[%c0_15, %c0_16], %19 {strides = array<i32>} : memref<2x10xf32, #tpu.memory_space<vmem>>, vector<2x10xf32>,
    return
  }
  func.func @transform_0(%arg0: i32) -> (i32, i32) {
    %c0_i32 = arith.constant 0 : i32
    %c0_i32_0 = arith.constant 0 : i32
    %c0_i32_1 = arith.constant 0 : i32
    return %c0_i32, %c0_i32_0 : i32, i32
  }
  func.func @transform_1(%arg0: i32) -> (i32, i32) {
    %c0_i32 = arith.constant 0 : i32
    %c0_i32_0 = arith.constant 0 : i32
    %c0_i32_1 = arith.constant 0 : i32
    return %c0_i32, %c0_i32_0 : i32, i32
  }
  func.func @transform_2(%arg0: i32) -> (i32, i32) {
    %c0_i32 = arith.constant 0 : i32
    %c0_i32_0 = arith.constant 0 : i32
    %c0_i32_1 = arith.constant 0 : i32
    return %c0_i32, %c0_i32_0 : i32, i32
  }
  func.func @transform_3(%arg0: i32) -> (i32, i32) {
    %c0_i32 = arith.constant 0 : i32
    %c0_i32_0 = arith.constant 0 : i32
    %c0_i32_1 = arith.constant 0 : i32
    return %c0_i32, %c0_i32_0 : i32, i32
  }
  func.func @transform_4(%arg0: i32) -> (i32, i32) {
    %c0_i32 = arith.constant 0 : i32
    %c0_i32_0 = arith.constant 0 : i32
    %c0_i32_1 = arith.constant 0 : i32
    return %c0_i32, %c0_i32_0 : i32, i32
  }
  func.func @transform_5(%arg0: i32) -> (i32, i32) {
    %c0_i32 = arith.constant 0 : i32
    %c0_i32_0 = arith.constant 0 : i32
    %c0_i32_1 = arith.constant 0 : i32
    return %c0_i32, %c0_i32_0 : i32, i32
  }
  func.func @transform_6(%arg0: i32) -> (i32, i32) {
    %c0_i32 = arith.constant 0 : i32
    %c0_i32_0 = arith.constant 0 : i32
    %c0_i32_1 = arith.constant 0 : i32
    return %c0_i32, %c0_i32_0 : i32, i32
  }
  func.func @transform_7(%arg0: i32) -> (i32, i32) {
    %c0_i32 = arith.constant 0 : i32
    %c0_i32_0 = arith.constant 0 : i32
    %c0_i32_1 = arith.constant 0 : i32
    return %c0_i32, %c0_i32_0 : i32, i32
  }
}

</mosaic_0001>

<bundles_post_ra>
// kernel: _lambda_.4
= control target key start
LH: loop header
LB: loop body
LE: loop exit
PB: predicated region body
PF: predicated region fallthrough
CT: control target
= control target key end

     0   :  { %vm318_vm0 = vcmask 1044480   ;;  %vm319_vm1 = vcmask 1045504   ;;  %v5639_v0 = vmov 0.0   ;;  %v4241_v2 = vmov 65535   ;;  %s5635_s1 = inlined_call_operand.vmem [shape: bf16[27,128], index: 1, kind: input, shape index: {}]   ;;  %s5636_s0 = inlined_call_operand.vmem [shape: bf16[4,450,27], index: 0, kind: input, shape index: {}]   ;;  %s5637_s2 = inlined_call_operand.vmem [shape: f32[1,128], index: 2, kind: input, shape index: {}]   ;;  %s5638_s3 = inlined_call_operand.vmem [shape: bf16[450,128], index: 3, kind: output, shape index: {}]  }
   0x1   :  { %3638 = vmatprep.subr.bf16.mxu0 %v5639_v0  ;;  %3758 = vmatprep.subr.bf16.mxu1 %v5639_v0  ;;  %v4121_v1 = vld [vmem:[%s5635_s1 + $0x8] sm:$0x3f]   ;;  %v320_v3 = vsel %vm318_vm0, 4294967295, %v4241_v2  ;;  %vm4242_vm2 = vmmov 0   ;;  %v4122_v6 = vld [vmem:[%s5635_s1] sm:$0xff]   ;;  %vm230_vm3 = vcmask 220160  }
   0x2   :  { %v321_v4 = vsel %vm319_vm1, %v320_v3, 0  ;;  %3642 = vmatprep.mubr.msk.bf16.mxu0 %vm4242_vm2, %v5639_v0  ;;  %3762 = vmatprep.mubr.msk.bf16.mxu1 %vm4242_vm2, %v5639_v0  ;;  %v4123_v7 = vld [vmem:[%s5636_s0] sm:$0xff]   ;;  %v4125_v9 = vld [vmem:[%s5636_s0 + $0x8] sm:$0xff]   ;;  %v4127_v11 = vld [vmem:[%s5636_s0 + $0x10] sm:$0xff]  }
   0x3   :  { %v323_v5 = vand.u32 %v4121_v1, %v321_v4  ;;  %v4124_v8 = vld [vmem:[%s5636_s0 + $0xe4] sm:$0xff]   ;;  %v4126_v10 = vld [vmem:[%s5636_s0 + $0xec] sm:$0xff]   ;;  %v4128_v12 = vld [vmem:[%s5636_s0 + $0xf4] sm:$0xff]  }
   0x4   :  { %v4129_v13 = vld [vmem:[%s5636_s0 + $0x18] sm:$0xff]   ;;  %v4131_v15 = vld [vmem:[%s5636_s0 + $0x20] sm:$0xff]   ;;  %v4133_v17 = vld [vmem:[%s5636_s0 + $0x28] sm:$0xff]  }
   0x5   :  { %3639 = vmatpush3.bf16.msra.mxu0 %v323_v5  ;;  %3759 = vmatpush3.bf16.msra.mxu1 %v323_v5  ;;  %v4130_v14 = vld [vmem:[%s5636_s0 + $0xfc] sm:$0xff]   ;;  %v4132_v16 = vld [vmem:[%s5636_s0 + $0x104] sm:$0xff]   ;;  %v4134_v18 = vld [vmem:[%s5636_s0 + $0x10c] sm:$0xff]  }
   0x6   :  { %3640 = vmatprep.subr.bf16.mxu0 %v5639_v0  ;;  %3760 = vmatprep.subr.bf16.mxu1 %v5639_v0  ;;  %v4135_v19 = vld [vmem:[%s5636_s0 + $0x30] sm:$0xff]   ;;  %v4137_v21 = vld [vmem:[%s5636_s0 + $0x38] sm:$0xff]   ;;  %v4139_v23 = vld [vmem:[%s5636_s0 + $0x40] sm:$0xff]  }
   0x7   :  { %v4136_v20 = vld [vmem:[%s5636_s0 + $0x114] sm:$0xff]   ;;  %v4138_v22 = vld [vmem:[%s5636_s0 + $0x11c] sm:$0xff]   ;;  %v4140_v24 = vld [vmem:[%s5636_s0 + $0x124] sm:$0xff]  }
   0x8   :  { %v4141_v25 = vld [vmem:[%s5636_s0 + $0x48] sm:$0xff]   ;;  %v4143_v27 = vld [vmem:[%s5636_s0 + $0x50] sm:$0xff]   ;;  %v4145_v29 = vld [vmem:[%s5636_s0 + $0x58] sm:$0xff]  }
   0x9   :  { %3641 = vmatpush3.bf16.msra.mxu0 %v4122_v6  ;;  %3761 = vmatpush3.bf16.msra.mxu1 %v4122_v6  ;;  %v4142_v26 = vld [vmem:[%s5636_s0 + $0x12c] sm:$0xff]   ;;  %v4144_v28 = vld [vmem:[%s5636_s0 + $0x134] sm:$0xff]   ;;  %v4146_v30 = vld [vmem:[%s5636_s0 + $0x13c] sm:$0xff]  }
   0xa   :  { %3878 = vmatprep.subr.bf16.mxu0 %v5639_v0  ;;  %3998 = vmatprep.subr.bf16.mxu1 %v5639_v0  ;;  %v4147_v31 = vld [vmem:[%s5636_s0 + $0x60] sm:$0xff]   ;;  %v4149_v33 = vld [vmem:[%s5636_s0 + $0x68] sm:$0xff]   ;;  %v4151_v35 = vld [vmem:[%s5636_s0 + $0x70] sm:$0xff]  }
   0xb   :  { %v4148_v32 = vld [vmem:[%s5636_s0 + $0x144] sm:$0xff]   ;;  %v4150_v34 = vld [vmem:[%s5636_s0 + $0x14c] sm:$0xff]   ;;  %v4152_v36 = vld [vmem:[%s5636_s0 + $0x154] sm:$0xff]  }
   0xc   :  { %3643 = vmatmul.mubr.msk.bf16.vlgmr.msra.gmra.mxu0 %vm230_vm3, %v4123_v7  ;;  %3763 = vmatmul.mubr.msk.bf16.vlgmr.msra.gmra.mxu1 %vm230_vm3, %v4124_v8  ;;  %v4153_v37 = vld [vmem:[%s5636_s0 + $0x78] sm:$0xff]   ;;  %v4155_v39 = vld [vmem:[%s5636_s0 + $0x80] sm:$0xff]   ;;  %v4157_v41 = vld [vmem:[%s5636_s0 + $0x88] sm:$0xff]  }
   0xd   :  { %3879 = vmatpush3.bf16.msra.mxu0 %v323_v5  ;;  %3999 = vmatpush3.bf16.msra.mxu1 %v323_v5  ;;  %v4154_v38 = vld [vmem:[%s5636_s0 + $0x15c] sm:$0xff]   ;;  %v4156_v40 = vld [vmem:[%s5636_s0 + $0x164] sm:$0xff]   ;;  %v4158_v42 = vld [vmem:[%s5636_s0 + $0x16c] sm:$0xff]  }
   0xe   :  { %3646 = vmatprep.mubr.msk.bf16.mxu0 %vm4242_vm2, %v5639_v0  ;;  %3766 = vmatprep.mubr.msk.bf16.mxu1 %vm4242_vm2, %v5639_v0  ;;  %v4159_v43 = vld [vmem:[%s5636_s0 + $0x90] sm:$0xff]   ;;  %v4161_v45 = vld [vmem:[%s5636_s0 + $0x98] sm:$0xff]   ;;  %v4163_v47 = vld [vmem:[%s5636_s0 + $0xa0] sm:$0xff]  }
   0xf   :  { %3880 = vmatprep.subr.bf16.mxu0 %v5639_v0  ;;  %4000 = vmatprep.subr.bf16.mxu1 %v5639_v0  ;;  %v4160_v44 = vld [vmem:[%s5636_s0 + $0x174] sm:$0xff]   ;;  %v4162_v46 = vld [vmem:[%s5636_s0 + $0x17c] sm:$0xff]   ;;  %v4164_v48 = vld [vmem:[%s5636_s0 + $0x184] sm:$0xff]  }
  0x10   :  { %v4165_v49 = vld [vmem:[%s5636_s0 + $0xa8] sm:$0xff]   ;;  %v4167_v51 = vld [vmem:[%s5636_s0 + $0xb0] sm:$0xff]   ;;  %v4169_v53 = vld [vmem:[%s5636_s0 + $0xb8] sm:$0xff]  }
  0x11   :  { %3881 = vmatpush3.bf16.msra.mxu0 %v4122_v6  ;;  %4001 = vmatpush3.bf16.msra.mxu1 %v4122_v6  ;;  %v4166_v50 = vld [vmem:[%s5636_s0 + $0x18c] sm:$0xff]   ;;  %v4168_v52 = vld [vmem:[%s5636_s0 + $0x194] sm:$0xff]   ;;  %v4170_v54 = vld [vmem:[%s5636_s0 + $0x19c] sm:$0xff]  }
  0x12   :  { %v4171_v55 = vld [vmem:[%s5636_s0 + $0xc0] sm:$0xff]   ;;  %v4173_v1 = vld [vmem:[%s5636_s0 + $0xc8] sm:$0xff]  }
  0x13   :  { %v4172_v56 = vld [vmem:[%s5636_s0 + $0x1a4] sm:$0xff]   ;;  %v4174_v2 = vld [vmem:[%s5636_s0 + $0x1ac] sm:$0xff]  }
  0x14   :  { %3647 = vmatmul.mubr.msk.bf16.gmra.mxu0 %vm230_vm3, %v4125_v9  ;;  %3767 = vmatmul.mubr.msk.bf16.gmra.mxu1 %vm230_vm3, %v4126_v10 }
  0x15   :  { %3650 = vmatprep.mubr.msk.bf16.mxu0 %vm4242_vm2, %v5639_v0  ;;  %3770 = vmatprep.mubr.msk.bf16.mxu1 %vm4242_vm2, %v5639_v0 }
  0x1c   :  { %3651 = vmatmul.mubr.msk.bf16.gmra.mxu0 %vm230_vm3, %v4127_v11  ;;  %3771 = vmatmul.mubr.msk.bf16.gmra.mxu1 %vm230_vm3, %v4128_v12 }
  0x1d   :  { %3654 = vmatprep.mubr.msk.bf16.mxu0 %vm4242_vm2, %v5639_v0  ;;  %3774 = vmatprep.mubr.msk.bf16.mxu1 %vm4242_vm2, %v5639_v0 }
  0x24   :  { %3655 = vmatmul.mubr.msk.bf16.gmra.mxu0 %vm230_vm3, %v4129_v13  ;;  %3775 = vmatmul.mubr.msk.bf16.gmra.mxu1 %vm230_vm3, %v4130_v14  ;;  %v4175_v13 = vld [vmem:[%s5636_s0 + $0xd0] sm:$0xff]  }
  0x25   :  { %3658 = vmatprep.mubr.msk.bf16.mxu0 %vm4242_vm2, %v5639_v0  ;;  %3778 = vmatprep.mubr.msk.bf16.mxu1 %vm4242_vm2, %v5639_v0  ;;  %v4176_v14 = vld [vmem:[%s5636_s0 + $0x1b4] sm:$0xff]  }
  0x2c   :  { %3659 = vmatmul.mubr.msk.bf16.gmra.mxu0 %vm230_vm3, %v4131_v15  ;;  %3779 = vmatmul.mubr.msk.bf16.gmra.mxu1 %vm230_vm3, %v4132_v16 }
  0x2d   :  { %3662 = vmatprep.mubr.msk.bf16.mxu0 %vm4242_vm2, %v5639_v0  ;;  %3782 = vmatprep.mubr.msk.bf16.mxu1 %vm4242_vm2, %v5639_v0 }
  0x34   :  { %3663 = vmatmul.mubr.msk.bf16.gmra.mxu0 %vm230_vm3, %v4133_v17  ;;  %3783 = vmatmul.mubr.msk.bf16.gmra.mxu1 %vm230_vm3, %v4134_v18 }
  0x35   :  { %3666 = vmatprep.mubr.msk.bf16.mxu0 %vm4242_vm2, %v5639_v0  ;;  %3786 = vmatprep.mubr.msk.bf16.mxu1 %vm4242_vm2, %v5639_v0 }
  0x3c   :  { %3667 = vmatmul.mubr.msk.bf16.gmra.mxu0 %vm230_vm3, %v4135_v19  ;;  %3787 = vmatmul.mubr.msk.bf16.gmra.mxu1 %vm230_vm3, %v4136_v20 }
  0x3d   :  { %3670 = vmatprep.mubr.msk.bf16.mxu0 %vm4242_vm2, %v5639_v0  ;;  %3790 = vmatprep.mubr.msk.bf16.mxu1 %vm4242_vm2, %v5639_v0 }
  0x44   :  { %3671 = vmatmul.mubr.msk.bf16.gmra.mxu0 %vm230_vm3, %v4137_v21  ;;  %3791 = vmatmul.mubr.msk.bf16.gmra.mxu1 %vm230_vm3, %v4138_v22 }
  0x45   :  { %3674 = vmatprep.mubr.msk.bf16.mxu0 %vm4242_vm2, %v5639_v0  ;;  %3794 = vmatprep.mubr.msk.bf16.mxu1 %vm4242_vm2, %v5639_v0 }
  0x4c   :  { %3675 = vmatmul.mubr.msk.bf16.gmra.mxu0 %vm230_vm3, %v4139_v23  ;;  %3795 = vmatmul.mubr.msk.bf16.gmra.mxu1 %vm230_vm3, %v4140_v24 }
  0x4d   :  { %3678 = vmatprep.mubr.msk.bf16.mxu0 %vm4242_vm2, %v5639_v0  ;;  %3798 = vmatprep.mubr.msk.bf16.mxu1 %vm4242_vm2, %v5639_v0 }
  0x54   :  { %3679 = vmatmul.mubr.msk.bf16.gmra.mxu0 %vm230_vm3, %v4141_v25  ;;  %3799 = vmatmul.mubr.msk.bf16.gmra.mxu1 %vm230_vm3, %v4142_v26  ;;  %v4177_v25 = vld [vmem:[%s5636_s0 + $0xd8] sm:$0xff]  }
  0x55   :  { %3682 = vmatprep.mubr.msk.bf16.mxu0 %vm4242_vm2, %v5639_v0  ;;  %3802 = vmatprep.mubr.msk.bf16.mxu1 %vm4242_vm2, %v5639_v0  ;;  %v4178_v26 = vld [vmem:[%s5636_s0 + $0x1bc] sm:$0xff]  }
  0x5c   :  { %3683 = vmatmul.mubr.msk.bf16.gmra.mxu0 %vm230_vm3, %v4143_v27  ;;  %3803 = vmatmul.mubr.msk.bf16.gmra.mxu1 %vm230_vm3, %v4144_v28 }
  0x5d   :  { %3686 = vmatprep.mubr.msk.bf16.mxu0 %vm4242_vm2, %v5639_v0  ;;  %3806 = vmatprep.mubr.msk.bf16.mxu1 %vm4242_vm2, %v5639_v0 }
  0x64   :  { %3687 = vmatmul.mubr.msk.bf16.gmra.mxu0 %vm230_vm3, %v4145_v29  ;;  %3807 = vmatmul.mubr.msk.bf16.gmra.mxu1 %vm230_vm3, %v4146_v30 }
  0x65   :  { %3690 = vmatprep.mubr.msk.bf16.mxu0 %vm4242_vm2, %v5639_v0  ;;  %3810 = vmatprep.mubr.msk.bf16.mxu1 %vm4242_vm2, %v5639_v0 }
  0x6c   :  { %3691 = vmatmul.mubr.msk.bf16.gmra.mxu0 %vm230_vm3, %v4147_v31  ;;  %3811 = vmatmul.mubr.msk.bf16.gmra.mxu1 %vm230_vm3, %v4148_v32 }
  0x6d   :  { %3694 = vmatprep.mubr.msk.bf16.mxu0 %vm4242_vm2, %v5639_v0  ;;  %3814 = vmatprep.mubr.msk.bf16.mxu1 %vm4242_vm2, %v5639_v0 }
  0x74   :  { %3695 = vmatmul.mubr.msk.bf16.gmra.mxu0 %vm230_vm3, %v4149_v33  ;;  %3815 = vmatmul.mubr.msk.bf16.gmra.mxu1 %vm230_vm3, %v4150_v34 }
  0x75   :  { %3698 = vmatprep.mubr.msk.bf16.mxu0 %vm4242_vm2, %v5639_v0  ;;  %3818 = vmatprep.mubr.msk.bf16.mxu1 %vm4242_vm2, %v5639_v0 }
  0x7c   :  { %3699 = vmatmul.mubr.msk.bf16.gmra.mxu0 %vm230_vm3, %v4151_v35  ;;  %3819 = vmatmul.mubr.msk.bf16.gmra.mxu1 %vm230_vm3, %v4152_v36 }
  0x7d   :  { %3702 = vmatprep.mubr.msk.bf16.mxu0 %vm4242_vm2, %v5639_v0  ;;  %3822 = vmatprep.mubr.msk.bf16.mxu1 %vm4242_vm2, %v5639_v0 }
  0x84   :  { %3703 = vmatmul.mubr.msk.bf16.gmra.mxu0 %vm230_vm3, %v4153_v37  ;;  %3823 = vmatmul.mubr.msk.bf16.gmra.mxu1 %vm230_vm3, %v4154_v38  ;;  %v4179_v37 = vld [vmem:[%s5636_s0 + $0xe0] ss:$0 sps:$4 sm:$0x11]   ;;  %v4180_v38 = vld [vmem:[%s5636_s0 + $0x1c4] ss:$0 sps:$4 sm:$0x11]  }
  0x85   :  { %3706 = vmatprep.mubr.msk.bf16.mxu0 %vm4242_vm2, %v5639_v0  ;;  %3826 = vmatprep.mubr.msk.bf16.mxu1 %vm4242_vm2, %v5639_v0 }
  0x8c   :  { %3707 = vmatmul.mubr.msk.bf16.gmra.mxu0 %vm230_vm3, %v4155_v39  ;;  %3827 = vmatmul.mubr.msk.bf16.gmra.mxu1 %vm230_vm3, %v4156_v40 }
  0x8d   :  { %3710 = vmatprep.mubr.msk.bf16.mxu0 %vm4242_vm2, %v5639_v0  ;;  %3830 = vmatprep.mubr.msk.bf16.mxu1 %vm4242_vm2, %v5639_v0 }
  0x94   :  { %3711 = vmatmul.mubr.msk.bf16.gmra.mxu0 %vm230_vm3, %v4157_v41  ;;  %3831 = vmatmul.mubr.msk.bf16.gmra.mxu1 %vm230_vm3, %v4158_v42 }
  0x95   :  { %3714 = vmatprep.mubr.msk.bf16.mxu0 %vm4242_vm2, %v5639_v0  ;;  %3834 = vmatprep.mubr.msk.bf16.mxu1 %vm4242_vm2, %v5639_v0 }
  0x9c   :  { %3715 = vmatmul.mubr.msk.bf16.gmra.mxu0 %vm230_vm3, %v4159_v43  ;;  %3835 = vmatmul.mubr.msk.bf16.gmra.mxu1 %vm230_vm3, %v4160_v44 }
  0x9d   :  { %3718 = vmatprep.mubr.msk.bf16.mxu0 %vm4242_vm2, %v5639_v0  ;;  %3838 = vmatprep.mubr.msk.bf16.mxu1 %vm4242_vm2, %v5639_v0 }
  0xa4   :  { %3719 = vmatmul.mubr.msk.bf16.gmra.mxu0 %vm230_vm3, %v4161_v45  ;;  %3839 = vmatmul.mubr.msk.bf16.gmra.mxu1 %vm230_vm3, %v4162_v46 }
  0xa5   :  { %3722 = vmatprep.mubr.msk.bf16.mxu0 %vm4242_vm2, %v5639_v0  ;;  %3842 = vmatprep.mubr.msk.bf16.mxu1 %vm4242_vm2, %v5639_v0 }
  0xac   :  { %3723 = vmatmul.mubr.msk.bf16.gmra.mxu0 %vm230_vm3, %v4163_v47  ;;  %3843 = vmatmul.mubr.msk.bf16.gmra.mxu1 %vm230_vm3, %v4164_v48 }
  0xad   :  { %3726 = vmatprep.mubr.msk.bf16.mxu0 %vm4242_vm2, %v5639_v0  ;;  %3846 = vmatprep.mubr.msk.bf16.mxu1 %vm4242_vm2, %v5639_v0 }
  0xb4   :  { %3727 = vmatmul.mubr.msk.bf16.gmra.mxu0 %vm230_vm3, %v4165_v49  ;;  %3847 = vmatmul.mubr.msk.bf16.gmra.mxu1 %vm230_vm3, %v4166_v50  ;;  %v4181_v49 = vld [vmem:[%s5636_s0 + $0x1c8] sm:$0xff]  }
  0xb5   :  { %3730 = vmatprep.mubr.msk.bf16.mxu0 %vm4242_vm2, %v5639_v0  ;;  %3850 = vmatprep.mubr.msk.bf16.mxu1 %vm4242_vm2, %v5639_v0  ;;  %v4182_v50 = vld [vmem:[%s5636_s0 + $0x2ac] sm:$0xff]  }
  0xbc   :  { %3731 = vmatmul.mubr.msk.bf16.gmra.mxu0 %vm230_vm3, %v4167_v51  ;;  %3851 = vmatmul.mubr.msk.bf16.gmra.mxu1 %vm230_vm3, %v4168_v52 }
  0xbd   :  { %3734 = vmatprep.mubr.msk.bf16.mxu0 %vm4242_vm2, %v5639_v0  ;;  %3854 = vmatprep.mubr.msk.bf16.mxu1 %vm4242_vm2, %v5639_v0 }
  0xc4   :  { %3735 = vmatmul.mubr.msk.bf16.gmra.mxu0 %vm230_vm3, %v4169_v53  ;;  %3855 = vmatmul.mubr.msk.bf16.gmra.mxu1 %vm230_vm3, %v4170_v54 }
  0xc5   :  { %3738 = vmatprep.mubr.msk.bf16.mxu0 %vm4242_vm2, %v5639_v0  ;;  %3858 = vmatprep.mubr.msk.bf16.mxu1 %vm4242_vm2, %v5639_v0 }
  0xcc   :  { %v4575_v57 = vpop.f32.mrf.mxu0  ;;  %3739 = vmatmul.mubr.msk.bf16.gmra.mxu0 %vm230_vm3, %v4171_v55  ;;  %v4578_v58 = vpop.f32.mrf.mxu1  ;;  %3859 = vmatmul.mubr.msk.bf16.gmra.mxu1 %vm230_vm3, %v4172_v56 }
  0xcd   :  { %3742 = vmatprep.mubr.msk.bf16.mxu0 %vm4242_vm2, %v5639_v0  ;;  %3862 = vmatprep.mubr.msk.bf16.mxu1 %vm4242_vm2, %v5639_v0 }
  0xce   :  { %v3644_v60 = vpop.f32.mrf.mxu0  ;;  %v3764_v61 = vpop.f32.mrf.mxu1 }
  0xd0   :  { %v4587_v62 = vpop.f32.mrf.mxu0  ;;  %v4589_v63 = vpop.f32.mrf.mxu1 }
  0xd2   :  { %v3645_v4 = vpop.f32.mrf.mxu0  ;;  %v3765_v5 = vpop.f32.mrf.mxu1 }
  0xd3   :  { %v4183_v4 = vld [vmem:[%s5636_s0 + $0x1d0] sm:$0xff]  }
  0xd4   :  { %v4599_v6 = vpop.f32.mrf.mxu0  ;;  %3743 = vmatmul.mubr.msk.bf16.gmra.mxu0 %vm230_vm3, %v4173_v1  ;;  %v4602_v7 = vpop.f32.mrf.mxu1  ;;  %3863 = vmatmul.mubr.msk.bf16.gmra.mxu1 %vm230_vm3, %v4174_v2  ;;  %v4184_v5 = vld [vmem:[%s5636_s0 + $0x2b4] sm:$0xff]  }
  0xd5   :  { %3746 = vmatprep.mubr.msk.bf16.mxu0 %vm4242_vm2, %v5639_v0  ;;  %3866 = vmatprep.mubr.msk.bf16.mxu1 %vm4242_vm2, %v5639_v0 }
  0xd6   :  { %v3648_v9 = vpop.f32.mrf.mxu0  ;;  %v3768_v10 = vpop.f32.mrf.mxu1 }
  0xd8   :  { %v4611_v11 = vpop.f32.mrf.mxu0  ;;  %v4613_v12 = vpop.f32.mrf.mxu1 }
  0xda   :  { %v3649_v16 = vpop.f32.mrf.mxu0  ;;  %v3769_v17 = vpop.f32.mrf.mxu1 }
  0xdc   :  { %v4623_v18 = vpop.f32.mrf.mxu0  ;;  %3747 = vmatmul.mubr.msk.bf16.gmra.mxu0 %vm230_vm3, %v4175_v13  ;;  %v4626_v19 = vpop.f32.mrf.mxu1  ;;  %3867 = vmatmul.mubr.msk.bf16.gmra.mxu1 %vm230_vm3, %v4176_v14 }
  0xdd   :  { %3750 = vmatprep.mubr.msk.bf16.mxu0 %vm4242_vm2, %v5639_v0  ;;  %3870 = vmatprep.mubr.msk.bf16.mxu1 %vm4242_vm2, %v5639_v0 }
  0xde   :  { %v3652_v21 = vpop.f32.mrf.mxu0  ;;  %v3772_v22 = vpop.f32.mrf.mxu1 }
  0xe0   :  { %v4635_v23 = vpop.f32.mrf.mxu0  ;;  %v4637_v24 = vpop.f32.mrf.mxu1 }
  0xe2   :  { %v3653_v28 = vpop.f32.mrf.mxu0  ;;  %v3773_v29 = vpop.f32.mrf.mxu1 }
  0xe3   :  { %v4185_v28 = vld [vmem:[%s5636_s0 + $0x1d8] sm:$0xff]  }
  0xe4   :  { %v4647_v30 = vpop.f32.mrf.mxu0  ;;  %3751 = vmatmul.mubr.msk.bf16.gmra.mxu0 %vm230_vm3, %v4177_v25  ;;  %v4650_v31 = vpop.f32.mrf.mxu1  ;;  %3871 = vmatmul.mubr.msk.bf16.gmra.mxu1 %vm230_vm3, %v4178_v26  ;;  %v4186_v29 = vld [vmem:[%s5636_s0 + $0x2bc] sm:$0xff]  }
  0xe5   :  { %3754 = vmatprep.mubr.msk.bf16.mxu0 %vm4242_vm2, %v5639_v0  ;;  %3874 = vmatprep.mubr.msk.bf16.mxu1 %vm4242_vm2, %v5639_v0 }
  0xe6   :  { %v3656_v33 = vpop.f32.mrf.mxu0  ;;  %v3776_v34 = vpop.f32.mrf.mxu1 }
  0xe8   :  { %v4659_v35 = vpop.f32.mrf.mxu0  ;;  %v4661_v36 = vpop.f32.mrf.mxu1 }
  0xea   :  { %v3657_v40 = vpop.f32.mrf.mxu0  ;;  %v3777_v41 = vpop.f32.mrf.mxu1 }
  0xec   :  { %v4671_v42 = vpop.f32.mrf.mxu0  ;;  %3755 = vmatmul.mubr.msk.bf16.gmra.mxu0 %vm230_vm3, %v4179_v37  ;;  %v4674_v43 = vpop.f32.mrf.mxu1  ;;  %3875 = vmatmul.mubr.msk.bf16.gmra.mxu1 %vm230_vm3, %v4180_v38 }
  0xed   :  { %3882 = vmatprep.mubr.msk.bf16.mxu0 %vm4242_vm2, %v5639_v0  ;;  %4002 = vmatprep.mubr.msk.bf16.mxu1 %vm4242_vm2, %v5639_v0 }
  0xee   :  { %v3660_v45 = vpop.f32.mrf.mxu0  ;;  %v3780_v46 = vpop.f32.mrf.mxu1 }
  0xf0   :  { %v4683_v47 = vpop.f32.mrf.mxu0  ;;  %v4685_v48 = vpop.f32.mrf.mxu1 }
  0xf2   :  { %v3661_v52 = vpop.f32.mrf.mxu0  ;;  %v3781_v53 = vpop.f32.mrf.mxu1 }
  0xf3   :  { %v4187_v52 = vld [vmem:[%s5636_s0 + $0x1e0] sm:$0xff]  }
  0xf4   :  { %v4695_v54 = vpop.f32.mrf.mxu0  ;;  %v4697_v55 = vpop.f32.mrf.mxu1  ;;  %3883 = vmatmul.mubr.msk.bf16.vlgmr.msra.gmra.mxu0 %vm230_vm3, %v4181_v49  ;;  %4003 = vmatmul.mubr.msk.bf16.vlgmr.msra.gmra.mxu1 %vm230_vm3, %v4182_v50  ;;  %v4188_v53 = vld [vmem:[%s5636_s0 + $0x2c4] sm:$0xff]  }
  0xf5   :  { %3886 = vmatprep.mubr.msk.bf16.mxu0 %vm4242_vm2, %v5639_v0  ;;  %4006 = vmatprep.mubr.msk.bf16.mxu1 %vm4242_vm2, %v5639_v0 }
  0xf6   :  { %v3664_v60 = vpop.f32.mrf.mxu0  ;;  %v3784_v61 = vpop.f32.mrf.mxu1 }
  0xf8   :  { %v4707_v1 = vpop.f32.mrf.mxu0  ;;  %v4709_v2 = vpop.f32.mrf.mxu1 }
  0xfa   :  { %v3665_v10 = vpop.f32.mrf.mxu0  ;;  %v3785_v13 = vpop.f32.mrf.mxu1 }
  0xfc   :  { %v4719_v14 = vpop.f32.mrf.mxu0  ;;  %v4721_v16 = vpop.f32.mrf.mxu1  ;;  %3887 = vmatmul.mubr.msk.bf16.gmra.mxu0 %vm230_vm3, %v4183_v4  ;;  %4007 = vmatmul.mubr.msk.bf16.gmra.mxu1 %vm230_vm3, %v4184_v5 }
  0xfd   :  { %3890 = vmatprep.mubr.msk.bf16.mxu0 %vm4242_vm2, %v5639_v0  ;;  %4010 = vmatprep.mubr.msk.bf16.mxu1 %vm4242_vm2, %v5639_v0 }
  0xfe   :  { %v3668_v21 = vpop.f32.mrf.mxu0  ;;  %v3788_v22 = vpop.f32.mrf.mxu1 }
 0x100   :  { %v4731_v25 = vpop.f32.mrf.mxu0  ;;  %v4733_v26 = vpop.f32.mrf.mxu1 }
 0x102   :  { %v3669_v34 = vpop.f32.mrf.mxu0  ;;  %v3789_v37 = vpop.f32.mrf.mxu1 }
 0x103   :  { %v4189_v34 = vld [vmem:[%s5636_s0 + $0x1e8] sm:$0xff]  }
 0x104   :  { %v4743_v38 = vpop.f32.mrf.mxu0  ;;  %v4745_v40 = vpop.f32.mrf.mxu1  ;;  %3891 = vmatmul.mubr.msk.bf16.gmra.mxu0 %vm230_vm3, %v4185_v28  ;;  %4011 = vmatmul.mubr.msk.bf16.gmra.mxu1 %vm230_vm3, %v4186_v29  ;;  %v4190_v37 = vld [vmem:[%s5636_s0 + $0x2cc] sm:$0xff]  }
 0x105   :  { %3894 = vmatprep.mubr.msk.bf16.mxu0 %vm4242_vm2, %v5639_v0  ;;  %4014 = vmatprep.mubr.msk.bf16.mxu1 %vm4242_vm2, %v5639_v0 }
 0x106   :  { %v3672_v45 = vpop.f32.mrf.mxu0  ;;  %v3792_v46 = vpop.f32.mrf.mxu1 }
 0x108   :  { %v4755_v49 = vpop.f32.mrf.mxu0  ;;  %v4757_v50 = vpop.f32.mrf.mxu1 }
 0x10a   :  { %v3673_v61 = vpop.f32.mrf.mxu0  ;;  %v3793_v4 = vpop.f32.mrf.mxu1 }
 0x10c   :  { %v4767_v5 = vpop.f32.mrf.mxu0  ;;  %v4769_v10 = vpop.f32.mrf.mxu1  ;;  %3895 = vmatmul.mubr.msk.bf16.gmra.mxu0 %vm230_vm3, %v4187_v52  ;;  %4015 = vmatmul.mubr.msk.bf16.gmra.mxu1 %vm230_vm3, %v4188_v53 }
 0x10d   :  { %3898 = vmatprep.mubr.msk.bf16.mxu0 %vm4242_vm2, %v5639_v0  ;;  %4018 = vmatprep.mubr.msk.bf16.mxu1 %vm4242_vm2, %v5639_v0 }
 0x10e   :  { %v3676_v21 = vpop.f32.mrf.mxu0  ;;  %v3796_v22 = vpop.f32.mrf.mxu1 }
 0x110   :  { %v4779_v28 = vpop.f32.mrf.mxu0  ;;  %v4781_v29 = vpop.f32.mrf.mxu1 }
 0x112   :  { %v3677_v46 = vpop.f32.mrf.mxu0  ;;  %v3797_v52 = vpop.f32.mrf.mxu1 }
 0x114   :  { %v4791_v53 = vpop.f32.mrf.mxu0  ;;  %v4793_v61 = vpop.f32.mrf.mxu1  ;;  %3899 = vmatmul.mubr.msk.bf16.gmra.mxu0 %vm230_vm3, %v4189_v34  ;;  %4019 = vmatmul.mubr.msk.bf16.gmra.mxu1 %vm230_vm3, %v4190_v37  ;;  %v4191_v34 = vld [vmem:[%s5636_s0 + $0x1f0] sm:$0xff]  }
 0x115   :  { %3902 = vmatprep.mubr.msk.bf16.mxu0 %vm4242_vm2, %v5639_v0  ;;  %4022 = vmatprep.mubr.msk.bf16.mxu1 %vm4242_vm2, %v5639_v0  ;;  %v4192_v37 = vld [vmem:[%s5636_s0 + $0x2d4] sm:$0xff]  }
 0x116   :  { %v3680_v21 = vpop.f32.mrf.mxu0  ;;  %v3800_v22 = vpop.f32.mrf.mxu1 }
 0x118   :  { %v4803_v46 = vpop.f32.mrf.mxu0  ;;  %v4805_v52 = vpop.f32.mrf.mxu1 }
 0x11a   :  { %v3681_v45 = vpop.f32.mrf.mxu0  ;;  %v3801_v13 = vpop.f32.mrf.mxu1 }
 0x11c   :  { %v4815_v60 = vpop.f32.mrf.mxu0  ;;  %v4817_v21 = vpop.f32.mrf.mxu1  ;;  %3903 = vmatmul.mubr.msk.bf16.gmra.mxu0 %vm230_vm3, %v4191_v34  ;;  %4023 = vmatmul.mubr.msk.bf16.gmra.mxu1 %vm230_vm3, %v4192_v37  ;;  %v4193_v34 = vld [vmem:[%s5636_s0 + $0x1f8] sm:$0xff]  }
 0x11d   :  { %3906 = vmatprep.mubr.msk.bf16.mxu0 %vm4242_vm2, %v5639_v0  ;;  %4026 = vmatprep.mubr.msk.bf16.mxu1 %vm4242_vm2, %v5639_v0  ;;  %v4194_v37 = vld [vmem:[%s5636_s0 + $0x2dc] sm:$0xff]  }
 0x11e   :  { %v3684_v4 = vpop.f32.mrf.mxu0  ;;  %v3804_v45 = vpop.f32.mrf.mxu1 }
 0x120   :  { %v4827_v13 = vpop.f32.mrf.mxu0  ;;  %v4829_v41 = vpop.f32.mrf.mxu1 }
 0x122   :  { %v3685_v33 = vpop.f32.mrf.mxu0  ;;  %v3805_v17 = vpop.f32.mrf.mxu1 }
 0x124   :  { %v4839_v9 = vpop.f32.mrf.mxu0  ;;  %v4841_v4 = vpop.f32.mrf.mxu1  ;;  %3907 = vmatmul.mubr.msk.bf16.gmra.mxu0 %vm230_vm3, %v4193_v34  ;;  %4027 = vmatmul.mubr.msk.bf16.gmra.mxu1 %vm230_vm3, %v4194_v37  ;;  %v4195_v34 = vld [vmem:[%s5636_s0 + $0x200] sm:$0xff]  }
 0x125   :  { %3910 = vmatprep.mubr.msk.bf16.mxu0 %vm4242_vm2, %v5639_v0  ;;  %4030 = vmatprep.mubr.msk.bf16.mxu1 %vm4242_vm2, %v5639_v0  ;;  %v4196_v37 = vld [vmem:[%s5636_s0 + $0x2e4] sm:$0xff]  }
 0x126   :  { %v3688_v22 = vpop.f32.mrf.mxu0  ;;  %v3808_v33 = vpop.f32.mrf.mxu1 }
 0x128   :  { %v4851_v17 = vpop.f32.mrf.mxu0  ;;  %v4853_v56 = vpop.f32.mrf.mxu1 }
 0x12a   :  { %v3689_v51 = vpop.f32.mrf.mxu0  ;;  %v3809_v44 = vpop.f32.mrf.mxu1 }
 0x12c   :  { %v4863_v39 = vpop.f32.mrf.mxu0  ;;  %v4865_v22 = vpop.f32.mrf.mxu1  ;;  %3911 = vmatmul.mubr.msk.bf16.gmra.mxu0 %vm230_vm3, %v4195_v34  ;;  %4031 = vmatmul.mubr.msk.bf16.gmra.mxu1 %vm230_vm3, %v4196_v37  ;;  %v4197_v34 = vld [vmem:[%s5636_s0 + $0x208] sm:$0xff]  }
 0x12d   :  { %5707 = vst [vmem:[#allocation2_spill] sm:$0xff] %v4863_v39  ;;  %5708 = vst [vmem:[#allocation3_spill] sm:$0xff] %v4865_v22  ;;  %3914 = vmatprep.mubr.msk.bf16.mxu0 %vm4242_vm2, %v5639_v0  ;;  %4034 = vmatprep.mubr.msk.bf16.mxu1 %vm4242_vm2, %v5639_v0  ;;  %v4198_v37 = vld [vmem:[%s5636_s0 + $0x2ec] sm:$0xff]   ;;  %v5776_v22 = vmax.f32 %v4599_v6, %v4602_v7  ;;  %v4234_v6 = vld [vmem:[%s5636_s0 + $0x37c] sm:$0xff]  }
 0x12e   :  { %v3692_v45 = vpop.f32.mrf.mxu0  ;;  %v3812_v51 = vpop.f32.mrf.mxu1 }
 0x130   :  { %v4875_v44 = vpop.f32.mrf.mxu0  ;;  %v4877_v32 = vpop.f32.mrf.mxu1 }
 0x131   :  { %5709 = vst [vmem:[#allocation4_spill] sm:$0xff] %v4875_v44  ;;  %5710 = vst [vmem:[#allocation5_spill] sm:$0xff] %v4877_v32 }
 0x132   :  { %v3693_v27 = vpop.f32.mrf.mxu0  ;;  %v3813_v20 = vpop.f32.mrf.mxu1 }
 0x134   :  { %v4887_v15 = vpop.f32.mrf.mxu0  ;;  %v4889_v45 = vpop.f32.mrf.mxu1  ;;  %3915 = vmatmul.mubr.msk.bf16.gmra.mxu0 %vm230_vm3, %v4197_v34  ;;  %4035 = vmatmul.mubr.msk.bf16.gmra.mxu1 %vm230_vm3, %v4198_v37  ;;  %v4199_v34 = vld [vmem:[%s5636_s0 + $0x210] sm:$0xff]  }
 0x135   :  { %5711 = vst [vmem:[#allocation6_spill] sm:$0xff] %v4887_v15  ;;  %5712 = vst [vmem:[#allocation7_spill] sm:$0xff] %v4889_v45  ;;  %3918 = vmatprep.mubr.msk.bf16.mxu0 %vm4242_vm2, %v5639_v0  ;;  %4038 = vmatprep.mubr.msk.bf16.mxu1 %vm4242_vm2, %v5639_v0  ;;  %v4200_v37 = vld [vmem:[%s5636_s0 + $0x2f4] sm:$0xff]   ;;  %v5717_v45 = vmov 0.0  }
 0x136   :  { %v3696_v33 = vpop.f32.mrf.mxu0  ;;  %v3816_v27 = vpop.f32.mrf.mxu1 }
 0x138   :  { %v4899_v20 = vpop.f32.mrf.mxu0  ;;  %v4901_v8 = vpop.f32.mrf.mxu1 }
 0x139   :  { %5713 = vst [vmem:[#allocation8_spill] sm:$0xff] %v4899_v20  ;;  %5714 = vst [vmem:[#allocation9_spill] sm:$0xff] %v4901_v8 }
 0x13a   :  { %v3697_v3 = vpop.f32.mrf.mxu0  ;;  %v3817_v59 = vpop.f32.mrf.mxu1 }
 0x13c   :  { %v4911_v0 = vpop.f32.mrf.mxu0  ;;  %v4913_v33 = vpop.f32.mrf.mxu1  ;;  %3919 = vmatmul.mubr.msk.bf16.gmra.mxu0 %vm230_vm3, %v4199_v34  ;;  %4039 = vmatmul.mubr.msk.bf16.gmra.mxu1 %vm230_vm3, %v4200_v37  ;;  %v4201_v34 = vld [vmem:[%s5636_s0 + $0x218] sm:$0xff]  }
 0x13d   :  { %5715 = vst [vmem:[#allocation10_spill] sm:$0xff] %v4911_v0  ;;  %5716 = vst [vmem:[#allocation11_spill] sm:$0xff] %v4913_v33  ;;  %3922 = vmatprep.mubr.msk.bf16.mxu0 %vm4242_vm2, %v5717_v45  ;;  %4042 = vmatprep.mubr.msk.bf16.mxu1 %vm4242_vm2, %v5717_v45  ;;  %v4202_v37 = vld [vmem:[%s5636_s0 + $0x2fc] sm:$0xff]  }
 0x13e   :  { %v3700_v51 = vpop.f32.mrf.mxu0  ;;  %v3820_v3 = vpop.f32.mrf.mxu1 }
 0x140   :  { %v4923_v59 = vpop.f32.mrf.mxu0  ;;  %v4925_v8 = vpop.f32.mrf.mxu1 }
 0x141   :  { %5718 = vst [vmem:[#allocation12_spill] sm:$0xff] %v4923_v59  ;;  %5719 = vst [vmem:[#allocation13_spill] sm:$0xff] %v4925_v8 }
 0x142   :  { %v3701_v33 = vpop.f32.mrf.mxu0  ;;  %v3821_v0 = vpop.f32.mrf.mxu1 }
 0x144   :  { %v4935_v20 = vpop.f32.mrf.mxu0  ;;  %v4937_v51 = vpop.f32.mrf.mxu1  ;;  %3923 = vmatmul.mubr.msk.bf16.gmra.mxu0 %vm230_vm3, %v4201_v34  ;;  %4043 = vmatmul.mubr.msk.bf16.gmra.mxu1 %vm230_vm3, %v4202_v37  ;;  %v4203_v34 = vld [vmem:[%s5636_s0 + $0x220] sm:$0xff]  }
 0x145   :  { %5720 = vst [vmem:[#allocation14_spill] sm:$0xff] %v4935_v20  ;;  %5721 = vst [vmem:[#allocation15_spill] sm:$0xff] %v4937_v51  ;;  %3926 = vmatprep.mubr.msk.bf16.mxu0 %vm4242_vm2, %v5717_v45  ;;  %4046 = vmatprep.mubr.msk.bf16.mxu1 %vm4242_vm2, %v5717_v45  ;;  %v4204_v37 = vld [vmem:[%s5636_s0 + $0x304] sm:$0xff]  }
 0x146   :  { %v3704_v27 = vpop.f32.mrf.mxu0  ;;  %v3824_v33 = vpop.f32.mrf.mxu1 }
 0x148   :  { %v4947_v0 = vpop.f32.mrf.mxu0  ;;  %v4949_v8 = vpop.f32.mrf.mxu1 }
 0x149   :  { %5722 = vst [vmem:[#allocation16_spill] sm:$0xff] %v4947_v0  ;;  %5723 = vst [vmem:[#allocation17_spill] sm:$0xff] %v4949_v8 }
 0x14a   :  { %v3705_v51 = vpop.f32.mrf.mxu0  ;;  %v3825_v20 = vpop.f32.mrf.mxu1 }
 0x14c   :  { %v4959_v59 = vpop.f32.mrf.mxu0  ;;  %v4961_v27 = vpop.f32.mrf.mxu1  ;;  %3927 = vmatmul.mubr.msk.bf16.gmra.mxu0 %vm230_vm3, %v4203_v34  ;;  %4047 = vmatmul.mubr.msk.bf16.gmra.mxu1 %vm230_vm3, %v4204_v37  ;;  %v4205_v34 = vld [vmem:[%s5636_s0 + $0x228] sm:$0xff]  }
 0x14d   :  { %5724 = vst [vmem:[#allocation18_spill] sm:$0xff] %v4959_v59  ;;  %5725 = vst [vmem:[#allocation19_spill] sm:$0xff] %v4961_v27  ;;  %3930 = vmatprep.mubr.msk.bf16.mxu0 %vm4242_vm2, %v5717_v45  ;;  %4050 = vmatprep.mubr.msk.bf16.mxu1 %vm4242_vm2, %v5717_v45  ;;  %v4206_v37 = vld [vmem:[%s5636_s0 + $0x30c] sm:$0xff]  }
 0x14e   :  { %v3708_v3 = vpop.f32.mrf.mxu0  ;;  %v3828_v51 = vpop.f32.mrf.mxu1 }
 0x150   :  { %v4971_v20 = vpop.f32.mrf.mxu0  ;;  %v4973_v8 = vpop.f32.mrf.mxu1 }
 0x151   :  { %5726 = vst [vmem:[#allocation20_spill] sm:$0xff] %v4971_v20  ;;  %5727 = vst [vmem:[#allocation21_spill] sm:$0xff] %v4973_v8 }
 0x152   :  { %v3709_v27 = vpop.f32.mrf.mxu0  ;;  %v3829_v59 = vpop.f32.mrf.mxu1 }
 0x154   :  { %v4983_v0 = vpop.f32.mrf.mxu0  ;;  %v4985_v3 = vpop.f32.mrf.mxu1  ;;  %3931 = vmatmul.mubr.msk.bf16.gmra.mxu0 %vm230_vm3, %v4205_v34  ;;  %4051 = vmatmul.mubr.msk.bf16.gmra.mxu1 %vm230_vm3, %v4206_v37  ;;  %v4207_v34 = vld [vmem:[%s5636_s0 + $0x230] sm:$0xff]  }
 0x155   :  { %5728 = vst [vmem:[#allocation22_spill] sm:$0xff] %v4983_v0  ;;  %5729 = vst [vmem:[#allocation23_spill] sm:$0xff] %v4985_v3  ;;  %3934 = vmatprep.mubr.msk.bf16.mxu0 %vm4242_vm2, %v5717_v45  ;;  %4054 = vmatprep.mubr.msk.bf16.mxu1 %vm4242_vm2, %v5717_v45  ;;  %v4208_v37 = vld [vmem:[%s5636_s0 + $0x314] sm:$0xff]  }
 0x156   :  { %v3712_v33 = vpop.f32.mrf.mxu0  ;;  %v3832_v27 = vpop.f32.mrf.mxu1 }
 0x158   :  { %v4995_v59 = vpop.f32.mrf.mxu0  ;;  %v4997_v8 = vpop.f32.mrf.mxu1 }
 0x159   :  { %5730 = vst [vmem:[#allocation24_spill] sm:$0xff] %v4995_v59  ;;  %5731 = vst [vmem:[#allocation25_spill] sm:$0xff] %v4997_v8 }
 0x15a   :  { %v3713_v3 = vpop.f32.mrf.mxu0  ;;  %v3833_v0 = vpop.f32.mrf.mxu1 }
 0x15c   :  { %v5007_v20 = vpop.f32.mrf.mxu0  ;;  %v5009_v33 = vpop.f32.mrf.mxu1  ;;  %3935 = vmatmul.mubr.msk.bf16.gmra.mxu0 %vm230_vm3, %v4207_v34  ;;  %4055 = vmatmul.mubr.msk.bf16.gmra.mxu1 %vm230_vm3, %v4208_v37  ;;  %v4209_v34 = vld [vmem:[%s5636_s0 + $0x238] sm:$0xff]  }
 0x15d   :  { %5732 = vst [vmem:[#allocation26_spill] sm:$0xff] %v5007_v20  ;;  %5733 = vst [vmem:[#allocation27_spill] sm:$0xff] %v5009_v33  ;;  %3938 = vmatprep.mubr.msk.bf16.mxu0 %vm4242_vm2, %v5717_v45  ;;  %4058 = vmatprep.mubr.msk.bf16.mxu1 %vm4242_vm2, %v5717_v45  ;;  %v4210_v37 = vld [vmem:[%s5636_s0 + $0x31c] sm:$0xff]  }
 0x15e   :  { %v3716_v51 = vpop.f32.mrf.mxu0  ;;  %v3836_v3 = vpop.f32.mrf.mxu1 }
 0x160   :  { %v5019_v0 = vpop.f32.mrf.mxu0  ;;  %v5021_v8 = vpop.f32.mrf.mxu1 }
 0x161   :  { %5734 = vst [vmem:[#allocation28_spill] sm:$0xff] %v5019_v0  ;;  %5735 = vst [vmem:[#allocation29_spill] sm:$0xff] %v5021_v8 }
 0x162   :  { %v3717_v33 = vpop.f32.mrf.mxu0  ;;  %v3837_v20 = vpop.f32.mrf.mxu1 }
 0x164   :  { %v5031_v59 = vpop.f32.mrf.mxu0  ;;  %v5033_v51 = vpop.f32.mrf.mxu1  ;;  %3939 = vmatmul.mubr.msk.bf16.gmra.mxu0 %vm230_vm3, %v4209_v34  ;;  %4059 = vmatmul.mubr.msk.bf16.gmra.mxu1 %vm230_vm3, %v4210_v37  ;;  %v4211_v34 = vld [vmem:[%s5636_s0 + $0x240] sm:$0xff]  }
 0x165   :  { %5736 = vst [vmem:[#allocation30_spill] sm:$0xff] %v5031_v59  ;;  %5737 = vst [vmem:[#allocation31_spill] sm:$0xff] %v5033_v51  ;;  %3942 = vmatprep.mubr.msk.bf16.mxu0 %vm4242_vm2, %v5717_v45  ;;  %4062 = vmatprep.mubr.msk.bf16.mxu1 %vm4242_vm2, %v5717_v45  ;;  %v4212_v37 = vld [vmem:[%s5636_s0 + $0x324] sm:$0xff]  }
 0x166   :  { %v3720_v27 = vpop.f32.mrf.mxu0  ;;  %v3840_v33 = vpop.f32.mrf.mxu1 }
 0x168   :  { %v5043_v20 = vpop.f32.mrf.mxu0  ;;  %v5045_v8 = vpop.f32.mrf.mxu1 }
 0x169   :  { %5738 = vst [vmem:[#allocation32_spill] sm:$0xff] %v5043_v20  ;;  %5739 = vst [vmem:[#allocation33_spill] sm:$0xff] %v5045_v8 }
 0x16a   :  { %v3721_v51 = vpop.f32.mrf.mxu0  ;;  %v3841_v59 = vpop.f32.mrf.mxu1 }
 0x16c   :  { %v5055_v0 = vpop.f32.mrf.mxu0  ;;  %v5057_v27 = vpop.f32.mrf.mxu1  ;;  %3943 = vmatmul.mubr.msk.bf16.gmra.mxu0 %vm230_vm3, %v4211_v34  ;;  %4063 = vmatmul.mubr.msk.bf16.gmra.mxu1 %vm230_vm3, %v4212_v37  ;;  %v4213_v34 = vld [vmem:[%s5636_s0 + $0x248] sm:$0xff]  }
 0x16d   :  { %5740 = vst [vmem:[#allocation34_spill] sm:$0xff] %v5055_v0  ;;  %5741 = vst [vmem:[#allocation35_spill] sm:$0xff] %v5057_v27  ;;  %3946 = vmatprep.mubr.msk.bf16.mxu0 %vm4242_vm2, %v5717_v45  ;;  %4066 = vmatprep.mubr.msk.bf16.mxu1 %vm4242_vm2, %v5717_v45  ;;  %v4214_v37 = vld [vmem:[%s5636_s0 + $0x32c] sm:$0xff]  }
 0x16e   :  { %v3724_v3 = vpop.f32.mrf.mxu0  ;;  %v3844_v51 = vpop.f32.mrf.mxu1 }
 0x170   :  { %v5067_v59 = vpop.f32.mrf.mxu0  ;;  %v5069_v8 = vpop.f32.mrf.mxu1 }
 0x171   :  { %5742 = vst [vmem:[#allocation36_spill] sm:$0xff] %v5067_v59  ;;  %5743 = vst [vmem:[#allocation37_spill] sm:$0xff] %v5069_v8 }
 0x172   :  { %v3725_v27 = vpop.f32.mrf.mxu0  ;;  %v3845_v0 = vpop.f32.mrf.mxu1 }
 0x174   :  { %v5079_v20 = vpop.f32.mrf.mxu0  ;;  %v5081_v3 = vpop.f32.mrf.mxu1  ;;  %3947 = vmatmul.mubr.msk.bf16.gmra.mxu0 %vm230_vm3, %v4213_v34  ;;  %4067 = vmatmul.mubr.msk.bf16.gmra.mxu1 %vm230_vm3, %v4214_v37  ;;  %v4215_v34 = vld [vmem:[%s5636_s0 + $0x250] sm:$0xff]  }
 0x175   :  { %5744 = vst [vmem:[#allocation38_spill] sm:$0xff] %v5079_v20  ;;  %5745 = vst [vmem:[#allocation39_spill] sm:$0xff] %v5081_v3  ;;  %3950 = vmatprep.mubr.msk.bf16.mxu0 %vm4242_vm2, %v5717_v45  ;;  %4070 = vmatprep.mubr.msk.bf16.mxu1 %vm4242_vm2, %v5717_v45  ;;  %v4216_v37 = vld [vmem:[%s5636_s0 + $0x334] sm:$0xff]  }
 0x176   :  { %v3728_v33 = vpop.f32.mrf.mxu0  ;;  %v3848_v27 = vpop.f32.mrf.mxu1 }
 0x178   :  { %v5091_v0 = vpop.f32.mrf.mxu0  ;;  %v5093_v8 = vpop.f32.mrf.mxu1 }
 0x179   :  { %5746 = vst [vmem:[#allocation40_spill] sm:$0xff] %v5091_v0  ;;  %5747 = vst [vmem:[#allocation41_spill] sm:$0xff] %v5093_v8 }
 0x17a   :  { %v3729_v3 = vpop.f32.mrf.mxu0  ;;  %v3849_v20 = vpop.f32.mrf.mxu1 }
 0x17c   :  { %v5103_v59 = vpop.f32.mrf.mxu0  ;;  %v5105_v33 = vpop.f32.mrf.mxu1  ;;  %3951 = vmatmul.mubr.msk.bf16.gmra.mxu0 %vm230_vm3, %v4215_v34  ;;  %4071 = vmatmul.mubr.msk.bf16.gmra.mxu1 %vm230_vm3, %v4216_v37  ;;  %v4217_v34 = vld [vmem:[%s5636_s0 + $0x258] sm:$0xff]  }
 0x17d   :  { %5748 = vst [vmem:[#allocation42_spill] sm:$0xff] %v5103_v59  ;;  %5749 = vst [vmem:[#allocation43_spill] sm:$0xff] %v5105_v33  ;;  %3954 = vmatprep.mubr.msk.bf16.mxu0 %vm4242_vm2, %v5717_v45  ;;  %4074 = vmatprep.mubr.msk.bf16.mxu1 %vm4242_vm2, %v5717_v45  ;;  %v4218_v37 = vld [vmem:[%s5636_s0 + $0x33c] sm:$0xff]  }
 0x17e   :  { %v3732_v51 = vpop.f32.mrf.mxu0  ;;  %v3852_v3 = vpop.f32.mrf.mxu1 }
 0x180   :  { %v5115_v20 = vpop.f32.mrf.mxu0  ;;  %v5117_v8 = vpop.f32.mrf.mxu1 }
 0x181   :  { %5750 = vst [vmem:[#allocation44_spill] sm:$0xff] %v5115_v20  ;;  %5751 = vst [vmem:[#allocation45_spill] sm:$0xff] %v5117_v8 }
 0x182   :  { %v3733_v33 = vpop.f32.mrf.mxu0  ;;  %v3853_v59 = vpop.f32.mrf.mxu1 }
 0x184   :  { %v5127_v0 = vpop.f32.mrf.mxu0  ;;  %v5129_v51 = vpop.f32.mrf.mxu1  ;;  %3955 = vmatmul.mubr.msk.bf16.gmra.mxu0 %vm230_vm3, %v4217_v34  ;;  %4075 = vmatmul.mubr.msk.bf16.gmra.mxu1 %vm230_vm3, %v4218_v37  ;;  %v4219_v34 = vld [vmem:[%s5636_s0 + $0x260] sm:$0xff]  }
 0x185   :  { %5752 = vst [vmem:[#allocation46_spill] sm:$0xff] %v5127_v0  ;;  %5753 = vst [vmem:[#allocation47_spill] sm:$0xff] %v5129_v51  ;;  %3958 = vmatprep.mubr.msk.bf16.mxu0 %vm4242_vm2, %v5717_v45  ;;  %4078 = vmatprep.mubr.msk.bf16.mxu1 %vm4242_vm2, %v5717_v45  ;;  %v4220_v37 = vld [vmem:[%s5636_s0 + $0x344] sm:$0xff]  }
 0x186   :  { %v3736_v27 = vpop.f32.mrf.mxu0  ;;  %v3856_v33 = vpop.f32.mrf.mxu1 }
 0x188   :  { %v5139_v59 = vpop.f32.mrf.mxu0  ;;  %v5141_v8 = vpop.f32.mrf.mxu1 }
 0x189   :  { %5754 = vst [vmem:[#allocation48_spill] sm:$0xff] %v5139_v59  ;;  %5755 = vst [vmem:[#allocation49_spill] sm:$0xff] %v5141_v8 }
 0x18a   :  { %v3737_v51 = vpop.f32.mrf.mxu0  ;;  %v3857_v0 = vpop.f32.mrf.mxu1 }
 0x18c   :  { %v5151_v20 = vpop.f32.mrf.mxu0  ;;  %v5153_v27 = vpop.f32.mrf.mxu1  ;;  %3959 = vmatmul.mubr.msk.bf16.gmra.mxu0 %vm230_vm3, %v4219_v34  ;;  %4079 = vmatmul.mubr.msk.bf16.gmra.mxu1 %vm230_vm3, %v4220_v37  ;;  %v4221_v34 = vld [vmem:[%s5636_s0 + $0x268] sm:$0xff]  }
 0x18d   :  { %5756 = vst [vmem:[#allocation50_spill] sm:$0xff] %v5151_v20  ;;  %5757 = vst [vmem:[#allocation51_spill] sm:$0xff] %v5153_v27  ;;  %3962 = vmatprep.mubr.msk.bf16.mxu0 %vm4242_vm2, %v5717_v45  ;;  %4082 = vmatprep.mubr.msk.bf16.mxu1 %vm4242_vm2, %v5717_v45  ;;  %v4222_v37 = vld [vmem:[%s5636_s0 + $0x34c] sm:$0xff]  }
 0x18e   :  { %v3740_v3 = vpop.f32.mrf.mxu0  ;;  %v3860_v51 = vpop.f32.mrf.mxu1 }
 0x190   :  { %v5163_v0 = vpop.f32.mrf.mxu0  ;;  %v5165_v8 = vpop.f32.mrf.mxu1 }
 0x191   :  { %5758 = vst [vmem:[#allocation52_spill] sm:$0xff] %v5163_v0  ;;  %5759 = vst [vmem:[#allocation53_spill] sm:$0xff] %v5165_v8 }
 0x192   :  { %v3741_v27 = vpop.f32.mrf.mxu0  ;;  %v3861_v20 = vpop.f32.mrf.mxu1 }
 0x194   :  { %v5175_v59 = vpop.f32.mrf.mxu0  ;;  %v5177_v3 = vpop.f32.mrf.mxu1  ;;  %3963 = vmatmul.mubr.msk.bf16.gmra.mxu0 %vm230_vm3, %v4221_v34  ;;  %4083 = vmatmul.mubr.msk.bf16.gmra.mxu1 %vm230_vm3, %v4222_v37  ;;  %v4223_v34 = vld [vmem:[%s5636_s0 + $0x270] sm:$0xff]  }
 0x195   :  { %5760 = vst [vmem:[#allocation54_spill] sm:$0xff] %v5175_v59  ;;  %5761 = vst [vmem:[#allocation55_spill] sm:$0xff] %v5177_v3  ;;  %3966 = vmatprep.mubr.msk.bf16.mxu0 %vm4242_vm2, %v5717_v45  ;;  %4086 = vmatprep.mubr.msk.bf16.mxu1 %vm4242_vm2, %v5717_v45  ;;  %v4224_v37 = vld [vmem:[%s5636_s0 + $0x354] sm:$0xff]  }
 0x196   :  { %v3744_v33 = vpop.f32.mrf.mxu0  ;;  %v3864_v27 = vpop.f32.mrf.mxu1 }
 0x198   :  { %v5187_v20 = vpop.f32.mrf.mxu0  ;;  %v5189_v8 = vpop.f32.mrf.mxu1 }
 0x199   :  { %5762 = vst [vmem:[#allocation56_spill] sm:$0xff] %v5187_v20  ;;  %5763 = vst [vmem:[#allocation57_spill] sm:$0xff] %v5189_v8 }
 0x19a   :  { %v3745_v3 = vpop.f32.mrf.mxu0  ;;  %v3865_v59 = vpop.f32.mrf.mxu1 }
 0x19c   :  { %v5199_v0 = vpop.f32.mrf.mxu0  ;;  %v5201_v33 = vpop.f32.mrf.mxu1  ;;  %3967 = vmatmul.mubr.msk.bf16.gmra.mxu0 %vm230_vm3, %v4223_v34  ;;  %4087 = vmatmul.mubr.msk.bf16.gmra.mxu1 %vm230_vm3, %v4224_v37  ;;  %v4225_v34 = vld [vmem:[%s5636_s0 + $0x278] sm:$0xff]  }
 0x19d   :  { %5764 = vst [vmem:[#allocation58_spill] sm:$0xff] %v5199_v0  ;;  %5765 = vst [vmem:[#allocation59_spill] sm:$0xff] %v5201_v33  ;;  %3970 = vmatprep.mubr.msk.bf16.mxu0 %vm4242_vm2, %v5717_v45  ;;  %4090 = vmatprep.mubr.msk.bf16.mxu1 %vm4242_vm2, %v5717_v45  ;;  %v4226_v37 = vld [vmem:[%s5636_s0 + $0x35c] sm:$0xff]  }
 0x19e   :  { %v3748_v51 = vpop.f32.mrf.mxu0  ;;  %v3868_v3 = vpop.f32.mrf.mxu1 }
 0x1a0   :  { %v5211_v59 = vpop.f32.mrf.mxu0  ;;  %v5213_v8 = vpop.f32.mrf.mxu1 }
 0x1a1   :  { %5766 = vst [vmem:[#allocation60_spill] sm:$0xff] %v5211_v59  ;;  %5767 = vst [vmem:[#allocation61_spill] sm:$0xff] %v5213_v8 }
 0x1a2   :  { %v3749_v33 = vpop.f32.mrf.mxu0  ;;  %v3869_v0 = vpop.f32.mrf.mxu1 }
 0x1a4   :  { %v5223_v20 = vpop.f32.mrf.mxu0  ;;  %v5225_v51 = vpop.f32.mrf.mxu1  ;;  %3971 = vmatmul.mubr.msk.bf16.gmra.mxu0 %vm230_vm3, %v4225_v34  ;;  %4091 = vmatmul.mubr.msk.bf16.gmra.mxu1 %vm230_vm3, %v4226_v37  ;;  %v4227_v34 = vld [vmem:[%s5636_s0 + $0x280] sm:$0xff]  }
 0x1a5   :  { %5768 = vst [vmem:[#allocation62_spill] sm:$0xff] %v5223_v20  ;;  %5769 = vst [vmem:[#allocation63_spill] sm:$0xff] %v5225_v51  ;;  %3974 = vmatprep.mubr.msk.bf16.mxu0 %vm4242_vm2, %v5717_v45  ;;  %4094 = vmatprep.mubr.msk.bf16.mxu1 %vm4242_vm2, %v5717_v45  ;;  %v4228_v37 = vld [vmem:[%s5636_s0 + $0x364] sm:$0xff]  }
 0x1a6   :  { %v3752_v27 = vpop.f32.mrf.mxu0  ;;  %v3872_v33 = vpop.f32.mrf.mxu1 }
 0x1a8   :  { %v5235_v0 = vpop.f32.mrf.mxu0  ;;  %v5237_v8 = vpop.f32.mrf.mxu1 }
 0x1a9   :  { %5770 = vst [vmem:[#allocation64_spill] sm:$0xff] %v5235_v0  ;;  %5771 = vst [vmem:[#allocation65_spill] sm:$0xff] %v5237_v8  ;;  %v4229_v0 = vld [vmem:[%s5636_s0 + $0x288] sm:$0xff]  }
 0x1aa   :  { %v3753_v51 = vpop.f32.mrf.mxu0  ;;  %v3873_v20 = vpop.f32.mrf.mxu1 }
 0x1ac   :  { %v5247_v59 = vpop.f32.mrf.mxu0  ;;  %v5249_v27 = vpop.f32.mrf.mxu1  ;;  %3975 = vmatmul.mubr.msk.bf16.gmra.mxu0 %vm230_vm3, %v4227_v34  ;;  %4095 = vmatmul.mubr.msk.bf16.gmra.mxu1 %vm230_vm3, %v4228_v37  ;;  %v4230_v34 = vld [vmem:[%s5636_s0 + $0x36c] sm:$0xff]  }
 0x1ad   :  { %5772 = vst [vmem:[#allocation66_spill] sm:$0xff] %v5247_v59  ;;  %5773 = vst [vmem:[#allocation67_spill] sm:$0xff] %v5249_v27  ;;  %3978 = vmatprep.mubr.msk.bf16.mxu0 %vm4242_vm2, %v5717_v45  ;;  %4098 = vmatprep.mubr.msk.bf16.mxu1 %vm4242_vm2, %v5717_v45 }
 0x1ae   :  { %v3756_v3 = vpop.f32.mrf.mxu0  ;;  %v3876_v51 = vpop.f32.mrf.mxu1 }
 0x1af   :  { %v5774_v3 = vmax.f32 %v4575_v57, %v4578_v58  ;;  %v4231_v57 = vld [vmem:[%s5636_s0 + $0x290] sm:$0xff]  }
 0x1b0   :  { %v586_v20 = vpop.f32.mrf.mxu0  ;;  %v1138_v8 = vpop.f32.mrf.mxu1  ;;  %v4232_v58 = vld [vmem:[%s5636_s0 + $0x374] sm:$0xff]  }
 0x1b2   :  { %v3757_v37 = vpop.f32.mrf.mxu0  ;;  %v3877_v33 = vpop.f32.mrf.mxu1 }
 0x1b4   :  { %v1520_v27 = vpop.f32.mrf.mxu0  ;;  %3979 = vmatmul.mubr.msk.bf16.gmra.mxu0 %vm230_vm3, %v4229_v0  ;;  %v2129_v59 = vpop.f32.mrf.mxu1  ;;  %4099 = vmatmul.mubr.msk.bf16.gmra.mxu1 %vm230_vm3, %v4230_v34  ;;  %v5277_v0 = vld [vmem:[%s5637_s2] ss:$0 sm:$0xff] }
 0x1b5   :  { %v1750_v8 = vmax.f32 %v5774_v3, %v1520_v27  ;;  %3982 = vmatprep.mubr.msk.bf16.mxu0 %vm4242_vm2, %v5717_v45  ;;  %4102 = vmatprep.mubr.msk.bf16.mxu1 %vm4242_vm2, %v5717_v45  ;;  %v5775_v27 = vmax.f32 %v4587_v62, %v4589_v63 }
 0x1b6   :  { %v3884_v51 = vpop.f32.mrf.mxu0  ;;  %v4004_v20 = vpop.f32.mrf.mxu1 }
 0x1b7   :  { %v2359_v37 = vmax.f32 %v1750_v8, %v2129_v59 }
 0x1b8   :  { %v1523_v33 = vpop.f32.mrf.mxu0  ;;  %v2132_v34 = vpop.f32.mrf.mxu1 }
 0x1b9   :  { %v1751_v3 = vmax.f32 %v5775_v27, %v1523_v33  ;;  %v2423_v51 = vadd.f32 %v5277_v0, %v2359_v37 }
 0x1ba   :  { %v3885_v59 = vpop.f32.mrf.mxu0  ;;  %v4005_v8 = vpop.f32.mrf.mxu1 }
 0x1bb   :  { %v2360_v20 = vmax.f32 %v1751_v3, %v2132_v34  ;;  %v2480_v37 = vmax.f32 %v2423_v51, 0.0 }
 0x1bc   :  { %v1528_v15 = vpop.f32.mrf.mxu0  ;;  %3983 = vmatmul.mubr.msk.bf16.gmra.mxu0 %vm230_vm3, %v4231_v57  ;;  %v2137_v32 = vpop.f32.mrf.mxu1  ;;  %4103 = vmatmul.mubr.msk.bf16.gmra.mxu1 %vm230_vm3, %v4232_v58  ;;  %v4233_v58 = vld [vmem:[%s5636_s0 + $0x298] sm:$0xff]  }
 0x1bd   :  { %v2424_v44 = vadd.f32 %v5277_v0, %v2360_v20  ;;  %v1752_v39 = vmax.f32 %v5776_v22, %v1528_v15  ;;  %3986 = vmatprep.mubr.msk.bf16.mxu0 %vm4242_vm2, %v5717_v45  ;;  %4106 = vmatprep.mubr.msk.bf16.mxu1 %vm4242_vm2, %v5717_v45  ;;  %v5777_v15 = vmax.f32 %v4611_v11, %v4613_v12 }
 0x1be   :  { %v3888_v62 = vpop.f32.mrf.mxu0  ;;  %v4008_v63 = vpop.f32.mrf.mxu1  ;;  %v5778_v11 = vmax.f32 %v4623_v18, %v4626_v19  ;;  %v4236_v18 = vld [vmem:[%s5636_s0 + $0x384] sm:$0xff]  }
 0x1bf   :  { %v2481_v33 = vmax.f32 %v2424_v44, 0.0  ;;  %v2361_v34 = vmax.f32 %v1752_v39, %v2137_v32 }
 0x1c0   :  { %v1531_v57 = vpop.f32.mrf.mxu0  ;;  %v2140_v27 = vpop.f32.mrf.mxu1 }
 0x1c1   :  { %v3350_v7 = vpack.c.bf16 %v2481_v33, %v2480_v37  ;;  %v1753_v22 = vmax.f32 %v5777_v15, %v1531_v57  ;;  %v2425_v32 = vadd.f32 %v5277_v0, %v2361_v34 }
 0x1c2   :  { %v3889_v3 = vpop.f32.mrf.mxu0  ;;  %v4009_v59 = vpop.f32.mrf.mxu1 }
 0x1c3   :  { %3351 = vst [vmem:[%s5638_s3] sm:$0xff] %v3350_v7   ;;  %v2362_v39 = vmax.f32 %v1753_v22, %v2140_v27  ;;  %v2482_v63 = vmax.f32 %v2425_v32, 0.0  ;;  %v4235_v27 = vld [vmem:[%s5636_s0 + $0x2a0] sm:$0xff]  }
 0x1c4   :  { %v1536_v44 = vpop.f32.mrf.mxu0  ;;  %3987 = vmatmul.mubr.msk.bf16.gmra.mxu0 %vm230_vm3, %v4233_v58  ;;  %v2145_v8 = vpop.f32.mrf.mxu1  ;;  %4107 = vmatmul.mubr.msk.bf16.gmra.mxu1 %vm230_vm3, %v4234_v6  ;;  %v5779_v58 = vmax.f32 %v4635_v23, %v4637_v24  ;;  %v5780_v23 = vmax.f32 %v4647_v30, %v4650_v31  ;;  %v4238_v30 = vld [vmem:[%s5636_s0 + $0x38c] ss:$0 sps:$4 sm:$0x11]  }
 0x1c5   :  { %v2426_v51 = vadd.f32 %v5277_v0, %v2362_v39  ;;  %v1754_v12 = vmax.f32 %v5778_v11, %v1536_v44  ;;  %3990 = vmatprep.mubr.msk.bf16.mxu0 %vm4242_vm2, %v5717_v45  ;;  %4110 = vmatprep.mubr.msk.bf16.mxu1 %vm4242_vm2, %v5717_v45 }
 0x1c6   :  { %v3892_v20 = vpop.f32.mrf.mxu0  ;;  %v4012_v62 = vpop.f32.mrf.mxu1 }
 0x1c7   :  { %v2483_v37 = vmax.f32 %v2426_v51, 0.0  ;;  %v2363_v33 = vmax.f32 %v1754_v12, %v2145_v8 }
 0x1c8   :  { %v1539_v34 = vpop.f32.mrf.mxu0  ;;  %v2148_v57 = vpop.f32.mrf.mxu1 }
 0x1c9   :  { %v3355_v19 = vpack.c.bf16 %v2483_v37, %v2482_v63  ;;  %v1755_v6 = vmax.f32 %v5779_v58, %v1539_v34  ;;  %v2427_v22 = vadd.f32 %v5277_v0, %v2363_v33  ;;  %v4237_v63 = vld [vmem:[%s5636_s0 + $0x2a8] ss:$0 sps:$4 sm:$0x11]   ;;  %v5781_v37 = vmax.f32 %v4659_v35, %v4661_v36 }
 0x1ca   :  { %v3893_v7 = vpop.f32.mrf.mxu0  ;;  %v4013_v15 = vpop.f32.mrf.mxu1  ;;  %v5782_v35 = vmax.f32 %v4671_v42, %v4674_v43 }
 0x1cb   :  { %3487 = vst [vmem:[%s5638_s3 + $0x8] sm:$0xff] %v3355_v19   ;;  %v2364_v3 = vmax.f32 %v1755_v6, %v2148_v57  ;;  %v2484_v51 = vmax.f32 %v2427_v22, 0.0 }
 0x1cc   :  { %v1544_v59 = vpop.f32.mrf.mxu0  ;;  %3991 = vmatmul.mubr.msk.bf16.gmra.mxu0 %vm230_vm3, %v4235_v27  ;;  %v2153_v32 = vpop.f32.mrf.mxu1  ;;  %4111 = vmatmul.mubr.msk.bf16.gmra.mxu1 %vm230_vm3, %v4236_v18 }
 0x1cd   :  { %v2428_v39 = vadd.f32 %v5277_v0, %v2364_v3  ;;  %v1756_v24 = vmax.f32 %v5780_v23, %v1544_v59  ;;  %3994 = vmatprep.mubr.msk.bf16.mxu0 %vm4242_vm2, %v5717_v45  ;;  %4114 = vmatprep.mubr.msk.bf16.mxu1 %vm4242_vm2, %v5717_v45  ;;  %v5783_v23 = vmax.f32 %v4683_v47, %v4685_v48 }
 0x1ce   :  { %v3896_v44 = vpop.f32.mrf.mxu0  ;;  %v4016_v8 = vpop.f32.mrf.mxu1 }
 0x1cf   :  { %v2485_v11 = vmax.f32 %v2428_v39, 0.0  ;;  %v2365_v12 = vmax.f32 %v1756_v24, %v2153_v32 }
 0x1d0   :  { %v1547_v20 = vpop.f32.mrf.mxu0  ;;  %v2156_v62 = vpop.f32.mrf.mxu1 }
 0x1d1   :  { %v3360_v31 = vpack.c.bf16 %v2485_v11, %v2484_v51  ;;  %v1757_v45 = vmax.f32 %v5781_v37, %v1547_v20  ;;  %v2429_v57 = vadd.f32 %v5277_v0, %v2365_v12  ;;  %v5784_v20 = vmax.f32 %v4695_v54, %v4697_v55 }
 0x1d2   :  { %v3897_v33 = vpop.f32.mrf.mxu0  ;;  %v4017_v34 = vpop.f32.mrf.mxu1 }
 0x1d3   :  { %3488 = vst [vmem:[%s5638_s3 + $0x10] sm:$0xff] %v3360_v31   ;;  %v2366_v27 = vmax.f32 %v1757_v45, %v2156_v62  ;;  %v2486_v15 = vmax.f32 %v2429_v57, 0.0  ;;  %v5785_v34 = vmax.f32 %v4707_v1, %v4709_v2 }
 0x1d4   :  { %v1552_v18 = vpop.f32.mrf.mxu0  ;;  %3995 = vmatmul.mubr.msk.bf16.gmra.mxu0 %vm230_vm3, %v4237_v63  ;;  %v2161_v19 = vpop.f32.mrf.mxu1  ;;  %4115 = vmatmul.mubr.msk.bf16.gmra.mxu1 %vm230_vm3, %v4238_v30 }
 0x1d5   :  { %v2430_v58 = vadd.f32 %v5277_v0, %v2366_v27  ;;  %v1758_v36 = vmax.f32 %v5782_v35, %v1552_v18 }
 0x1d6   :  { %v3900_v6 = vpop.f32.mrf.mxu0  ;;  %v4020_v7 = vpop.f32.mrf.mxu1 }
 0x1d7   :  { %v2487_v22 = vmax.f32 %v2430_v58, 0.0  ;;  %v2367_v3 = vmax.f32 %v1758_v36, %v2161_v19  ;;  %v5786_v36 = vmax.f32 %v4719_v14, %v4721_v16 }
 0x1d8   :  { %v1555_v59 = vpop.f32.mrf.mxu0  ;;  %v2164_v32 = vpop.f32.mrf.mxu1 }
 0x1d9   :  { %v3365_v39 = vpack.c.bf16 %v2487_v22, %v2486_v15  ;;  %v1759_v24 = vmax.f32 %v5783_v23, %v1555_v59  ;;  %v2431_v42 = vadd.f32 %v5277_v0, %v2367_v3 }
 0x1da   :  { %v3901_v44 = vpop.f32.mrf.mxu0  ;;  %v4021_v8 = vpop.f32.mrf.mxu1 }
 0x1db   :  { %3489 = vst [vmem:[%s5638_s3 + $0x18] sm:$0xff] %v3365_v39   ;;  %v2368_v43 = vmax.f32 %v1759_v24, %v2164_v32  ;;  %v2488_v48 = vmax.f32 %v2431_v42, 0.0  ;;  %v5787_v39 = vmax.f32 %v4731_v25, %v4733_v26 }
 0x1dc   :  { %v1560_v51 = vpop.f32.mrf.mxu0  ;;  %v2169_v11 = vpop.f32.mrf.mxu1 }
 0x1dd   :  { %v2432_v12 = vadd.f32 %v5277_v0, %v2368_v43  ;;  %v1760_v62 = vmax.f32 %v5784_v20, %v1560_v51  ;;  %v5788_v51 = vmax.f32 %v4743_v38, %v4745_v40 }
 0x1de   :  { %v3904_v63 = vpop.f32.mrf.mxu0  ;;  %v4024_v47 = vpop.f32.mrf.mxu1 }
 0x1df   :  { %v2489_v30 = vmax.f32 %v2432_v12, 0.0  ;;  %v2369_v31 = vmax.f32 %v1760_v62, %v2169_v11 }
 0x1e0   :  { %v1563_v37 = vpop.f32.mrf.mxu0  ;;  %v2172_v45 = vpop.f32.mrf.mxu1 }
 0x1e1   :  { %v3370_v33 = vpack.c.bf16 %v2489_v30, %v2488_v48  ;;  %v1761_v57 = vmax.f32 %v5785_v34, %v1563_v37  ;;  %v2433_v54 = vadd.f32 %v5277_v0, %v2369_v31  ;;  %v5789_v30 = vmax.f32 %v4755_v49, %v4757_v50 }
 0x1e2   :  { %v3905_v27 = vpop.f32.mrf.mxu0  ;;  %v4025_v18 = vpop.f32.mrf.mxu1 }
 0x1e3   :  { %3490 = vst [vmem:[%s5638_s3 + $0x20] sm:$0xff] %v3370_v33   ;;  %v2370_v55 = vmax.f32 %v1761_v57, %v2172_v45  ;;  %v2490_v2 = vmax.f32 %v2433_v54, 0.0  ;;  %v5790_v27 = vmax.f32 %v4767_v5, %v4769_v10 }
 0x1e4   :  { %v1568_v19 = vpop.f32.mrf.mxu0  ;;  %v2177_v58 = vpop.f32.mrf.mxu1 }
 0x1e5   :  { %v2434_v35 = vadd.f32 %v5277_v0, %v2370_v55  ;;  %v1762_v6 = vmax.f32 %v5786_v36, %v1568_v19 }
 0x1e6   :  { %v3908_v7 = vpop.f32.mrf.mxu0  ;;  %v4028_v1 = vpop.f32.mrf.mxu1 }
 0x1e7   :  { %v2491_v15 = vmax.f32 %v2434_v35, 0.0  ;;  %v2371_v22 = vmax.f32 %v1762_v6, %v2177_v58  ;;  %v5791_v6 = vmax.f32 %v4779_v28, %v4781_v29 }
 0x1e8   :  { %v1571_v3 = vpop.f32.mrf.mxu0  ;;  %v2180_v59 = vpop.f32.mrf.mxu1 }
 0x1e9   :  { %v3375_v32 = vpack.c.bf16 %v2491_v15, %v2490_v2  ;;  %v1763_v23 = vmax.f32 %v5787_v39, %v1571_v3  ;;  %v2435_v14 = vadd.f32 %v5277_v0, %v2371_v22 }
 0x1ea   :  { %v3909_v24 = vpop.f32.mrf.mxu0  ;;  %v4029_v44 = vpop.f32.mrf.mxu1 }
 0x1eb   :  { %3491 = vst [vmem:[%s5638_s3 + $0x28] sm:$0xff] %v3375_v32   ;;  %v2372_v16 = vmax.f32 %v1763_v23, %v2180_v59  ;;  %v2492_v26 = vmax.f32 %v2435_v14, 0.0  ;;  %v5792_v59 = vmax.f32 %v4791_v53, %v4793_v61 }
 0x1ec   :  { %v1576_v8 = vpop.f32.mrf.mxu0  ;;  %v2185_v42 = vpop.f32.mrf.mxu1 }
 0x1ed   :  { %v2436_v43 = vadd.f32 %v5277_v0, %v2372_v16  ;;  %v1764_v11 = vmax.f32 %v5788_v51, %v1576_v8  ;;  %v5793_v8 = vmax.f32 %v4803_v46, %v4805_v52 }
 0x1ee   :  { %v3912_v12 = vpop.f32.mrf.mxu0  ;;  %v4032_v25 = vpop.f32.mrf.mxu1 }
 0x1ef   :  { %v2493_v20 = vmax.f32 %v2436_v43, 0.0  ;;  %v2373_v62 = vmax.f32 %v1764_v11, %v2185_v42 }
 0x1f0   :  { %v1579_v63 = vpop.f32.mrf.mxu0  ;;  %v2188_v47 = vpop.f32.mrf.mxu1 }
 0x1f1   :  { %v3380_v48 = vpack.c.bf16 %v2493_v20, %v2492_v26  ;;  %v1765_v31 = vmax.f32 %v5789_v30, %v1579_v63  ;;  %v2437_v38 = vadd.f32 %v5277_v0, %v2373_v62  ;;  %v5794_v26 = vmax.f32 %v4815_v60, %v4817_v21 }
 0x1f2   :  { %v3913_v37 = vpop.f32.mrf.mxu0  ;;  %v4033_v45 = vpop.f32.mrf.mxu1 }
 0x1f3   :  { %3492 = vst [vmem:[%s5638_s3 + $0x30] sm:$0xff] %v3380_v48   ;;  %v2374_v40 = vmax.f32 %v1765_v31, %v2188_v47  ;;  %v2494_v50 = vmax.f32 %v2437_v38, 0.0  ;;  %v5795_v37 = vmax.f32 %v4827_v13, %v4829_v41 }
 0x1f4   :  { %v1584_v33 = vpop.f32.mrf.mxu0  ;;  %v2193_v34 = vpop.f32.mrf.mxu1 }
 0x1f5   :  { %v2438_v57 = vadd.f32 %v5277_v0, %v2374_v40  ;;  %v1766_v18 = vmax.f32 %v5790_v27, %v1584_v33  ;;  %v5796_v27 = vmax.f32 %v4839_v9, %v4841_v4 }
 0x1f6   :  { %v3916_v54 = vpop.f32.mrf.mxu0  ;;  %v4036_v49 = vpop.f32.mrf.mxu1 }
 0x1f7   :  { %v2495_v55 = vmax.f32 %v2438_v57, 0.0  ;;  %v2375_v19 = vmax.f32 %v1766_v18, %v2193_v34 }
 0x1f8   :  { %v1587_v58 = vpop.f32.mrf.mxu0  ;;  %v2196_v35 = vpop.f32.mrf.mxu1 }
 0x1f9   :  { %v3385_v36 = vpack.c.bf16 %v2495_v55, %v2494_v50  ;;  %v1767_v7 = vmax.f32 %v5791_v6, %v1587_v58  ;;  %v2439_v5 = vadd.f32 %v5277_v0, %v2375_v19 }
 0x1fa   :  { %v3917_v1 = vpop.f32.mrf.mxu0  ;;  %v4037_v2 = vpop.f32.mrf.mxu1 }
 0x1fb   :  { %3493 = vst [vmem:[%s5638_s3 + $0x38] sm:$0xff] %v3385_v36   ;;  %v2376_v10 = vmax.f32 %v1767_v7, %v2196_v35  ;;  %v2496_v29 = vmax.f32 %v2439_v5, 0.0  ;;  %v5797_v35 = vmax.f32 %v4851_v17, %v4853_v56 }
 0x1fc   :  { %v1592_v15 = vpop.f32.mrf.mxu0  ;;  %v2201_v22 = vpop.f32.mrf.mxu1 }
 0x1fd   :  { %v2440_v3 = vadd.f32 %v5277_v0, %v2376_v10  ;;  %v1768_v32 = vmax.f32 %v5792_v59, %v1592_v15  ;;  %v5798_v10 = vld [vmem:[#allocation2_spill] sm:$0xff]  ;;  %v5799_v15 = vld [vmem:[#allocation3_spill] sm:$0xff] }
 0x1fe   :  { %v3920_v39 = vpop.f32.mrf.mxu0  ;;  %v4040_v28 = vpop.f32.mrf.mxu1 }
 0x1ff   :  { %v2497_v23 = vmax.f32 %v2440_v3, 0.0  ;;  %v2377_v24 = vmax.f32 %v1768_v32, %v2201_v22  ;;  %v5800_v22 = vmax.f32 %v5798_v10, %v5799_v15 }
 0x200   :  { %v1595_v44 = vpop.f32.mrf.mxu0  ;;  %v2204_v14 = vpop.f32.mrf.mxu1 }
 0x201   :  { %v3390_v16 = vpack.c.bf16 %v2497_v23, %v2496_v29  ;;  %v1769_v42 = vmax.f32 %v5793_v8, %v1595_v44  ;;  %v2441_v53 = vadd.f32 %v5277_v0, %v2377_v24  ;;  %v5801_v24 = vld [vmem:[#allocation4_spill] sm:$0xff]  ;;  %v5802_v44 = vld [vmem:[#allocation5_spill] sm:$0xff] }
 0x202   :  { %v3921_v43 = vpop.f32.mrf.mxu0  ;;  %v4041_v51 = vpop.f32.mrf.mxu1 }
 0x203   :  { %3494 = vst [vmem:[%s5638_s3 + $0x40] sm:$0xff] %v3390_v16   ;;  %v2378_v61 = vmax.f32 %v1769_v42, %v2204_v14  ;;  %v2498_v52 = vmax.f32 %v2441_v53, 0.0  ;;  %v5803_v14 = vmax.f32 %v5801_v24, %v5802_v44 }
 0x204   :  { %v1600_v11 = vpop.f32.mrf.mxu0  ;;  %v2209_v12 = vpop.f32.mrf.mxu1 }
 0x205   :  { %v2442_v25 = vadd.f32 %v5277_v0, %v2378_v61  ;;  %v1770_v20 = vmax.f32 %v5794_v26, %v1600_v11 }
 0x206   :  { %v3924_v62 = vpop.f32.mrf.mxu0  ;;  %v4044_v46 = vpop.f32.mrf.mxu1 }
 0x207   :  { %v2499_v63 = vmax.f32 %v2442_v25, 0.0  ;;  %v2379_v47 = vmax.f32 %v1770_v20, %v2209_v12  ;;  %v5804_v12 = vld [vmem:[#allocation6_spill] sm:$0xff]  ;;  %v5805_v25 = vld [vmem:[#allocation7_spill] sm:$0xff] }
 0x208   :  { %v1603_v48 = vpop.f32.mrf.mxu0  ;;  %v2212_v30 = vpop.f32.mrf.mxu1  ;;  %v5806_v26 = vmax.f32 %v5804_v12, %v5805_v25 }
 0x209   :  { %v3395_v31 = vpack.c.bf16 %v2499_v63, %v2498_v52  ;;  %v1771_v45 = vmax.f32 %v5795_v37, %v1603_v48  ;;  %v2443_v60 = vadd.f32 %v5277_v0, %v2379_v47  ;;  %v5807_v37 = vld [vmem:[#allocation8_spill] sm:$0xff] }
 0x20a   :  { %v3925_v38 = vpop.f32.mrf.mxu0  ;;  %v4045_v40 = vpop.f32.mrf.mxu1 }
 0x20b   :  { %3495 = vst [vmem:[%s5638_s3 + $0x48] sm:$0xff] %v3395_v31   ;;  %v2380_v21 = vmax.f32 %v1771_v45, %v2212_v30  ;;  %v2500_v13 = vmax.f32 %v2443_v60, 0.0  ;;  %v5808_v45 = vld [vmem:[#allocation9_spill] sm:$0xff] }
 0x20c   :  { %v1608_v33 = vpop.f32.mrf.mxu0  ;;  %v2217_v34 = vpop.f32.mrf.mxu1  ;;  %v5809_v38 = vmax.f32 %v5807_v37, %v5808_v45 }
 0x20d   :  { %v2444_v57 = vadd.f32 %v5277_v0, %v2380_v21  ;;  %v1772_v18 = vmax.f32 %v5796_v27, %v1608_v33 }
 0x20e   :  { %v3928_v54 = vpop.f32.mrf.mxu0  ;;  %v4048_v41 = vpop.f32.mrf.mxu1 }
 0x20f   :  { %v2501_v49 = vmax.f32 %v2444_v57, 0.0  ;;  %v2381_v50 = vmax.f32 %v1772_v18, %v2217_v34  ;;  %v5810_v54 = vld [vmem:[#allocation10_spill] sm:$0xff]  ;;  %v5811_v41 = vld [vmem:[#allocation11_spill] sm:$0xff] }
 0x210   :  { %v1611_v55 = vpop.f32.mrf.mxu0  ;;  %v2220_v19 = vpop.f32.mrf.mxu1 }
 0x211   :  { %v3400_v58 = vpack.c.bf16 %v2501_v49, %v2500_v13  ;;  %v1773_v36 = vmax.f32 %v5797_v35, %v1611_v55  ;;  %v2445_v9 = vadd.f32 %v5277_v0, %v2381_v50  ;;  %v5812_v13 = vmax.f32 %v5810_v54, %v5811_v41 }
 0x212   :  { %v3929_v6 = vpop.f32.mrf.mxu0  ;;  %v4049_v7 = vpop.f32.mrf.mxu1 }
 0x213   :  { %3496 = vst [vmem:[%s5638_s3 + $0x50] sm:$0xff] %v3400_v58   ;;  %v2382_v4 = vmax.f32 %v1773_v36, %v2220_v19  ;;  %v2502_v17 = vmax.f32 %v2445_v9, 0.0  ;;  %v5813_v9 = vld [vmem:[#allocation12_spill] sm:$0xff] }
 0x214   :  { %v1616_v1 = vpop.f32.mrf.mxu0  ;;  %v2225_v2 = vpop.f32.mrf.mxu1 }
 0x215   :  { %v2446_v5 = vadd.f32 %v5277_v0, %v2382_v4  ;;  %v1774_v3 = vmax.f32 %v5800_v22, %v1616_v1  ;;  %v5814_v4 = vld [vmem:[#allocation13_spill] sm:$0xff] }
 0x216   :  { %v3932_v59 = vpop.f32.mrf.mxu0  ;;  %v4052_v56 = vpop.f32.mrf.mxu1  ;;  %v5815_v1 = vmax.f32 %v5813_v9, %v5814_v4 }
 0x217   :  { %v2503_v32 = vmax.f32 %v2446_v5, 0.0  ;;  %v2383_v39 = vmax.f32 %v1774_v3, %v2225_v2 }
 0x218   :  { %v1619_v28 = vpop.f32.mrf.mxu0  ;;  %v2228_v29 = vpop.f32.mrf.mxu1 }
 0x219   :  { %v3405_v23 = vpack.c.bf16 %v2503_v32, %v2502_v17  ;;  %v1775_v16 = vmax.f32 %v5803_v14, %v1619_v28  ;;  %v2447_v43 = vadd.f32 %v5277_v0, %v2383_v39  ;;  %v5816_v17 = vld [vmem:[#allocation14_spill] sm:$0xff]  ;;  %v5817_v32 = vld [vmem:[#allocation15_spill] sm:$0xff] }
 0x21a   :  { %v3933_v8 = vpop.f32.mrf.mxu0  ;;  %v4053_v42 = vpop.f32.mrf.mxu1  ;;  %v5818_v39 = vmax.f32 %v5816_v17, %v5817_v32 }
 0x21b   :  { %3497 = vst [vmem:[%s5638_s3 + $0x58] sm:$0xff] %v3405_v23   ;;  %v2384_v51 = vmax.f32 %v1775_v16, %v2228_v29  ;;  %v2504_v52 = vmax.f32 %v2447_v43, 0.0  ;;  %v5819_v43 = vld [vmem:[#allocation16_spill] sm:$0xff] }
 0x21c   :  { %v1624_v53 = vpop.f32.mrf.mxu0  ;;  %v2233_v61 = vpop.f32.mrf.mxu1 }
 0x21d   :  { %v2448_v11 = vadd.f32 %v5277_v0, %v2384_v51  ;;  %v1776_v20 = vmax.f32 %v5806_v26, %v1624_v53  ;;  %v5820_v51 = vld [vmem:[#allocation17_spill] sm:$0xff] }
 0x21e   :  { %v3936_v62 = vpop.f32.mrf.mxu0  ;;  %v4056_v46 = vpop.f32.mrf.mxu1  ;;  %v5821_v53 = vmax.f32 %v5819_v43, %v5820_v51 }
 0x21f   :  { %v2505_v63 = vmax.f32 %v2448_v11, 0.0  ;;  %v2385_v47 = vmax.f32 %v1776_v20, %v2233_v61 }
 0x220   :  { %v1627_v48 = vpop.f32.mrf.mxu0  ;;  %v2236_v30 = vpop.f32.mrf.mxu1 }
 0x221   :  { %v3410_v31 = vpack.c.bf16 %v2505_v63, %v2504_v52  ;;  %v1777_v40 = vmax.f32 %v5809_v38, %v1627_v48  ;;  %v2449_v33 = vadd.f32 %v5277_v0, %v2385_v47  ;;  %v5822_v52 = vld [vmem:[#allocation18_spill] sm:$0xff]  ;;  %v5823_v63 = vld [vmem:[#allocation19_spill] sm:$0xff] }
 0x222   :  { %v3937_v60 = vpop.f32.mrf.mxu0  ;;  %v4057_v21 = vpop.f32.mrf.mxu1  ;;  %v5824_v47 = vmax.f32 %v5822_v52, %v5823_v63 }
 0x223   :  { %3498 = vst [vmem:[%s5638_s3 + $0x60] sm:$0xff] %v3410_v31   ;;  %v2386_v34 = vmax.f32 %v1777_v40, %v2236_v30  ;;  %v2506_v19 = vmax.f32 %v2449_v33, 0.0  ;;  %v5825_v33 = vld [vmem:[#allocation20_spill] sm:$0xff] }
 0x224   :  { %v1632_v57 = vpop.f32.mrf.mxu0  ;;  %v2241_v27 = vpop.f32.mrf.mxu1 }
 0x225   :  { %v2450_v18 = vadd.f32 %v5277_v0, %v2386_v34  ;;  %v1778_v49 = vmax.f32 %v5812_v13, %v1632_v57  ;;  %v5826_v34 = vld [vmem:[#allocation21_spill] sm:$0xff] }
 0x226   :  { %v3940_v50 = vpop.f32.mrf.mxu0  ;;  %v4060_v55 = vpop.f32.mrf.mxu1  ;;  %v5827_v57 = vmax.f32 %v5825_v33, %v5826_v34 }
 0x227   :  { %v2507_v58 = vmax.f32 %v2450_v18, 0.0  ;;  %v2387_v35 = vmax.f32 %v1778_v49, %v2241_v27 }
 0x228   :  { %v1635_v36 = vpop.f32.mrf.mxu0  ;;  %v2244_v6 = vpop.f32.mrf.mxu1 }
 0x229   :  { %v3415_v7 = vpack.c.bf16 %v2507_v58, %v2506_v19  ;;  %v1779_v2 = vmax.f32 %v5815_v1, %v1635_v36  ;;  %v2451_v15 = vadd.f32 %v5277_v0, %v2387_v35  ;;  %v5828_v19 = vld [vmem:[#allocation22_spill] sm:$0xff]  ;;  %v5829_v58 = vld [vmem:[#allocation23_spill] sm:$0xff] }
 0x22a   :  { %v3941_v5 = vpop.f32.mrf.mxu0  ;;  %v4061_v10 = vpop.f32.mrf.mxu1  ;;  %v5830_v35 = vmax.f32 %v5828_v19, %v5829_v58 }
 0x22b   :  { %3499 = vst [vmem:[%s5638_s3 + $0x68] sm:$0xff] %v3415_v7   ;;  %v2388_v22 = vmax.f32 %v1779_v2, %v2244_v6  ;;  %v2508_v24 = vmax.f32 %v2451_v15, 0.0  ;;  %v5831_v15 = vld [vmem:[#allocation24_spill] sm:$0xff] }
 0x22c   :  { %v1640_v3 = vpop.f32.mrf.mxu0  ;;  %v2249_v59 = vpop.f32.mrf.mxu1 }
 0x22d   :  { %v2452_v56 = vadd.f32 %v5277_v0, %v2388_v22  ;;  %v1780_v28 = vmax.f32 %v5818_v39, %v1640_v3  ;;  %v5832_v22 = vld [vmem:[#allocation25_spill] sm:$0xff] }
 0x22e   :  { %v3944_v29 = vpop.f32.mrf.mxu0  ;;  %v4064_v23 = vpop.f32.mrf.mxu1  ;;  %v5833_v3 = vmax.f32 %v5831_v15, %v5832_v22 }
 0x22f   :  { %v2509_v44 = vmax.f32 %v2452_v56, 0.0  ;;  %v2389_v14 = vmax.f32 %v1780_v28, %v2249_v59 }
 0x230   :  { %v1643_v16 = vpop.f32.mrf.mxu0  ;;  %v2252_v8 = vpop.f32.mrf.mxu1 }
 0x231   :  { %v3420_v42 = vpack.c.bf16 %v2509_v44, %v2508_v24  ;;  %v1781_v61 = vmax.f32 %v5821_v53, %v1643_v16  ;;  %v2453_v25 = vadd.f32 %v5277_v0, %v2389_v14  ;;  %v5834_v24 = vld [vmem:[#allocation26_spill] sm:$0xff]  ;;  %v5835_v44 = vld [vmem:[#allocation27_spill] sm:$0xff] }
 0x232   :  { %v3945_v11 = vpop.f32.mrf.mxu0  ;;  %v4065_v12 = vpop.f32.mrf.mxu1  ;;  %v5836_v14 = vmax.f32 %v5834_v24, %v5835_v44 }
 0x233   :  { %3500 = vst [vmem:[%s5638_s3 + $0x70] sm:$0xff] %v3420_v42   ;;  %v2390_v26 = vmax.f32 %v1781_v61, %v2252_v8  ;;  %v2510_v37 = vmax.f32 %v2453_v25, 0.0  ;;  %v5837_v25 = vld [vmem:[#allocation28_spill] sm:$0xff] }
 0x234   :  { %v1648_v20 = vpop.f32.mrf.mxu0  ;;  %v2257_v62 = vpop.f32.mrf.mxu1 }
 0x235   :  { %v2454_v46 = vadd.f32 %v5277_v0, %v2390_v26  ;;  %v1782_v48 = vmax.f32 %v5824_v47, %v1648_v20  ;;  %v5838_v26 = vld [vmem:[#allocation29_spill] sm:$0xff] }
 0x236   :  { %v3948_v30 = vpop.f32.mrf.mxu0  ;;  %v4068_v31 = vpop.f32.mrf.mxu1  ;;  %v5839_v20 = vmax.f32 %v5837_v25, %v5838_v26 }
 0x237   :  { %v2511_v45 = vmax.f32 %v2454_v46, 0.0  ;;  %v2391_v38 = vmax.f32 %v1782_v48, %v2257_v62 }
 0x238   :  { %v1651_v40 = vpop.f32.mrf.mxu0  ;;  %v2260_v60 = vpop.f32.mrf.mxu1 }
 0x239   :  { %v3425_v21 = vpack.c.bf16 %v2511_v45, %v2510_v37  ;;  %v1783_v27 = vmax.f32 %v5827_v57, %v1651_v40  ;;  %v2455_v41 = vadd.f32 %v5277_v0, %v2391_v38  ;;  %v5840_v37 = vld [vmem:[#allocation30_spill] sm:$0xff]  ;;  %v5841_v45 = vld [vmem:[#allocation31_spill] sm:$0xff] }
 0x23a   :  { %v3949_v18 = vpop.f32.mrf.mxu0  ;;  %v4069_v54 = vpop.f32.mrf.mxu1  ;;  %v5842_v38 = vmax.f32 %v5840_v37, %v5841_v45 }
 0x23b   :  { %3501 = vst [vmem:[%s5638_s3 + $0x78] sm:$0xff] %v3425_v21   ;;  %v2392_v13 = vmax.f32 %v1783_v27, %v2260_v60  ;;  %v2512_v9 = vmax.f32 %v2455_v41, 0.0  ;;  %v5843_v41 = vld [vmem:[#allocation32_spill] sm:$0xff] }
 0x23c   :  { %v1656_v49 = vpop.f32.mrf.mxu0  ;;  %v2265_v50 = vpop.f32.mrf.mxu1 }
 0x23d   :  { %v2456_v55 = vadd.f32 %v5277_v0, %v2392_v13  ;;  %v1784_v36 = vmax.f32 %v5830_v35, %v1656_v49  ;;  %v5844_v13 = vld [vmem:[#allocation33_spill] sm:$0xff] }
 0x23e   :  { %v3952_v6 = vpop.f32.mrf.mxu0  ;;  %v4072_v7 = vpop.f32.mrf.mxu1  ;;  %v5845_v49 = vmax.f32 %v5843_v41, %v5844_v13 }
 0x23f   :  { %v2513_v4 = vmax.f32 %v2456_v55, 0.0  ;;  %v2393_v1 = vmax.f32 %v1784_v36, %v2265_v50 }
 0x240   :  { %v1659_v2 = vpop.f32.mrf.mxu0  ;;  %v2268_v5 = vpop.f32.mrf.mxu1 }
 0x241   :  { %v3430_v10 = vpack.c.bf16 %v2513_v4, %v2512_v9  ;;  %v1785_v59 = vmax.f32 %v5833_v3, %v1659_v2  ;;  %v2457_v32 = vadd.f32 %v5277_v0, %v2393_v1  ;;  %v5846_v9 = vld [vmem:[#allocation34_spill] sm:$0xff]  ;;  %v5847_v4 = vld [vmem:[#allocation35_spill] sm:$0xff] }
 0x242   :  { %v3953_v56 = vpop.f32.mrf.mxu0  ;;  %v4073_v17 = vpop.f32.mrf.mxu1  ;;  %v5848_v1 = vmax.f32 %v5846_v9, %v5847_v4 }
 0x243   :  { %3502 = vst [vmem:[%s5638_s3 + $0x80] sm:$0xff] %v3430_v10   ;;  %v2394_v39 = vmax.f32 %v1785_v59, %v2268_v5  ;;  %v2514_v43 = vmax.f32 %v2457_v32, 0.0  ;;  %v5849_v32 = vld [vmem:[#allocation36_spill] sm:$0xff] }
 0x244   :  { %v1664_v28 = vpop.f32.mrf.mxu0  ;;  %v2273_v29 = vpop.f32.mrf.mxu1 }
 0x245   :  { %v2458_v23 = vadd.f32 %v5277_v0, %v2394_v39  ;;  %v1786_v16 = vmax.f32 %v5836_v14, %v1664_v28  ;;  %v5850_v39 = vld [vmem:[#allocation37_spill] sm:$0xff] }
 0x246   :  { %v3956_v8 = vpop.f32.mrf.mxu0  ;;  %v4076_v42 = vpop.f32.mrf.mxu1  ;;  %v5851_v28 = vmax.f32 %v5849_v32, %v5850_v39 }
 0x247   :  { %v2515_v51 = vmax.f32 %v2458_v23, 0.0  ;;  %v2395_v53 = vmax.f32 %v1786_v16, %v2273_v29 }
 0x248   :  { %v1667_v61 = vpop.f32.mrf.mxu0  ;;  %v2276_v11 = vpop.f32.mrf.mxu1 }
 0x249   :  { %v3435_v12 = vpack.c.bf16 %v2515_v51, %v2514_v43  ;;  %v1787_v62 = vmax.f32 %v5839_v20, %v1667_v61  ;;  %v2459_v63 = vadd.f32 %v5277_v0, %v2395_v53  ;;  %v5852_v43 = vld [vmem:[#allocation38_spill] sm:$0xff]  ;;  %v5853_v51 = vld [vmem:[#allocation39_spill] sm:$0xff] }
 0x24a   :  { %v3957_v46 = vpop.f32.mrf.mxu0  ;;  %v4077_v52 = vpop.f32.mrf.mxu1  ;;  %v5854_v53 = vmax.f32 %v5852_v43, %v5853_v51 }
 0x24b   :  { %3503 = vst [vmem:[%s5638_s3 + $0x88] sm:$0xff] %v3435_v12   ;;  %v2396_v47 = vmax.f32 %v1787_v62, %v2276_v11  ;;  %v2516_v33 = vmax.f32 %v2459_v63, 0.0  ;;  %v5855_v63 = vld [vmem:[#allocation40_spill] sm:$0xff] }
 0x24c   :  { %v1672_v48 = vpop.f32.mrf.mxu0  ;;  %v2281_v30 = vpop.f32.mrf.mxu1 }
 0x24d   :  { %v2460_v31 = vadd.f32 %v5277_v0, %v2396_v47  ;;  %v1788_v40 = vmax.f32 %v5842_v38, %v1672_v48  ;;  %v5856_v47 = vld [vmem:[#allocation41_spill] sm:$0xff] }
 0x24e   :  { %v3960_v60 = vpop.f32.mrf.mxu0  ;;  %v4080_v21 = vpop.f32.mrf.mxu1  ;;  %v5857_v48 = vmax.f32 %v5855_v63, %v5856_v47 }
 0x24f   :  { %v2517_v34 = vmax.f32 %v2460_v31, 0.0  ;;  %v2397_v57 = vmax.f32 %v1788_v40, %v2281_v30 }
 0x250   :  { %v1675_v27 = vpop.f32.mrf.mxu0  ;;  %v2284_v18 = vpop.f32.mrf.mxu1 }
 0x251   :  { %v3440_v54 = vpack.c.bf16 %v2517_v34, %v2516_v33  ;;  %v1789_v50 = vmax.f32 %v5845_v49, %v1675_v27  ;;  %v2461_v58 = vadd.f32 %v5277_v0, %v2397_v57  ;;  %v5858_v33 = vld [vmem:[#allocation42_spill] sm:$0xff]  ;;  %v5859_v34 = vld [vmem:[#allocation43_spill] sm:$0xff] }
 0x252   :  { %v3961_v55 = vpop.f32.mrf.mxu0  ;;  %v4081_v19 = vpop.f32.mrf.mxu1  ;;  %v5860_v57 = vmax.f32 %v5858_v33, %v5859_v34 }
 0x253   :  { %3504 = vst [vmem:[%s5638_s3 + $0x90] sm:$0xff] %v3440_v54   ;;  %v2398_v35 = vmax.f32 %v1789_v50, %v2284_v18  ;;  %v2518_v15 = vmax.f32 %v2461_v58, 0.0  ;;  %v5861_v58 = vld [vmem:[#allocation44_spill] sm:$0xff] }
 0x254   :  { %v1680_v36 = vpop.f32.mrf.mxu0  ;;  %v2289_v6 = vpop.f32.mrf.mxu1 }
 0x255   :  { %v2462_v7 = vadd.f32 %v5277_v0, %v2398_v35  ;;  %v1790_v2 = vmax.f32 %v5848_v1, %v1680_v36  ;;  %v5862_v35 = vld [vmem:[#allocation45_spill] sm:$0xff] }
 0x256   :  { %v3964_v5 = vpop.f32.mrf.mxu0  ;;  %v4084_v10 = vpop.f32.mrf.mxu1  ;;  %v5863_v36 = vmax.f32 %v5861_v58, %v5862_v35 }
 0x257   :  { %v2519_v22 = vmax.f32 %v2462_v7, 0.0  ;;  %v2399_v3 = vmax.f32 %v1790_v2, %v2289_v6 }
 0x258   :  { %v1683_v59 = vpop.f32.mrf.mxu0  ;;  %v2292_v56 = vpop.f32.mrf.mxu1 }
 0x259   :  { %v3445_v17 = vpack.c.bf16 %v2519_v22, %v2518_v15  ;;  %v1791_v29 = vmax.f32 %v5851_v28, %v1683_v59  ;;  %v2463_v44 = vadd.f32 %v5277_v0, %v2399_v3  ;;  %v5864_v15 = vld [vmem:[#allocation46_spill] sm:$0xff]  ;;  %v5865_v22 = vld [vmem:[#allocation47_spill] sm:$0xff] }
 0x25a   :  { %v3965_v23 = vpop.f32.mrf.mxu0  ;;  %v4085_v24 = vpop.f32.mrf.mxu1  ;;  %v5866_v3 = vmax.f32 %v5864_v15, %v5865_v22 }
 0x25b   :  { %3505 = vst [vmem:[%s5638_s3 + $0x98] sm:$0xff] %v3445_v17   ;;  %v2400_v14 = vmax.f32 %v1791_v29, %v2292_v56  ;;  %v2520_v25 = vmax.f32 %v2463_v44, 0.0  ;;  %v5867_v44 = vld [vmem:[#allocation48_spill] sm:$0xff] }
 0x25c   :  { %v1688_v16 = vpop.f32.mrf.mxu0  ;;  %v2297_v8 = vpop.f32.mrf.mxu1 }
 0x25d   :  { %v2464_v42 = vadd.f32 %v5277_v0, %v2400_v14  ;;  %v1792_v61 = vmax.f32 %v5854_v53, %v1688_v16  ;;  %v5868_v14 = vld [vmem:[#allocation49_spill] sm:$0xff] }
 0x25e   :  { %v3968_v11 = vpop.f32.mrf.mxu0  ;;  %v4088_v12 = vpop.f32.mrf.mxu1  ;;  %v5869_v16 = vmax.f32 %v5867_v44, %v5868_v14 }
 0x25f   :  { %v2521_v26 = vmax.f32 %v2464_v42, 0.0  ;;  %v2401_v20 = vmax.f32 %v1792_v61, %v2297_v8 }
 0x260   :  { %v1691_v62 = vpop.f32.mrf.mxu0  ;;  %v2300_v46 = vpop.f32.mrf.mxu1 }
 0x261   :  { %v3450_v52 = vpack.c.bf16 %v2521_v26, %v2520_v25  ;;  %v1793_v30 = vmax.f32 %v5857_v48, %v1691_v62  ;;  %v2465_v45 = vadd.f32 %v5277_v0, %v2401_v20  ;;  %v5870_v25 = vld [vmem:[#allocation50_spill] sm:$0xff]  ;;  %v5871_v26 = vld [vmem:[#allocation51_spill] sm:$0xff] }
 0x262   :  { %v3969_v31 = vpop.f32.mrf.mxu0  ;;  %v4089_v37 = vpop.f32.mrf.mxu1  ;;  %v5872_v20 = vmax.f32 %v5870_v25, %v5871_v26 }
 0x263   :  { %3506 = vst [vmem:[%s5638_s3 + $0xa0] sm:$0xff] %v3450_v52   ;;  %v2402_v38 = vmax.f32 %v1793_v30, %v2300_v46  ;;  %v2522_v41 = vmax.f32 %v2465_v45, 0.0  ;;  %v5873_v45 = vld [vmem:[#allocation52_spill] sm:$0xff] }
 0x264   :  { %v1696_v40 = vpop.f32.mrf.mxu0  ;;  %v2305_v60 = vpop.f32.mrf.mxu1 }
 0x265   :  { %v2466_v21 = vadd.f32 %v5277_v0, %v2402_v38  ;;  %v1794_v27 = vmax.f32 %v5860_v57, %v1696_v40  ;;  %v5874_v38 = vld [vmem:[#allocation53_spill] sm:$0xff] }
 0x266   :  { %v3972_v18 = vpop.f32.mrf.mxu0  ;;  %v4092_v54 = vpop.f32.mrf.mxu1  ;;  %v5875_v40 = vmax.f32 %v5873_v45, %v5874_v38 }
 0x267   :  { %v2523_v13 = vmax.f32 %v2466_v21, 0.0  ;;  %v2403_v49 = vmax.f32 %v1794_v27, %v2305_v60 }
 0x268   :  { %v1699_v50 = vpop.f32.mrf.mxu0  ;;  %v2308_v55 = vpop.f32.mrf.mxu1 }
 0x269   :  { %v3455_v19 = vpack.c.bf16 %v2523_v13, %v2522_v41  ;;  %v1795_v6 = vmax.f32 %v5863_v36, %v1699_v50  ;;  %v2467_v4 = vadd.f32 %v5277_v0, %v2403_v49  ;;  %v5876_v41 = vld [vmem:[#allocation54_spill] sm:$0xff]  ;;  %v5877_v13 = vld [vmem:[#allocation55_spill] sm:$0xff] }
 0x26a   :  { %v3973_v7 = vpop.f32.mrf.mxu0  ;;  %v4093_v9 = vpop.f32.mrf.mxu1  ;;  %v5878_v49 = vmax.f32 %v5876_v41, %v5877_v13 }
 0x26b   :  { %3507 = vst [vmem:[%s5638_s3 + $0xa8] sm:$0xff] %v3455_v19   ;;  %v2404_v1 = vmax.f32 %v1795_v6, %v2308_v55  ;;  %v2524_v32 = vmax.f32 %v2467_v4, 0.0  ;;  %v5879_v4 = vld [vmem:[#allocation56_spill] sm:$0xff] }
 0x26c   :  { %v1704_v2 = vpop.f32.mrf.mxu0  ;;  %v2313_v5 = vpop.f32.mrf.mxu1 }
 0x26d   :  { %v2468_v10 = vadd.f32 %v5277_v0, %v2404_v1  ;;  %v1796_v59 = vmax.f32 %v5866_v3, %v1704_v2  ;;  %v5880_v1 = vld [vmem:[#allocation57_spill] sm:$0xff] }
 0x26e   :  { %v3976_v56 = vpop.f32.mrf.mxu0  ;;  %v4096_v17 = vpop.f32.mrf.mxu1  ;;  %v5881_v2 = vmax.f32 %v5879_v4, %v5880_v1 }
 0x26f   :  { %v2525_v39 = vmax.f32 %v2468_v10, 0.0  ;;  %v2405_v28 = vmax.f32 %v1796_v59, %v2313_v5 }
 0x270   :  { %v1707_v29 = vpop.f32.mrf.mxu0  ;;  %v2316_v23 = vpop.f32.mrf.mxu1 }
 0x271   :  { %v3460_v24 = vpack.c.bf16 %v2525_v39, %v2524_v32  ;;  %v1797_v8 = vmax.f32 %v5869_v16, %v1707_v29  ;;  %v2469_v51 = vadd.f32 %v5277_v0, %v2405_v28  ;;  %v5882_v32 = vld [vmem:[#allocation58_spill] sm:$0xff]  ;;  %v5883_v39 = vld [vmem:[#allocation59_spill] sm:$0xff] }
 0x272   :  { %v3977_v42 = vpop.f32.mrf.mxu0  ;;  %v4097_v43 = vpop.f32.mrf.mxu1  ;;  %v5884_v28 = vmax.f32 %v5882_v32, %v5883_v39 }
 0x273   :  { %3508 = vst [vmem:[%s5638_s3 + $0xb0] sm:$0xff] %v3460_v24   ;;  %v2406_v53 = vmax.f32 %v1797_v8, %v2316_v23  ;;  %v2526_v63 = vmax.f32 %v2469_v51, 0.0  ;;  %v5885_v51 = vld [vmem:[#allocation60_spill] sm:$0xff] }
 0x274   :  { %v1712_v61 = vpop.f32.mrf.mxu0  ;;  %v2321_v11 = vpop.f32.mrf.mxu1 }
 0x275   :  { %v2470_v12 = vadd.f32 %v5277_v0, %v2406_v53  ;;  %v1798_v62 = vmax.f32 %v5872_v20, %v1712_v61  ;;  %v5886_v53 = vld [vmem:[#allocation61_spill] sm:$0xff] }
 0x276   :  { %v3980_v46 = vpop.f32.mrf.mxu0  ;;  %v4100_v52 = vpop.f32.mrf.mxu1  ;;  %v5887_v61 = vmax.f32 %v5885_v51, %v5886_v53 }
 0x277   :  { %v2527_v47 = vmax.f32 %v2470_v12, 0.0  ;;  %v2407_v48 = vmax.f32 %v1798_v62, %v2321_v11 }
 0x278   :  { %v1715_v30 = vpop.f32.mrf.mxu0  ;;  %v2324_v31 = vpop.f32.mrf.mxu1 }
 0x279   :  { %v3465_v37 = vpack.c.bf16 %v2527_v47, %v2526_v63  ;;  %v1799_v60 = vmax.f32 %v5875_v40, %v1715_v30  ;;  %v2471_v34 = vadd.f32 %v5277_v0, %v2407_v48  ;;  %v5888_v63 = vld [vmem:[#allocation62_spill] sm:$0xff]  ;;  %v5889_v47 = vld [vmem:[#allocation63_spill] sm:$0xff] }
 0x27a   :  { %v3981_v21 = vpop.f32.mrf.mxu0  ;;  %v4101_v33 = vpop.f32.mrf.mxu1  ;;  %v5890_v48 = vmax.f32 %v5888_v63, %v5889_v47 }
 0x27b   :  { %3509 = vst [vmem:[%s5638_s3 + $0xb8] sm:$0xff] %v3465_v37   ;;  %v2408_v57 = vmax.f32 %v1799_v60, %v2324_v31  ;;  %v2528_v58 = vmax.f32 %v2471_v34, 0.0  ;;  %v5891_v34 = vld [vmem:[#allocation64_spill] sm:$0xff] }
 0x27c   :  { %v1720_v27 = vpop.f32.mrf.mxu0  ;;  %v2329_v18 = vpop.f32.mrf.mxu1 }
 0x27d   :  { %v2472_v54 = vadd.f32 %v5277_v0, %v2408_v57  ;;  %v1800_v50 = vmax.f32 %v5878_v49, %v1720_v27  ;;  %v5892_v57 = vld [vmem:[#allocation65_spill] sm:$0xff] }
 0x27e   :  { %v3984_v55 = vpop.f32.mrf.mxu0  ;;  %v4104_v19 = vpop.f32.mrf.mxu1  ;;  %v5893_v27 = vmax.f32 %v5891_v34, %v5892_v57 }
 0x27f   :  { %v2529_v35 = vmax.f32 %v2472_v54, 0.0  ;;  %v2409_v36 = vmax.f32 %v1800_v50, %v2329_v18 }
 0x280   :  { %v1723_v6 = vpop.f32.mrf.mxu0  ;;  %v2332_v7 = vpop.f32.mrf.mxu1 }
 0x281   :  { %v3470_v9 = vpack.c.bf16 %v2529_v35, %v2528_v58  ;;  %v1801_v5 = vmax.f32 %v5881_v2, %v1723_v6  ;;  %v2473_v22 = vadd.f32 %v5277_v0, %v2409_v36  ;;  %v5894_v58 = vld [vmem:[#allocation66_spill] sm:$0xff]  ;;  %v5895_v35 = vld [vmem:[#allocation67_spill] sm:$0xff] }
 0x282   :  { %v3985_v10 = vpop.f32.mrf.mxu0  ;;  %v4105_v15 = vpop.f32.mrf.mxu1  ;;  %v5896_v36 = vmax.f32 %v5894_v58, %v5895_v35 }
 0x283   :  { %3510 = vst [vmem:[%s5638_s3 + $0xc0] sm:$0xff] %v3470_v9   ;;  %v2410_v3 = vmax.f32 %v1801_v5, %v2332_v7  ;;  %v2530_v44 = vmax.f32 %v2473_v22, 0.0 }
 0x284   :  { %v1728_v59 = vpop.f32.mrf.mxu0  ;;  %v2337_v56 = vpop.f32.mrf.mxu1 }
 0x285   :  { %v2474_v17 = vadd.f32 %v5277_v0, %v2410_v3  ;;  %v1802_v29 = vmax.f32 %v5884_v28, %v1728_v59 }
 0x286   :  { %v3988_v23 = vpop.f32.mrf.mxu0  ;;  %v4108_v24 = vpop.f32.mrf.mxu1 }
 0x287   :  { %v2531_v14 = vmax.f32 %v2474_v17, 0.0  ;;  %v2411_v16 = vmax.f32 %v1802_v29, %v2337_v56 }
 0x288   :  { %v1731_v8 = vpop.f32.mrf.mxu0  ;;  %v2340_v42 = vpop.f32.mrf.mxu1 }
 0x289   :  { %v3475_v43 = vpack.c.bf16 %v2531_v14, %v2530_v44  ;;  %v1803_v11 = vmax.f32 %v5887_v61, %v1731_v8  ;;  %v2475_v26 = vadd.f32 %v5277_v0, %v2411_v16 }
 0x28a   :  { %v3989_v12 = vpop.f32.mrf.mxu0  ;;  %v4109_v25 = vpop.f32.mrf.mxu1 }
 0x28b   :  { %3511 = vst [vmem:[%s5638_s3 + $0xc8] sm:$0xff] %v3475_v43   ;;  %v2412_v20 = vmax.f32 %v1803_v11, %v2340_v42  ;;  %v2532_v45 = vmax.f32 %v2475_v26, 0.0 }
 0x28c   :  { %v1736_v62 = vpop.f32.mrf.mxu0  ;;  %v2345_v46 = vpop.f32.mrf.mxu1 }
 0x28d   :  { %v2476_v52 = vadd.f32 %v5277_v0, %v2412_v20  ;;  %v1804_v30 = vmax.f32 %v5890_v48, %v1736_v62  ;;  %v4239_v0 = vld [vmem:[%s5637_s2] ss:$0 sm:$0xff] }
 0x28e   :  { %v3992_v31 = vpop.f32.mrf.mxu0  ;;  %v4112_v37 = vpop.f32.mrf.mxu1 }
 0x28f   :  { %v2533_v38 = vmax.f32 %v2476_v52, 0.0  ;;  %v2413_v40 = vmax.f32 %v1804_v30, %v2345_v46 }
 0x290   :  { %v1739_v60 = vpop.f32.mrf.mxu0  ;;  %v2348_v21 = vpop.f32.mrf.mxu1 }
 0x291   :  { %v3480_v33 = vpack.c.bf16 %v2533_v38, %v2532_v45  ;;  %v1805_v18 = vmax.f32 %v5893_v27, %v1739_v60  ;;  %v2477_v13 = vadd.f32 %v4239_v0, %v2413_v40 }
 0x292   :  { %v3993_v54 = vpop.f32.mrf.mxu0  ;;  %v4113_v41 = vpop.f32.mrf.mxu1 }
 0x293   :  { %3512 = vst [vmem:[%s5638_s3 + $0xd0] sm:$0xff] %v3480_v33   ;;  %v2414_v49 = vmax.f32 %v1805_v18, %v2348_v21  ;;  %v2534_v4 = vmax.f32 %v2477_v13, 0.0 }
 0x294   :  { %v1744_v50 = vpop.f32.mrf.mxu0  ;;  %v2353_v55 = vpop.f32.mrf.mxu1 }
 0x295   :  { %v2478_v19 = vadd.f32 %v4239_v0, %v2414_v49  ;;  %v1806_v6 = vmax.f32 %v5896_v36, %v1744_v50 }
 0x296   :  { %v3996_v7 = vpop.f32.mrf.mxu0  ;;  %v4116_v9 = vpop.f32.mrf.mxu1 }
 0x297   :  { %v2535_v1 = vmax.f32 %v2478_v19, 0.0  ;;  %v2415_v2 = vmax.f32 %v1806_v6, %v2353_v55 }
 0x298   :  { %v1747_v5 = vpop.f32.mrf.mxu0  ;;  %v2356_v10 = vpop.f32.mrf.mxu1 }
 0x299   :  { %v3485_v15 = vpack.c.bf16 %v2535_v1, %v2534_v4  ;;  %v2479_v22 = vadd.f32 %v4239_v0, %v2415_v2 }
 0x29a   :  { %v3997_v3 = vpop.f32.mrf.mxu0  ;;  %v4117_v59 = vpop.f32.mrf.mxu1 }
 0x29b   :  { %3513 = vst [vmem:[%s5638_s3 + $0xd8] sm:$0xff] %v3485_v15   ;;  %v2536_v56 = vmax.f32 %v2479_v22, 0.0 }
 0x29d   :  { %v3346_v17 = vpack.c.bf16 %v2536_v56, %v2536_v56 }
 0x29f   :  { %2822 = vst [vmem:[%s5638_s3 + $0xe0] sm:$0x1] %v3346_v17 }

// kernel: _lambda_.5
= control target key start
LH: loop header
LB: loop body
LE: loop exit
PB: predicated region body
PF: predicated region fallthrough
CT: control target
= control target key end

     0   :  { %v1855_v0 = vmov 0.0   ;;  %vm1856_vm0 = vmmov 0   ;;  %vm247_vm1 = vcmask 261120   ;;  %s2434_s1 = inlined_call_operand.vmem [shape: bf16[288,128], index: 1, kind: input, shape index: {}]   ;;  %s2435_s0 = inlined_call_operand.vmem [shape: bf16[4,72,288], index: 0, kind: input, shape index: {}]   ;;  %s2436_s2 = inlined_call_operand.vmem [shape: f32[1,128], index: 2, kind: input, shape index: {}]   ;;  %s2437_s3 = inlined_call_operand.vmem [shape: bf16[72,128], index: 3, kind: output, shape index: {}]  }
   0x1   :  { %1659 = vmatprep.subr.bf16.mxu1 %v1855_v0  ;;  %v1881_v1 = vld [vmem:[%s2434_s1 + $0x78] sm:$0xff]   ;;  %1663 = vmatprep.mubr.msk.bf16.mxu1 %vm1856_vm0, %v1855_v0  ;;  %v1888_v2 = vld [vmem:[%s2434_s1 + $0x88] sm:$0xff]   ;;  %v1900_v4 = vld [vmem:[%s2434_s1 + $0x70] sm:$0xff]  }
   0x2   :  { %1447 = vmatprep.subr.bf16.mxu0 %v1881_v1  ;;  %v1894_v3 = vld [vmem:[%s2434_s1 + $0x38] sm:$0xff]   ;;  %1660 = vmatpush3.bf16.msra.mxu1 %v1888_v2  ;;  %v1907_v5 = vld [vmem:[%s2434_s1 + $0x80] sm:$0xff]   ;;  %v1913_v6 = vld [vmem:[%s2434_s1 + $0x30] sm:$0xff]  }
   0x3   :  { %1448 = vmatpush3.bf16.msra.mxu0 %v1894_v3  ;;  %1661 = vmatprep.subr.bf16.mxu1 %v1855_v0  ;;  %v1767_v7 = vld [vmem:[%s2435_s0 + $0x8] ss:$12 sps:$4 sm:$0xff]   ;;  %v1935_v10 = vld [vmem:[%s2434_s1 + $0x60] sm:$0xff]   ;;  %v1952_v12 = vld [vmem:[%s2434_s1 + $0x58] sm:$0xff]  }
   0x4   :  { %1449 = vmatprep.subr.bf16.mxu0 %v1900_v4  ;;  %v1922_v8 = vld [vmem:[%s2434_s1 + $0x68] sm:$0xff]   ;;  %v1945_v11 = vld [vmem:[%s2434_s1 + $0x20] sm:$0xff]   ;;  %v1962_v14 = vld [vmem:[%s2434_s1 + $0x18] sm:$0xff]  }
   0x5   :  { %v1928_v9 = vld [vmem:[%s2434_s1 + $0x28] sm:$0xff]   ;;  %v1969_v15 = vld [vmem:[%s2434_s1 + $0x50] sm:$0xff]   ;;  %v1777_v17 = vld [vmem:[%s2435_s0 + $0x38] ss:$12 sps:$4 sm:$0xff]  }
   0x6   :  { %1662 = vmatpush3.bf16.msra.mxu1 %v1907_v5  ;;  %v1772_v13 = vld [vmem:[%s2435_s0 + $0x20] ss:$12 sps:$4 sm:$0xff]   ;;  %v1975_v16 = vld [vmem:[%s2434_s1 + $0x10] sm:$0xff]   ;;  %v1786_v25 = vld [vmem:[%s2435_s0 + $0x1c] ss:$12 sps:$4 sm:$0xff]  }
   0x7   :  { %1450 = vmatpush3.bf16.msra.mxu0 %v1913_v6  ;;  %1500 = vmatprep.subr.bf16.mxu1 %v1881_v1  ;;  %v1989_v18 = vld [vmem:[%s2434_s1 + $0x48] sm:$0xff]   ;;  %v1784_v19 = vld [vmem:[%s2435_s0 + $0x4] ss:$12 sps:$4 sm:$0xff]   ;;  %v1793_v29 = vld [vmem:[%s2435_s0 + $0x34] ss:$12 sps:$4 sm:$0xff]  }
   0x8   :  { %1451 = vmatprep.subr.bf16.mxu0 %v1922_v8  ;;  %v1999_v20 = vld [vmem:[%s2434_s1 + $0x8] sm:$0xff]   ;;  %295 = vmatprep.mubr.bf16.mxu0 %v1784_v19  ;;  %v2005_v21 = vld [vmem:[%s2434_s1 + $0x40] sm:$0xff]   ;;  %v1785_v23 = vld [vmem:[%s2435_s0 + $0x50] ss:$12 sps:$4 sm:$0xff]  }
   0x9   :  { %1664 = vmatmul.mubr.msk.bf16.vlgmr.msra.gmra.mxu1 %vm247_vm1, %v1767_v7  ;;  %v2016_v22 = vld [vmem:[%s2434_s1] sm:$0xff]   ;;  %v1788_v26 = vld [vmem:[%s2435_s0 + $0x68] ss:$0 sps:$4 sm:$0xff]   ;;  %v1792_v28 = vld [vmem:[%s2435_s0 + $0x70] ss:$12 sps:$4 sm:$0xff]  }
   0xa   :  { %1667 = vmatprep.mubr.msk.bf16.mxu1 %vm1856_vm0, %v1855_v0  ;;  %1501 = vmatpush3.bf16.msra.mxu1 %v1894_v3  ;;  %v1782_v24 = vld [vmem:[%s2435_s0] ss:$12 sps:$4 sm:$0xff]   ;;  %v1789_v27 = vld [vmem:[%s2435_s0 + $0x18] ss:$12 sps:$4 sm:$0xff]   ;;  %v1795_v31 = vld [vmem:[%s2435_s0 + $0x30] ss:$12 sps:$4 sm:$0xff]  }
   0xb   :  { %1452 = vmatpush3.bf16.msra.mxu0 %v1928_v9  ;;  %1502 = vmatprep.subr.bf16.mxu1 %v1900_v4  ;;  %v1790_v30 = vld [vmem:[%s2435_s0 + $0x6c] ss:$12 sps:$4 sm:$0xff]   ;;  %v1796_v32 = vld [vmem:[%s2435_s0 + $0x88] ss:$12 sps:$4 sm:$0xff]   ;;  %v67_v34 = vld [vmem:[%s2435_s0 + $0x60] sm:$0xff] }
   0xc   :  { %1453 = vmatprep.subr.bf16.mxu0 %v1935_v10  ;;  %v1798_v33 = vld [vmem:[%s2435_s0 + $0x4c] ss:$12 sps:$4 sm:$0xff]   ;;  %v1800_v35 = vld [vmem:[%s2435_s0 + $0x84] ss:$12 sps:$4 sm:$0xff]   ;;  %v1801_v36 = vld [vmem:[%s2435_s0 + $0x48] ss:$12 sps:$4 sm:$0xff]   ;;  %v1266_v38 = vcombine.high %v67_v34, %v67_v34  ;;  %v1265_v40 = vcombine.low %v67_v34, %v67_v34 }
   0xd   :  { %v1802_v37 = vld [vmem:[%s2435_s0 + $0xa0] ss:$12 sps:$4 sm:$0xff]   ;;  %v1805_v39 = vld [vmem:[%s2435_s0 + $0x9c] ss:$12 sps:$4 sm:$0xff]   ;;  %v1807_v41 = vld [vmem:[%s2435_s0 + $0xb8] ss:$12 sps:$4 sm:$0xff]  }
   0xe   :  { %1503 = vmatpush3.bf16.msra.mxu1 %v1913_v6  ;;  %v1307_v42 = vld [vmem:[%s2435_s0 + $0xcc] sm:$0xff]  ;;  %v1809_v43 = vld [vmem:[%s2435_s0 + $0xb4] ss:$12 sps:$4 sm:$0xff]   ;;  %v1816_v48 = vld [vmem:[%s2435_s0 + $0xdc] ss:$12 sps:$4 sm:$0xff]  }
   0xf   :  { %1454 = vmatpush3.bf16.msra.mxu0 %v1945_v11  ;;  %1504 = vmatprep.subr.bf16.mxu1 %v1922_v8  ;;  %v1810_v44 = vld [vmem:[%s2435_s0 + $0x74] ss:$12 sps:$4 sm:$0xff]   ;;  %v1322_v45 = vcombine.high %v1307_v42, %v1307_v42  ;;  %v1321_v46 = vcombine.low %v1307_v42, %v1307_v42  ;;  %v1813_v47 = vld [vmem:[%s2435_s0 + $0x8c] ss:$12 sps:$4 sm:$0xff]   ;;  %v1817_v50 = vld [vmem:[%s2435_s0 + $0xa4] ss:$12 sps:$4 sm:$0xff]  }
  0x10   :  { %1455 = vmatprep.subr.bf16.mxu0 %v1952_v12  ;;  %v1814_v49 = vld [vmem:[%s2435_s0 + $0xd8] ss:$12 sps:$4 sm:$0xff]   ;;  %v1818_v51 = vld [vmem:[%s2435_s0 + $0xf4] ss:$12 sps:$4 sm:$0xff]   ;;  %v1820_v52 = vld [vmem:[%s2435_s0 + $0xf0] ss:$12 sps:$4 sm:$0xff]  }
  0x11   :  { %1668 = vmatmul.mubr.msk.bf16.gmra.mxu1 %vm247_vm1, %v1772_v13  ;;  %v1821_v53 = vld [vmem:[%s2435_s0 + $0xbc] ss:$12 sps:$4 sm:$0xff]   ;;  %v1822_v54 = vld [vmem:[%s2435_s0 + $0x10c] ss:$12 sps:$4 sm:$0xff]   ;;  %v1825_v56 = vld [vmem:[%s2435_s0 + $0xd4] ss:$0 sps:$4 sm:$0xff]  }
  0x12   :  { %1671 = vmatprep.mubr.msk.bf16.mxu1 %vm1856_vm0, %v1855_v0  ;;  %1505 = vmatpush3.bf16.msra.mxu1 %v1928_v9  ;;  %v1824_v55 = vld [vmem:[%s2435_s0 + $0x108] ss:$12 sps:$4 sm:$0xff]   ;;  %v1826_v57 = vld [vmem:[%s2435_s0 + $0x124] ss:$12 sps:$4 sm:$0xff]   ;;  %v1345_v58 = vld [vmem:[%s2435_s0 + $0x138] sm:$0xff] }
  0x13   :  { %1456 = vmatpush3.bf16.msra.mxu0 %v1962_v14  ;;  %1506 = vmatprep.subr.bf16.mxu1 %v1935_v10  ;;  %v1828_v59 = vld [vmem:[%s2435_s0 + $0x120] ss:$12 sps:$4 sm:$0xff]   ;;  %v1360_v61 = vcombine.high %v1345_v58, %v1345_v58  ;;  %v1359_v62 = vcombine.low %v1345_v58, %v1345_v58  ;;  %v1832_v63 = vld [vmem:[%s2435_s0 + $0xf8] ss:$12 sps:$4 sm:$0xff]   ;;  %v1839_v7 = vld [vmem:[%s2435_s0 + $0x15c] ss:$12 sps:$4 sm:$0xff]  }
  0x14   :  { %1457 = vmatprep.subr.bf16.mxu0 %v1969_v15  ;;  %v1829_v60 = vld [vmem:[%s2435_s0 + $0xe0] ss:$12 sps:$4 sm:$0xff]  }
  0x15   :  { %v1848_v13 = vld [vmem:[%s2435_s0 + $0x14c] ss:$12 sps:$4 sm:$0xff]   ;;  %v1854_v19 = vld [vmem:[%s2435_s0 + $0x194] ss:$12 sps:$4 sm:$0xff]  }
  0x16   :  { %1507 = vmatpush3.bf16.msra.mxu1 %v1945_v11 }
  0x17   :  { %1458 = vmatpush3.bf16.msra.mxu0 %v1975_v16  ;;  %1508 = vmatprep.subr.bf16.mxu1 %v1952_v12 }
  0x18   :  { %1459 = vmatprep.subr.bf16.mxu0 %v1989_v18 }
  0x19   :  { %1672 = vmatmul.mubr.msk.bf16.gmra.mxu1 %vm247_vm1, %v1777_v17  ;;  %v1852_v17 = vld [vmem:[%s2435_s0 + $0x1ac] ss:$0 sps:$4 sm:$0xff]  }
  0x1a   :  { %1675 = vmatprep.mubr.msk.bf16.mxu1 %vm1856_vm0, %v1855_v0  ;;  %1509 = vmatpush3.bf16.msra.mxu1 %v1962_v14 }
  0x1b   :  { %1460 = vmatpush3.bf16.msra.mxu0 %v1999_v20  ;;  %1510 = vmatprep.subr.bf16.mxu1 %v1969_v15 }
  0x1c   :  { %1461 = vmatprep.subr.bf16.mxu0 %v2005_v21 }
  0x1e   :  { %1511 = vmatpush3.bf16.msra.mxu1 %v1975_v16 }
  0x1f   :  { %1462 = vmatpush3.bf16.msra.mxu0 %v2016_v22  ;;  %1512 = vmatprep.subr.bf16.mxu1 %v1989_v18 }
  0x20   :  { %1683 = vmatprep.subr.bf16.mxu0 %v1855_v0 }
  0x21   :  { %1676 = vmatmul.mubr.msk.bf16.gmra.mxu1 %vm247_vm1, %v1785_v23 }
  0x22   :  { %296 = vmatmul.mubr.bf16.vlgmr.msra.gmra.mxu0 %v1782_v24  ;;  %1679 = vmatprep.mubr.msk.bf16.mxu1 %vm1856_vm0, %v1855_v0 }
  0x23   :  { %1684 = vmatpush3.bf16.msra.mxu0 %v1888_v2  ;;  %303 = vmatprep.mubr.bf16.mxu0 %v1786_v25 }
  0x24   :  { %1513 = vmatpush3.bf16.msra.mxu1 %v1999_v20  ;;  %1685 = vmatprep.subr.bf16.mxu0 %v1855_v0 }
  0x25   :  { %1514 = vmatprep.subr.bf16.mxu1 %v2005_v21 }
  0x27   :  { %1686 = vmatpush3.bf16.msra.mxu0 %v1907_v5 }
  0x28   :  { %1515 = vmatpush3.bf16.msra.mxu1 %v2016_v22  ;;  %1707 = vmatprep.subr.bf16.mxu0 %v1855_v0 }
  0x29   :  { %1680 = vmatmul.mubr.msk.bf16.gmra.mxu1 %vm247_vm1, %v1788_v26  ;;  %1553 = vmatprep.subr.bf16.mxu1 %v1881_v1 }
  0x2a   :  { %304 = vmatmul.mubr.bf16.gmra.mxu0 %v1789_v27  ;;  %543 = vmatprep.mubr.bf16.mxu1 %v1792_v28 }
  0x2b   :  { %311 = vmatprep.mubr.bf16.mxu0 %v1793_v29 }
  0x31   :  { %544 = vmatmul.mubr.bf16.vlgmr.msra.gmra.mxu1 %v1790_v30 }
  0x32   :  { %312 = vmatmul.mubr.bf16.gmra.mxu0 %v1795_v31  ;;  %551 = vmatprep.mubr.bf16.mxu1 %v1796_v32 }
  0x33   :  { %319 = vmatprep.mubr.bf16.mxu0 %v1798_v33  ;;  %1554 = vmatpush3.bf16.msra.mxu1 %v1894_v3 }
  0x34   :  { %1555 = vmatprep.subr.bf16.mxu1 %v1900_v4 }
  0x37   :  { %1556 = vmatpush3.bf16.msra.mxu1 %v1913_v6 }
  0x38   :  { %1557 = vmatprep.subr.bf16.mxu1 %v1922_v8 }
  0x39   :  { %552 = vmatmul.mubr.bf16.gmra.mxu1 %v1800_v35 }
  0x3a   :  { %320 = vmatmul.mubr.bf16.gmra.mxu0 %v1801_v36  ;;  %559 = vmatprep.mubr.bf16.mxu1 %v1802_v37 }
  0x3b   :  { %327 = vmatprep.mubr.bf16.mxu0 %v1266_v38  ;;  %1558 = vmatpush3.bf16.msra.mxu1 %v1928_v9 }
  0x3c   :  { %1559 = vmatprep.subr.bf16.mxu1 %v1935_v10 }
  0x3f   :  { %1560 = vmatpush3.bf16.msra.mxu1 %v1945_v11 }
  0x40   :  { %1561 = vmatprep.subr.bf16.mxu1 %v1952_v12 }
  0x41   :  { %560 = vmatmul.mubr.bf16.gmra.mxu1 %v1805_v39 }
  0x42   :  { %328 = vmatmul.mubr.bf16.gmra.mxu0 %v1265_v40  ;;  %567 = vmatprep.mubr.bf16.mxu1 %v1807_v41 }
  0x43   :  { %1687 = vmatprep.mubr.msk.bf16.mxu0 %vm1856_vm0, %v1855_v0  ;;  %1562 = vmatpush3.bf16.msra.mxu1 %v1962_v14 }
  0x44   :  { %1563 = vmatprep.subr.bf16.mxu1 %v1969_v15 }
  0x47   :  { %1564 = vmatpush3.bf16.msra.mxu1 %v1975_v16 }
  0x48   :  { %1565 = vmatprep.subr.bf16.mxu1 %v1989_v18 }
  0x49   :  { %568 = vmatmul.mubr.bf16.gmra.mxu1 %v1809_v43 }
  0x4a   :  { %1688 = vmatmul.mubr.msk.bf16.vlgmr.msra.gmra.mxu0 %vm247_vm1, %v1810_v44  ;;  %575 = vmatprep.mubr.bf16.mxu1 %v1322_v45 }
  0x4b   :  { %1708 = vmatpush3.bf16.msra.mxu0 %v1888_v2  ;;  %1691 = vmatprep.mubr.msk.bf16.mxu0 %vm1856_vm0, %v1855_v0 }
  0x4c   :  { %1566 = vmatpush3.bf16.msra.mxu1 %v1999_v20  ;;  %1709 = vmatprep.subr.bf16.mxu0 %v1855_v0 }
  0x4d   :  { %1567 = vmatprep.subr.bf16.mxu1 %v2005_v21 }
  0x4f   :  { %1710 = vmatpush3.bf16.msra.mxu0 %v1907_v5 }
  0x50   :  { %1568 = vmatpush3.bf16.msra.mxu1 %v2016_v22  ;;  %1731 = vmatprep.subr.bf16.mxu0 %v1855_v0 }
  0x51   :  { %576 = vmatmul.mubr.bf16.gmra.mxu1 %v1321_v46  ;;  %1606 = vmatprep.subr.bf16.mxu1 %v1881_v1  ;;  %v1835_v1 = vld [vmem:[%s2435_s0 + $0x148] ss:$12 sps:$4 sm:$0xff]  }
  0x52   :  { %1692 = vmatmul.mubr.msk.bf16.gmra.mxu0 %vm247_vm1, %v1813_v47  ;;  %800 = vmatprep.mubr.bf16.mxu1 %v1816_v48 }
  0x53   :  { %1695 = vmatprep.mubr.msk.bf16.mxu0 %vm1856_vm0, %v1855_v0 }
  0x59   :  { %801 = vmatmul.mubr.bf16.vlgmr.msra.gmra.mxu1 %v1814_v49 }
  0x5a   :  { %1696 = vmatmul.mubr.msk.bf16.gmra.mxu0 %vm247_vm1, %v1817_v50  ;;  %808 = vmatprep.mubr.bf16.mxu1 %v1818_v51 }
  0x5b   :  { %1699 = vmatprep.mubr.msk.bf16.mxu0 %vm1856_vm0, %v1855_v0  ;;  %1607 = vmatpush3.bf16.msra.mxu1 %v1894_v3  ;;  %v1833_v3 = vld [vmem:[%s2435_s0 + $0x144] ss:$12 sps:$4 sm:$0xff]  }
  0x5c   :  { %1608 = vmatprep.subr.bf16.mxu1 %v1900_v4  ;;  %v1836_v4 = vld [vmem:[%s2435_s0 + $0x110] ss:$12 sps:$4 sm:$0xff]  }
  0x5f   :  { %1609 = vmatpush3.bf16.msra.mxu1 %v1913_v6  ;;  %v1837_v6 = vld [vmem:[%s2435_s0 + $0x160] ss:$12 sps:$4 sm:$0xff]  }
  0x60   :  { %1610 = vmatprep.subr.bf16.mxu1 %v1922_v8  ;;  %v1840_v8 = vld [vmem:[%s2435_s0 + $0x128] ss:$12 sps:$4 sm:$0xff]  }
  0x61   :  { %809 = vmatmul.mubr.bf16.gmra.mxu1 %v1820_v52 }
  0x62   :  { %1700 = vmatmul.mubr.msk.bf16.gmra.mxu0 %vm247_vm1, %v1821_v53  ;;  %816 = vmatprep.mubr.bf16.mxu1 %v1822_v54 }
  0x63   :  { %1703 = vmatprep.mubr.msk.bf16.mxu0 %vm1856_vm0, %v1855_v0  ;;  %1611 = vmatpush3.bf16.msra.mxu1 %v1928_v9  ;;  %v1841_v9 = vld [vmem:[%s2435_s0 + $0x178] ss:$12 sps:$4 sm:$0xff]  }
  0x64   :  { %1612 = vmatprep.subr.bf16.mxu1 %v1935_v10  ;;  %v1844_v10 = vld [vmem:[%s2435_s0 + $0x140] ss:$0 sps:$4 sm:$0xff]  }
  0x67   :  { %1613 = vmatpush3.bf16.msra.mxu1 %v1945_v11  ;;  %v1845_v11 = vld [vmem:[%s2435_s0 + $0x190] ss:$12 sps:$4 sm:$0xff]  }
  0x68   :  { %1614 = vmatprep.subr.bf16.mxu1 %v1952_v12  ;;  %v1847_v12 = vld [vmem:[%s2435_s0 + $0x18c] ss:$12 sps:$4 sm:$0xff]  }
  0x69   :  { %817 = vmatmul.mubr.bf16.gmra.mxu1 %v1824_v55 }
  0x6a   :  { %1704 = vmatmul.mubr.msk.bf16.gmra.mxu0 %vm247_vm1, %v1825_v56  ;;  %824 = vmatprep.mubr.bf16.mxu1 %v1826_v57 }
  0x6b   :  { %1711 = vmatprep.mubr.msk.bf16.mxu0 %vm1856_vm0, %v1855_v0  ;;  %1615 = vmatpush3.bf16.msra.mxu1 %v1962_v14 }
  0x6c   :  { %1616 = vmatprep.subr.bf16.mxu1 %v1969_v15 }
  0x6f   :  { %1617 = vmatpush3.bf16.msra.mxu1 %v1975_v16  ;;  %v1851_v16 = vld [vmem:[%s2435_s0 + $0x164] ss:$12 sps:$4 sm:$0xff]  }
  0x70   :  { %1618 = vmatprep.subr.bf16.mxu1 %v1989_v18  ;;  %v1853_v18 = vld [vmem:[%s2435_s0 + $0x17c] ss:$12 sps:$4 sm:$0xff]  }
  0x71   :  { %825 = vmatmul.mubr.bf16.gmra.mxu1 %v1828_v59 }
  0x72   :  { %1712 = vmatmul.mubr.msk.bf16.vlgmr.msra.gmra.mxu0 %vm247_vm1, %v1829_v60  ;;  %832 = vmatprep.mubr.bf16.mxu1 %v1360_v61 }
  0x73   :  { %1732 = vmatpush3.bf16.msra.mxu0 %v1888_v2  ;;  %1715 = vmatprep.mubr.msk.bf16.mxu0 %vm1856_vm0, %v1855_v0 }
  0x74   :  { %1619 = vmatpush3.bf16.msra.mxu1 %v1999_v20  ;;  %1733 = vmatprep.subr.bf16.mxu0 %v1855_v0 }
  0x75   :  { %1620 = vmatprep.subr.bf16.mxu1 %v2005_v21 }
  0x77   :  { %1734 = vmatpush3.bf16.msra.mxu0 %v1907_v5 }
  0x78   :  { %1621 = vmatpush3.bf16.msra.mxu1 %v2016_v22 }
  0x79   :  { %833 = vmatmul.mubr.bf16.gmra.mxu1 %v1359_v62  ;;  %1755 = vmatprep.subr.bf16.mxu1 %v1855_v0 }
  0x7a   :  { %1716 = vmatmul.mubr.msk.bf16.gmra.mxu0 %vm247_vm1, %v1832_v63  ;;  %1057 = vmatprep.mubr.bf16.mxu1 %v1835_v1 }
  0x7b   :  { %1719 = vmatprep.mubr.msk.bf16.mxu0 %vm1856_vm0, %v1855_v0 }
  0x81   :  { %1058 = vmatmul.mubr.bf16.vlgmr.msra.gmra.mxu1 %v1833_v3 }
  0x82   :  { %1720 = vmatmul.mubr.msk.bf16.gmra.mxu0 %vm247_vm1, %v1836_v4  ;;  %1065 = vmatprep.mubr.bf16.mxu1 %v1837_v6 }
  0x83   :  { %1723 = vmatprep.mubr.msk.bf16.mxu0 %vm1856_vm0, %v1855_v0  ;;  %1757 = vmatpush3.bf16.msra.mxu1 %v1888_v2  ;;  %v1843_v2 = vld [vmem:[%s2435_s0 + $0x174] ss:$12 sps:$4 sm:$0xff]  }
  0x84   :  { %1756 = vmatprep.subr.bf16.mxu1 %v1855_v0 }
  0x87   :  { %1758 = vmatpush3.bf16.msra.mxu1 %v1907_v5  ;;  %v1383_v5 = vld [vmem:[%s2435_s0 + $0x1a4] sm:$0xff] }
  0x88   :  { %v1398_v14 = vcombine.high %v1383_v5, %v1383_v5  ;;  %v1397_v15 = vcombine.low %v1383_v5, %v1383_v5 }
  0x89   :  { %1066 = vmatmul.mubr.bf16.gmra.mxu1 %v1839_v7 }
  0x8a   :  { %1724 = vmatmul.mubr.msk.bf16.gmra.mxu0 %vm247_vm1, %v1840_v8  ;;  %1073 = vmatprep.mubr.bf16.mxu1 %v1841_v9 }
  0x8b   :  { %1727 = vmatprep.mubr.msk.bf16.mxu0 %vm1856_vm0, %v1855_v0 }
  0x91   :  { %1074 = vmatmul.mubr.bf16.gmra.mxu1 %v1843_v2 }
  0x92   :  { %1728 = vmatmul.mubr.msk.bf16.gmra.mxu0 %vm247_vm1, %v1844_v10  ;;  %1081 = vmatprep.mubr.bf16.mxu1 %v1845_v11 }
  0x93   :  { %1735 = vmatprep.mubr.msk.bf16.mxu0 %vm1856_vm0, %v1855_v0 }
  0x99   :  { %1082 = vmatmul.mubr.bf16.gmra.mxu1 %v1847_v12 }
  0x9a   :  { %1736 = vmatmul.mubr.msk.bf16.vlgmr.msra.gmra.mxu0 %vm247_vm1, %v1848_v13  ;;  %1089 = vmatprep.mubr.bf16.mxu1 %v1398_v14 }
  0x9b   :  { %1739 = vmatprep.mubr.msk.bf16.mxu0 %vm1856_vm0, %v1855_v0 }
  0xa1   :  { %1090 = vmatmul.mubr.bf16.gmra.mxu1 %v1397_v15 }
  0xa2   :  { %1740 = vmatmul.mubr.msk.bf16.gmra.mxu0 %vm247_vm1, %v1851_v16  ;;  %1751 = vmatprep.mubr.msk.bf16.mxu1 %vm1856_vm0, %v1855_v0 }
  0xa3   :  { %1743 = vmatprep.mubr.msk.bf16.mxu0 %vm1856_vm0, %v1855_v0 }
  0xa9   :  { %1752 = vmatmul.mubr.msk.bf16.vlgmr.msra.gmra.mxu1 %vm247_vm1, %v1852_v17 }
  0xaa   :  { %1744 = vmatmul.mubr.msk.bf16.gmra.mxu0 %vm247_vm1, %v1853_v18 }
  0xab   :  { %1747 = vmatprep.mubr.msk.bf16.mxu0 %vm1856_vm0, %v1855_v0 }
  0xb2   :  { %1748 = vmatmul.mubr.msk.bf16.gmra.mxu0 %vm247_vm1, %v1854_v19 }
  0xc9   :  { %v369_v20 = vpop.f32.mrf.mxu1 }
  0xcb   :  { %v1665_v21 = vpop.f32.mrf.mxu1 }
  0xcd   :  { %v372_v22 = vpop.f32.mrf.mxu1 }
  0xcf   :  { %v1666_v23 = vpop.f32.mrf.mxu1 }
  0xd1   :  { %v377_v24 = vpop.f32.mrf.mxu1 }
  0xd3   :  { %v1669_v25 = vpop.f32.mrf.mxu1 }
  0xd5   :  { %v380_v26 = vpop.f32.mrf.mxu1 }
  0xd7   :  { %v1670_v27 = vpop.f32.mrf.mxu1 }
  0xd9   :  { %v385_v28 = vpop.f32.mrf.mxu1 }
  0xdb   :  { %v1673_v29 = vpop.f32.mrf.mxu1 }
  0xdd   :  { %v388_v30 = vpop.f32.mrf.mxu1 }
  0xdf   :  { %v1674_v31 = vpop.f32.mrf.mxu1 }
  0xe1   :  { %v393_v32 = vpop.f32.mrf.mxu1 }
  0xe2   :  { %v1463_v0 = vpop.f32.mrf.mxu0 }
  0xe3   :  { %v1677_v33 = vpop.f32.mrf.mxu1 }
  0xe4   :  { %v1464_v34 = vpop.f32.mrf.mxu0 }
  0xe5   :  { %v1465_v35 = vadd.f32 %v1464_v34, %v1463_v0  ;;  %v396_v36 = vpop.f32.mrf.mxu1 }
  0xe6   :  { %v1466_v37 = vpop.f32.mrf.mxu0 }
  0xe7   :  { %v2279_v38 = vadd.f32 %v1465_v35, %v369_v20  ;;  %v1678_v39 = vpop.f32.mrf.mxu1 }
  0xe8   :  { %v1467_v40 = vpop.f32.mrf.mxu0 }
  0xe9   :  { %v1468_v41 = vadd.f32 %v1467_v40, %v1466_v37  ;;  %v401_v42 = vpop.f32.mrf.mxu1 }
  0xea   :  { %v1469_v43 = vpop.f32.mrf.mxu0 }
  0xeb   :  { %v2281_v44 = vadd.f32 %v1468_v41, %v372_v22  ;;  %v1681_v45 = vpop.f32.mrf.mxu1 }
  0xec   :  { %v1470_v46 = vpop.f32.mrf.mxu0 }
  0xed   :  { %v1471_v47 = vadd.f32 %v1470_v46, %v1469_v43  ;;  %v404_v48 = vpop.f32.mrf.mxu1 }
  0xee   :  { %v1472_v49 = vpop.f32.mrf.mxu0 }
  0xef   :  { %v2283_v50 = vadd.f32 %v1471_v47, %v377_v24  ;;  %v1682_v51 = vpop.f32.mrf.mxu1 }
  0xf0   :  { %v1473_v52 = vpop.f32.mrf.mxu0 }
  0xf1   :  { %v1474_v53 = vadd.f32 %v1473_v52, %v1472_v49  ;;  %v1516_v54 = vpop.f32.mrf.mxu1 }
  0xf2   :  { %v1475_v55 = vpop.f32.mrf.mxu0 }
  0xf3   :  { %v2285_v56 = vadd.f32 %v1474_v53, %v380_v26  ;;  %v1517_v57 = vpop.f32.mrf.mxu1 }
  0xf4   :  { %v1518_v58 = vadd.f32 %v1517_v57, %v1516_v54  ;;  %v1476_v59 = vpop.f32.mrf.mxu0 }
  0xf5   :  { %v1477_v60 = vadd.f32 %v1476_v59, %v1475_v55  ;;  %v1519_v61 = vpop.f32.mrf.mxu1 }
  0xf6   :  { %v1478_v62 = vpop.f32.mrf.mxu0 }
  0xf7   :  { %v2287_v63 = vadd.f32 %v1477_v60, %v385_v28  ;;  %v1520_v1 = vpop.f32.mrf.mxu1 }
  0xf8   :  { %v1521_v3 = vadd.f32 %v1520_v1, %v1519_v61  ;;  %v1479_v4 = vpop.f32.mrf.mxu0 }
  0xf9   :  { %v1480_v6 = vadd.f32 %v1479_v4, %v1478_v62  ;;  %v1522_v7 = vpop.f32.mrf.mxu1 }
  0xfa   :  { %v1481_v8 = vpop.f32.mrf.mxu0 }
  0xfb   :  { %v2289_v9 = vadd.f32 %v1480_v6, %v388_v30  ;;  %v1523_v2 = vpop.f32.mrf.mxu1 }
  0xfc   :  { %v1524_v10 = vadd.f32 %v1523_v2, %v1522_v7  ;;  %v1482_v11 = vpop.f32.mrf.mxu0 }
  0xfd   :  { %v1483_v5 = vadd.f32 %v1482_v11, %v1481_v8  ;;  %v1525_v12 = vpop.f32.mrf.mxu1 }
  0xfe   :  { %v1484_v13 = vpop.f32.mrf.mxu0 }
  0xff   :  { %v2291_v14 = vadd.f32 %v1483_v5, %v393_v32  ;;  %v1526_v15 = vpop.f32.mrf.mxu1 }
 0x100   :  { %v1527_v16 = vadd.f32 %v1526_v15, %v1525_v12  ;;  %v1485_v17 = vpop.f32.mrf.mxu0 }
 0x101   :  { %v1486_v18 = vadd.f32 %v1485_v17, %v1484_v13  ;;  %v1528_v19 = vpop.f32.mrf.mxu1 }
 0x102   :  { %v1487_v20 = vpop.f32.mrf.mxu0 }
 0x103   :  { %v2293_v21 = vadd.f32 %v1486_v18, %v396_v36  ;;  %v1529_v22 = vpop.f32.mrf.mxu1 }
 0x104   :  { %v1530_v23 = vadd.f32 %v1529_v22, %v1528_v19  ;;  %v1488_v24 = vpop.f32.mrf.mxu0 }
 0x105   :  { %v1489_v25 = vadd.f32 %v1488_v24, %v1487_v20  ;;  %v1531_v26 = vpop.f32.mrf.mxu1 }
 0x106   :  { %v1490_v27 = vpop.f32.mrf.mxu0 }
 0x107   :  { %v2295_v28 = vadd.f32 %v1489_v25, %v401_v42  ;;  %v1532_v29 = vpop.f32.mrf.mxu1 }
 0x108   :  { %v1533_v30 = vadd.f32 %v1532_v29, %v1531_v26  ;;  %v1491_v31 = vpop.f32.mrf.mxu0 }
 0x109   :  { %v1534_v32 = vpop.f32.mrf.mxu1 }
 0x10a   :  { %v617_v0 = vpop.f32.mrf.mxu0 }
 0x10b   :  { %v2297_v33 = vadd.f32 %v1518_v58, %v617_v0  ;;  %v1535_v34 = vpop.f32.mrf.mxu1 }
 0x10c   :  { %v1536_v35 = vadd.f32 %v1535_v34, %v1534_v32  ;;  %v1689_v37 = vpop.f32.mrf.mxu0 }
 0x10d   :  { %v655_v36 = vmax.f32 %v2279_v38, %v2297_v33  ;;  %v1537_v39 = vpop.f32.mrf.mxu1 }
 0x10e   :  { %v620_v40 = vpop.f32.mrf.mxu0 }
 0x10f   :  { %v2301_v41 = vadd.f32 %v1521_v3, %v620_v40  ;;  %v1538_v43 = vpop.f32.mrf.mxu1 }
 0x110   :  { %v1539_v42 = vadd.f32 %v1538_v43, %v1537_v39  ;;  %v1690_v45 = vpop.f32.mrf.mxu0 }
 0x111   :  { %v656_v46 = vmax.f32 %v2281_v44, %v2301_v41  ;;  %v1540_v47 = vpop.f32.mrf.mxu1 }
 0x112   :  { %v625_v48 = vpop.f32.mrf.mxu0 }
 0x113   :  { %v2305_v49 = vadd.f32 %v1524_v10, %v625_v48  ;;  %v1541_v51 = vpop.f32.mrf.mxu1 }
 0x114   :  { %v1542_v52 = vadd.f32 %v1541_v51, %v1540_v47  ;;  %v1693_v53 = vpop.f32.mrf.mxu0 }
 0x115   :  { %v657_v38 = vmax.f32 %v2283_v50, %v2305_v49  ;;  %v1543_v54 = vpop.f32.mrf.mxu1 }
 0x116   :  { %v628_v55 = vpop.f32.mrf.mxu0 }
 0x117   :  { %v2309_v57 = vadd.f32 %v1527_v16, %v628_v55  ;;  %v1544_v58 = vpop.f32.mrf.mxu1 }
 0x118   :  { %v1694_v59 = vpop.f32.mrf.mxu0 }
 0x119   :  { %v658_v60 = vmax.f32 %v2285_v56, %v2309_v57  ;;  %v1569_v61 = vpop.f32.mrf.mxu1 }
 0x11a   :  { %v633_v62 = vpop.f32.mrf.mxu0 }
 0x11b   :  { %v634_v1 = vadd.f32 %v1530_v23, %v633_v62  ;;  %v1570_v3 = vpop.f32.mrf.mxu1 }
 0x11c   :  { %v1697_v4 = vpop.f32.mrf.mxu0  ;;  %v1571_v33 = vadd.f32 %v1570_v3, %v1569_v61 }
 0x11d   :  { %v659_v6 = vmax.f32 %v2287_v63, %v634_v1  ;;  %v2314_v7 = vpop.f32.mrf.mxu1 }
 0x11e   :  { %v636_v8 = vpop.f32.mrf.mxu0 }
 0x11f   :  { %v2316_v50 = vadd.f32 %v1533_v30, %v636_v8  ;;  %v2318_v2 = vpop.f32.mrf.mxu1 }
 0x120   :  { %v1698_v10 = vpop.f32.mrf.mxu0 }
 0x121   :  { %v660_v11 = vmax.f32 %v2289_v9, %v2316_v50  ;;  %v1575_v5 = vpop.f32.mrf.mxu1 }
 0x122   :  { %v641_v12 = vpop.f32.mrf.mxu0 }
 0x123   :  { %v642_v13 = vadd.f32 %v1536_v35, %v641_v12  ;;  %v1576_v15 = vpop.f32.mrf.mxu1 }
 0x124   :  { %v1701_v16 = vpop.f32.mrf.mxu0  ;;  %v1577_v49 = vadd.f32 %v1576_v15, %v1575_v5 }
 0x125   :  { %v661_v17 = vmax.f32 %v2291_v14, %v642_v13  ;;  %v2323_v18 = vpop.f32.mrf.mxu1 }
 0x126   :  { %v644_v63 = vpop.f32.mrf.mxu0 }
 0x127   :  { %v2325_v19 = vadd.f32 %v1539_v42, %v644_v63  ;;  %v2327_v20 = vpop.f32.mrf.mxu1 }
 0x128   :  { %v1702_v22 = vpop.f32.mrf.mxu0 }
 0x129   :  { %v662_v23 = vmax.f32 %v2293_v21, %v2325_v19  ;;  %v1581_v24 = vpop.f32.mrf.mxu1 }
 0x12a   :  { %v649_v25 = vpop.f32.mrf.mxu0 }
 0x12b   :  { %v2331_v26 = vadd.f32 %v1542_v52, %v649_v25  ;;  %v1582_v27 = vpop.f32.mrf.mxu1 }
 0x12c   :  { %v1705_v29 = vpop.f32.mrf.mxu0  ;;  %v1583_v1 = vadd.f32 %v1582_v27, %v1581_v24 }
 0x12d   :  { %v663_v14 = vmax.f32 %v2295_v28, %v2331_v26  ;;  %v2335_v30 = vpop.f32.mrf.mxu1 }
 0x12e   :  { %v652_v31 = vpop.f32.mrf.mxu0 }
 0x12f   :  { %v2337_v32 = vpop.f32.mrf.mxu1 }
 0x130   :  { %v1706_v0 = vpop.f32.mrf.mxu0 }
 0x131   :  { %v1587_v34 = vpop.f32.mrf.mxu1 }
 0x132   :  { %v874_v35 = vpop.f32.mrf.mxu0 }
 0x133   :  { %v875_v37 = vadd.f32 %v1571_v33, %v874_v35  ;;  %v1588_v39 = vpop.f32.mrf.mxu1 }
 0x134   :  { %v1713_v40 = vpop.f32.mrf.mxu0  ;;  %v1589_v22 = vadd.f32 %v1588_v39, %v1587_v34 }
 0x135   :  { %v2339_v43 = vmax.f32 %v655_v36, %v875_v37  ;;  %v2341_v42 = vpop.f32.mrf.mxu1 }
 0x136   :  { %v877_v45 = vpop.f32.mrf.mxu0 }
 0x137   :  { %v2343_v47 = vpop.f32.mrf.mxu1 }
 0x138   :  { %v1714_v48 = vpop.f32.mrf.mxu0 }
 0x139   :  { %v2345_v51 = vpop.f32.mrf.mxu1 }
 0x13a   :  { %v882_v52 = vpop.f32.mrf.mxu0 }
 0x13b   :  { %v883_v53 = vadd.f32 %v1577_v49, %v882_v52  ;;  %v2347_v54 = vpop.f32.mrf.mxu1 }
 0x13c   :  { %v1717_v55 = vpop.f32.mrf.mxu0  ;;  %v1595_v44 = vadd.f32 %v2347_v54, %v2345_v51  ;;  %v1586_v51 = vadd.f32 %v2337_v32, %v2335_v30 }
 0x13d   :  { %v2349_v58 = vmax.f32 %v657_v38, %v883_v53  ;;  %v1596_v59 = vpop.f32.mrf.mxu1  ;;  %v1574_v55 = vadd.f32 %v2318_v2, %v2314_v7 }
 0x13e   :  { %v885_v61 = vpop.f32.mrf.mxu0 }
 0x13f   :  { %v1597_v36 = vpop.f32.mrf.mxu1 }
 0x140   :  { %v1718_v62 = vpop.f32.mrf.mxu0 }
 0x141   :  { %v1622_v3 = vpop.f32.mrf.mxu1  ;;  %v878_v62 = vadd.f32 %v1574_v55, %v877_v45 }
 0x142   :  { %v890_v4 = vpop.f32.mrf.mxu0 }
 0x143   :  { %v891_v8 = vadd.f32 %v1583_v1, %v890_v4  ;;  %v1623_v10 = vpop.f32.mrf.mxu1  ;;  %v913_v2 = vmax.f32 %v656_v46, %v878_v62 }
 0x144   :  { %v1721_v12 = vpop.f32.mrf.mxu0  ;;  %v1624_v59 = vadd.f32 %v1623_v10, %v1622_v3 }
 0x145   :  { %v2351_v5 = vmax.f32 %v659_v6, %v891_v8  ;;  %v1625_v13 = vpop.f32.mrf.mxu1 }
 0x146   :  { %v2353_v15 = vpop.f32.mrf.mxu0 }
 0x147   :  { %v1626_v16 = vpop.f32.mrf.mxu1 }
 0x148   :  { %v1722_v63 = vpop.f32.mrf.mxu0  ;;  %v1627_v12 = vadd.f32 %v1626_v16, %v1625_v13  ;;  %v1580_v13 = vadd.f32 %v2327_v20, %v2323_v18 }
 0x149   :  { %v1628_v38 = vpop.f32.mrf.mxu1 }
 0x14a   :  { %v898_v25 = vpop.f32.mrf.mxu0 }
 0x14b   :  { %v899_v29 = vadd.f32 %v1589_v22, %v898_v25  ;;  %v1629_v31 = vpop.f32.mrf.mxu1  ;;  %v2373_v25 = vld [vmem:[%s2436_s2] ss:$0 sm:$0xff] }
 0x14c   :  { %v1725_v0 = vpop.f32.mrf.mxu0 }
 0x14d   :  { %v2355_v33 = vmax.f32 %v661_v17, %v899_v29  ;;  %v1631_v24 = vpop.f32.mrf.mxu1 }
 0x14e   :  { %v2357_v27 = vpop.f32.mrf.mxu0 }
 0x14f   :  { %v1632_v35 = vpop.f32.mrf.mxu1 }
 0x150   :  { %v1726_v37 = vpop.f32.mrf.mxu0  ;;  %v1633_v46 = vadd.f32 %v1632_v35, %v1631_v24 }
 0x151   :  { %v1634_v6 = vpop.f32.mrf.mxu1 }
 0x152   :  { %v906_v40 = vpop.f32.mrf.mxu0 }
 0x153   :  { %v1635_v48 = vpop.f32.mrf.mxu1 }
 0x154   :  { %v1729_v49 = vpop.f32.mrf.mxu0  ;;  %v1636_v54 = vadd.f32 %v1635_v48, %v1634_v6 }
 0x155   :  { %v2359_v52 = vpop.f32.mrf.mxu1  ;;  %v886_v49 = vadd.f32 %v1580_v13, %v885_v61 }
 0x156   :  { %v909_v53 = vpop.f32.mrf.mxu0 }
 0x157   :  { %v1638_v34 = vpop.f32.mrf.mxu1  ;;  %v915_v61 = vmax.f32 %v658_v60, %v886_v49 }
 0x158   :  { %v1730_v39 = vpop.f32.mrf.mxu0 }
 0x159   :  { %v2363_v17 = vpop.f32.mrf.mxu1 }
 0x15a   :  { %v1131_v36 = vpop.f32.mrf.mxu0 }
 0x15b   :  { %v1132_v1 = vadd.f32 %v1624_v59, %v1131_v36  ;;  %v2365_v4 = vpop.f32.mrf.mxu1 }
 0x15c   :  { %v1737_v8 = vpop.f32.mrf.mxu0 }
 0x15d   :  { %v1169_v63 = vmax.f32 %v2339_v43, %v1132_v1  ;;  %v2368_v22 = vpop.f32.mrf.mxu1  ;;  %v1630_v43 = vadd.f32 %v1629_v31, %v1628_v38  ;;  %v907_v38 = vadd.f32 %v1595_v44, %v906_v40  ;;  %v894_v40 = vadd.f32 %v1586_v51, %v2353_v15 }
 0x15e   :  { %v1134_v7 = vpop.f32.mrf.mxu0 }
 0x15f   :  { %v1135_v45 = vadd.f32 %v1627_v12, %v1134_v7  ;;  %v2378_v3 = vpop.f32.mrf.mxu1  ;;  %v1185_v16 = vadd.f32 %v2373_v25, %v1169_v63  ;;  %v920_v56 = vmax.f32 %v663_v14, %v907_v38  ;;  %v917_v14 = vmax.f32 %v660_v11, %v894_v40 }
 0x160   :  { %v1738_v10 = vpop.f32.mrf.mxu0 }
 0x161   :  { %v1170_v29 = vmax.f32 %v913_v2, %v1135_v45  ;;  %v1646_v0 = vpop.f32.mrf.mxu1  ;;  %v1194_v59 = vmax.f32 %v1185_v16, 0.0  ;;  %v1639_v2 = vadd.f32 %v1638_v34, %v2359_v52  ;;  %v1592_v52 = vadd.f32 %v2343_v47, %v2341_v42 }
 0x162   :  { %v1139_v37 = vpop.f32.mrf.mxu0  ;;  %v1642_v34 = vadd.f32 %v2365_v4, %v2363_v17  ;;  %v1645_v47 = vadd.f32 %v2378_v3, %v2368_v22 }
 0x163   :  { %v1186_v53 = vadd.f32 %v2373_v25, %v1170_v29  ;;  %v1140_v39 = vadd.f32 %v1630_v43, %v1139_v37  ;;  %v1647_v55 = vpop.f32.mrf.mxu1  ;;  %v902_v11 = vadd.f32 %v1592_v52, %v2357_v27 }
 0x164   :  { %v1741_v41 = vpop.f32.mrf.mxu0  ;;  %v1648_v31 = vadd.f32 %v1647_v55, %v1646_v0 }
 0x165   :  { %v1195_v36 = vmax.f32 %v1186_v53, 0.0  ;;  %v1171_v18 = vmax.f32 %v2349_v58, %v1140_v39  ;;  %v1649_v20 = vpop.f32.mrf.mxu1  ;;  %v919_v27 = vmax.f32 %v662_v23, %v902_v11 }
 0x166   :  { %v1142_v62 = vpop.f32.mrf.mxu0 }
 0x167   :  { %v1427_v1 = vpack.c.bf16 %v1195_v36, %v1194_v59  ;;  %v1143_v8 = vadd.f32 %v1633_v46, %v1142_v62  ;;  %v1650_v12 = vpop.f32.mrf.mxu1  ;;  %v1187_v58 = vadd.f32 %v2373_v25, %v1171_v18 }
 0x168   :  { %v1742_v63 = vpop.f32.mrf.mxu0 }
 0x169   :  { %1428 = vst [vmem:[%s2437_s3] sm:$0xff] %v1427_v1   ;;  %v1172_v24 = vmax.f32 %v915_v61, %v1143_v8  ;;  %v1163_v35 = vpop.f32.mrf.mxu1  ;;  %v1196_v45 = vmax.f32 %v1187_v58, 0.0 }
 0x16a   :  { %v1164_v57 = vadd.f32 %v1648_v31, %v1163_v35  ;;  %v1147_v60 = vpop.f32.mrf.mxu0 }
 0x16b   :  { %v1188_v7 = vadd.f32 %v2373_v25, %v1172_v24  ;;  %v1148_v30 = vadd.f32 %v1636_v54, %v1147_v60  ;;  %v1753_v32 = vpop.f32.mrf.mxu1 }
 0x16c   :  { %v1177_v6 = vmax.f32 %v920_v56, %v1164_v57  ;;  %v1745_v48 = vpop.f32.mrf.mxu0 }
 0x16d   :  { %v1197_v10 = vmax.f32 %v1188_v7, 0.0  ;;  %v1173_v13 = vmax.f32 %v2351_v5, %v1148_v30  ;;  %v1166_v43 = vpop.f32.mrf.mxu1 }
 0x16e   :  { %v1193_v28 = vadd.f32 %v2373_v25, %v1177_v6  ;;  %v1150_v26 = vpop.f32.mrf.mxu0 }
 0x16f   :  { %v1432_v15 = vpack.c.bf16 %v1197_v10, %v1196_v45  ;;  %v1151_v16 = vadd.f32 %v1639_v2, %v1150_v26  ;;  %v1754_v29 = vpop.f32.mrf.mxu1  ;;  %v1189_v5 = vadd.f32 %v2373_v25, %v1173_v13 }
 0x170   :  { %v1202_v0 = vmax.f32 %v1193_v28, 0.0  ;;  %v1746_v37 = vpop.f32.mrf.mxu0 }
 0x171   :  { %1444 = vst [vmem:[%s2437_s3 + $0x8] sm:$0xff] %v1432_v15   ;;  %v1174_v49 = vmax.f32 %v917_v14, %v1151_v16  ;;  %v1198_v17 = vmax.f32 %v1189_v5, 0.0 }
 0x172   :  { %v1423_v9 = vpack.c.bf16 %v1202_v0, %v1202_v0  ;;  %v1155_v50 = vpop.f32.mrf.mxu0 }
 0x173   :  { %v1190_v53 = vadd.f32 %v2373_v25, %v1174_v49  ;;  %v1156_v39 = vadd.f32 %v1642_v34, %v1155_v50 }
 0x174   :  { %1248 = vst [vmem:[%s2437_s3 + $0x20] sm:$0xf] %v1423_v9  ;;  %v1749_v42 = vpop.f32.mrf.mxu0 }
 0x175   :  { %v1199_v4 = vmax.f32 %v1190_v53, 0.0  ;;  %v1175_v55 = vmax.f32 %v2355_v33, %v1156_v39 }
 0x176   :  { %v1158_v44 = vpop.f32.mrf.mxu0 }
 0x177   :  { %v1437_v41 = vpack.c.bf16 %v1199_v4, %v1198_v17  ;;  %v1159_v46 = vadd.f32 %v1645_v47, %v1158_v44  ;;  %v1191_v36 = vadd.f32 %v2373_v25, %v1175_v55 }
 0x178   :  { %v1750_v59 = vpop.f32.mrf.mxu0 }
 0x179   :  { %1445 = vst [vmem:[%s2437_s3 + $0x10] sm:$0xff] %v1437_v41   ;;  %v1176_v18 = vmax.f32 %v919_v27, %v1159_v46  ;;  %v1200_v3 = vmax.f32 %v1191_v36, 0.0 }
 0x17b   :  { %v1192_v22 = vadd.f32 %v2373_v25, %v1176_v18 }
 0x17d   :  { %v1201_v20 = vmax.f32 %v1192_v22, 0.0 }
 0x17f   :  { %v1442_v33 = vpack.c.bf16 %v1201_v20, %v1200_v3 }
 0x181   :  { %1446 = vst [vmem:[%s2437_s3 + $0x18] sm:$0xff] %v1442_v33  }

// kernel: _lambda_.6
= control target key start
LH: loop header
LB: loop body
LE: loop exit
PB: predicated region body
PF: predicated region fallthrough
CT: control target
= control target key end

     0   :  { %v1269_v39 = vmov 0.0   ;;  %vm1270_vm0 = vmmov 0   ;;  %vm323_vm1 = vcmask 523264   ;;  %s1685_s1 = inlined_call_operand.vmem [shape: bf16[576,128], index: 1, kind: input, shape index: {}]   ;;  %s1686_s0 = inlined_call_operand.vmem [shape: bf16[4,8,576], index: 0, kind: input, shape index: {}]   ;;  %s1687_s2 = inlined_call_operand.vmem [shape: f32[1,128], index: 2, kind: input, shape index: {}]   ;;  %s1688_s3 = inlined_call_operand.vmem [shape: bf16[8,128], index: 3, kind: output, shape index: {}]  }
   0x1   :  { %v1294_v0 = vld [vmem:[%s1685_s1 + $0x78] sm:$0xff]   ;;  %v1317_v4 = vld [vmem:[%s1685_s1 + $0x70] sm:$0xff]   ;;  %v1341_v8 = vld [vmem:[%s1685_s1 + $0x68] sm:$0xff]  }
   0x2   :  { %v1299_v1 = vld [vmem:[%s1685_s1 + $0xf8] sm:$0xff]   ;;  %967 = vmatprep.subr.bf16.mxu0 %v1294_v0  ;;  %v1323_v5 = vld [vmem:[%s1685_s1 + $0xf0] sm:$0xff]   ;;  %v1347_v9 = vld [vmem:[%s1685_s1 + $0xe8] sm:$0xff]  }
   0x3   :  { %v1305_v2 = vld [vmem:[%s1685_s1 + $0x38] sm:$0xff]   ;;  %989 = vmatprep.subr.bf16.mxu1 %v1299_v1  ;;  %v1329_v6 = vld [vmem:[%s1685_s1 + $0x30] sm:$0xff]   ;;  %v1353_v10 = vld [vmem:[%s1685_s1 + $0x28] sm:$0xff]  }
   0x4   :  { %v1311_v3 = vld [vmem:[%s1685_s1 + $0xb8] sm:$0xff]   ;;  %968 = vmatpush3.bf16.msra.mxu0 %v1305_v2  ;;  %v1335_v7 = vld [vmem:[%s1685_s1 + $0xb0] sm:$0xff]   ;;  %v1359_v11 = vld [vmem:[%s1685_s1 + $0xa8] sm:$0xff]  }
   0x5   :  { %990 = vmatpush3.bf16.msra.mxu1 %v1311_v3  ;;  %969 = vmatprep.subr.bf16.mxu0 %v1317_v4  ;;  %v1365_v12 = vld [vmem:[%s1685_s1 + $0x60] sm:$0xff]   ;;  %v1389_v16 = vld [vmem:[%s1685_s1 + $0x58] sm:$0xff]   ;;  %v1413_v20 = vld [vmem:[%s1685_s1 + $0x50] sm:$0xff]  }
   0x6   :  { %991 = vmatprep.subr.bf16.mxu1 %v1323_v5  ;;  %v1371_v13 = vld [vmem:[%s1685_s1 + $0xe0] sm:$0xff]   ;;  %v1395_v17 = vld [vmem:[%s1685_s1 + $0xd8] sm:$0xff]   ;;  %v1419_v21 = vld [vmem:[%s1685_s1 + $0xd0] sm:$0xff]  }
   0x7   :  { %v1377_v14 = vld [vmem:[%s1685_s1 + $0x20] sm:$0xff]   ;;  %v1401_v18 = vld [vmem:[%s1685_s1 + $0x18] sm:$0xff]   ;;  %v1425_v22 = vld [vmem:[%s1685_s1 + $0x10] sm:$0xff]  }
   0x8   :  { %970 = vmatpush3.bf16.msra.mxu0 %v1329_v6  ;;  %v1383_v15 = vld [vmem:[%s1685_s1 + $0xa0] sm:$0xff]   ;;  %v1407_v19 = vld [vmem:[%s1685_s1 + $0x98] sm:$0xff]   ;;  %v1431_v23 = vld [vmem:[%s1685_s1 + $0x90] sm:$0xff]  }
   0x9   :  { %992 = vmatpush3.bf16.msra.mxu1 %v1335_v7  ;;  %971 = vmatprep.subr.bf16.mxu0 %v1341_v8  ;;  %v1437_v24 = vld [vmem:[%s1685_s1 + $0x48] sm:$0xff]   ;;  %v1461_v28 = vld [vmem:[%s1685_s1 + $0x40] sm:$0xff]   ;;  %v1492_v38 = vld [vmem:[%s1685_s1 + $0x118] sm:$0xff]  }
   0xa   :  { %993 = vmatprep.subr.bf16.mxu1 %v1347_v9  ;;  %v1443_v25 = vld [vmem:[%s1685_s1 + $0xc8] sm:$0xff]   ;;  %v1467_v29 = vld [vmem:[%s1685_s1 + $0xc0] sm:$0xff]   ;;  %v1501_v40 = vld [vmem:[%s1685_s1 + $0x110] sm:$0xff]  }
   0xb   :  { %v1449_v26 = vld [vmem:[%s1685_s1 + $0x8] sm:$0xff]   ;;  %v1473_v30 = vld [vmem:[%s1685_s1] sm:$0xff]   ;;  %v939_v41 = vld [vmem:[%s1686_s0 + $0x14] sm:$0xff] }
   0xc   :  { %972 = vmatpush3.bf16.msra.mxu0 %v1353_v10  ;;  %v1455_v27 = vld [vmem:[%s1685_s1 + $0x88] sm:$0xff]   ;;  %v1479_v31 = vld [vmem:[%s1685_s1 + $0x80] sm:$0xff]   ;;  %v943_v42 = vcombine.high %v939_v41, %v939_v41  ;;  %v1253_v45 = vld [vmem:[%s1686_s0 + $0x10] ss:$0 sps:$4 sm:$0xff]   ;;  %v942_v48 = vcombine.low %v939_v41, %v939_v41 }
   0xd   :  { %994 = vmatpush3.bf16.msra.mxu1 %v1359_v11  ;;  %973 = vmatprep.subr.bf16.mxu0 %v1365_v12  ;;  %v87_v32 = vld [vmem:[%s1686_s0] sm:$0xff]  ;;  %v88_v33 = vld [vmem:[%s1686_s0 + $0x8] sm:$0xff]  ;;  %v949_v52 = vld [vmem:[%s1686_s0 + $0x30] sm:$0xff] }
   0xe   :  { %995 = vmatprep.subr.bf16.mxu1 %v1371_v13  ;;  %v897_v34 = vcombine.low %v87_v32, %v87_v32  ;;  %v898_v35 = vcombine.high %v87_v32, %v87_v32  ;;  %v899_v36 = vcombine.low %v88_v33, %v88_v33  ;;  %v900_v37 = vcombine.high %v88_v33, %v88_v33  ;;  %v1515_v43 = vld [vmem:[%s1685_s1 + $0x108] sm:$0xff]   ;;  %v1524_v44 = vld [vmem:[%s1685_s1 + $0x100] sm:$0xff]   ;;  %v1263_v59 = vld [vmem:[%s1686_s0 + $0x38] ss:$0 sps:$4 sm:$0xff]  }
   0xf   :  { %v940_v46 = vld [vmem:[%s1686_s0 + $0x1c] sm:$0xff]  ;;  %v1258_v50 = vld [vmem:[%s1686_s0 + $0x24] ss:$0 sps:$4 sm:$0xff]   ;;  %v948_v51 = vld [vmem:[%s1686_s0 + $0x28] sm:$0xff]  ;;  %v954_v54 = vcombine.high %v949_v52, %v949_v52  ;;  %v953_v56 = vcombine.low %v949_v52, %v949_v52 }
  0x10   :  { %974 = vmatpush3.bf16.msra.mxu0 %v1377_v14  ;;  %359 = vmatprep.mubr.bf16.mxu0 %v898_v35  ;;  %v945_v47 = vcombine.high %v940_v46, %v940_v46  ;;  %v944_v49 = vcombine.low %v940_v46, %v940_v46  ;;  %v952_v53 = vcombine.high %v948_v51, %v948_v51  ;;  %v957_v57 = vld [vmem:[%s1686_s0 + $0x3c] sm:$0xff]  ;;  %v958_v60 = vld [vmem:[%s1686_s0 + $0x44] sm:$0xff] }
  0x11   :  { %996 = vmatpush3.bf16.msra.mxu1 %v1383_v15  ;;  %975 = vmatprep.subr.bf16.mxu0 %v1389_v16  ;;  %v951_v55 = vcombine.low %v948_v51, %v948_v51  ;;  %v961_v58 = vcombine.high %v957_v57, %v957_v57  ;;  %v963_v61 = vcombine.high %v958_v60, %v958_v60 }
  0x12   :  { %997 = vmatprep.subr.bf16.mxu1 %v1395_v17  ;;  %399 = vmatprep.mubr.bf16.mxu1 %v900_v37  ;;  %v960_v62 = vcombine.low %v957_v57, %v957_v57  ;;  %v962_v63 = vcombine.low %v958_v60, %v958_v60 }
  0x14   :  { %976 = vmatpush3.bf16.msra.mxu0 %v1401_v18 }
  0x15   :  { %998 = vmatpush3.bf16.msra.mxu1 %v1407_v19  ;;  %977 = vmatprep.subr.bf16.mxu0 %v1413_v20 }
  0x16   :  { %999 = vmatprep.subr.bf16.mxu1 %v1419_v21 }
  0x18   :  { %978 = vmatpush3.bf16.msra.mxu0 %v1425_v22 }
  0x19   :  { %1000 = vmatpush3.bf16.msra.mxu1 %v1431_v23  ;;  %979 = vmatprep.subr.bf16.mxu0 %v1437_v24 }
  0x1a   :  { %1001 = vmatprep.subr.bf16.mxu1 %v1443_v25 }
  0x1c   :  { %980 = vmatpush3.bf16.msra.mxu0 %v1449_v26 }
  0x1d   :  { %1002 = vmatpush3.bf16.msra.mxu1 %v1455_v27  ;;  %981 = vmatprep.subr.bf16.mxu0 %v1461_v28 }
  0x1e   :  { %1003 = vmatprep.subr.bf16.mxu1 %v1467_v29 }
  0x20   :  { %982 = vmatpush3.bf16.msra.mxu0 %v1473_v30 }
  0x21   :  { %1004 = vmatpush3.bf16.msra.mxu1 %v1479_v31  ;;  %1163 = vmatprep.subr.bf16.mxu0 %v1269_v39 }
  0x22   :  { %1016 = vmatprep.subr.bf16.mxu1 %v1294_v0 }
  0x23   :  { %360 = vmatmul.mubr.bf16.vlgmr.msra.gmra.mxu0 %v897_v34 }
  0x24   :  { %400 = vmatmul.mubr.bf16.vlgmr.msra.gmra.mxu1 %v899_v36  ;;  %1164 = vmatpush3.bf16.msra.mxu0 %v1492_v38 }
  0x25   :  { %1017 = vmatpush3.bf16.msra.mxu1 %v1305_v2  ;;  %1165 = vmatprep.subr.bf16.mxu0 %v1269_v39 }
  0x26   :  { %1018 = vmatprep.subr.bf16.mxu1 %v1317_v4  ;;  %1171 = vmatprep.mubr.msk.bf16.mxu0 %vm1270_vm0, %v1269_v39 }
  0x27   :  { %503 = vmatprep.mubr.bf16.mxu1 %v943_v42 }
  0x28   :  { %1166 = vmatpush3.bf16.msra.mxu0 %v1501_v40 }
  0x29   :  { %1019 = vmatpush3.bf16.msra.mxu1 %v1329_v6  ;;  %1167 = vmatprep.subr.bf16.mxu0 %v1269_v39 }
  0x2a   :  { %1020 = vmatprep.subr.bf16.mxu1 %v1341_v8 }
  0x2c   :  { %1168 = vmatpush3.bf16.msra.mxu0 %v1515_v43 }
  0x2d   :  { %1021 = vmatpush3.bf16.msra.mxu1 %v1353_v10  ;;  %1169 = vmatprep.subr.bf16.mxu0 %v1269_v39 }
  0x2e   :  { %1022 = vmatprep.subr.bf16.mxu1 %v1365_v12 }
  0x30   :  { %1170 = vmatpush3.bf16.msra.mxu0 %v1524_v44 }
  0x31   :  { %1023 = vmatpush3.bf16.msra.mxu1 %v1377_v14  ;;  %1038 = vmatprep.subr.bf16.mxu0 %v1299_v1 }
  0x32   :  { %1024 = vmatprep.subr.bf16.mxu1 %v1389_v16 }
  0x33   :  { %1172 = vmatmul.mubr.msk.bf16.vlgmr.msra.gmra.mxu0 %vm323_vm1, %v1253_v45 }
  0x34   :  { %1039 = vmatpush3.bf16.msra.mxu0 %v1311_v3  ;;  %543 = vmatprep.mubr.bf16.mxu0 %v945_v47 }
  0x35   :  { %1025 = vmatpush3.bf16.msra.mxu1 %v1401_v18  ;;  %1040 = vmatprep.subr.bf16.mxu0 %v1323_v5 }
  0x36   :  { %1026 = vmatprep.subr.bf16.mxu1 %v1413_v20 }
  0x38   :  { %1041 = vmatpush3.bf16.msra.mxu0 %v1335_v7 }
  0x39   :  { %1027 = vmatpush3.bf16.msra.mxu1 %v1425_v22  ;;  %1042 = vmatprep.subr.bf16.mxu0 %v1347_v9 }
  0x3a   :  { %1028 = vmatprep.subr.bf16.mxu1 %v1437_v24 }
  0x3c   :  { %1043 = vmatpush3.bf16.msra.mxu0 %v1359_v11 }
  0x3d   :  { %1029 = vmatpush3.bf16.msra.mxu1 %v1449_v26  ;;  %1044 = vmatprep.subr.bf16.mxu0 %v1371_v13 }
  0x3e   :  { %1030 = vmatprep.subr.bf16.mxu1 %v1461_v28 }
  0x40   :  { %1045 = vmatpush3.bf16.msra.mxu0 %v1383_v15 }
  0x41   :  { %1031 = vmatpush3.bf16.msra.mxu1 %v1473_v30  ;;  %1046 = vmatprep.subr.bf16.mxu0 %v1395_v17 }
  0x42   :  { %1175 = vmatprep.subr.bf16.mxu1 %v1269_v39 }
  0x44   :  { %504 = vmatmul.mubr.bf16.vlgmr.msra.gmra.mxu1 %v942_v48  ;;  %1047 = vmatpush3.bf16.msra.mxu0 %v1407_v19 }
  0x45   :  { %1176 = vmatpush3.bf16.msra.mxu1 %v1492_v38  ;;  %1048 = vmatprep.subr.bf16.mxu0 %v1419_v21 }
  0x46   :  { %1177 = vmatprep.subr.bf16.mxu1 %v1269_v39  ;;  %1183 = vmatprep.mubr.msk.bf16.mxu1 %vm1270_vm0, %v1269_v39 }
  0x48   :  { %1049 = vmatpush3.bf16.msra.mxu0 %v1431_v23 }
  0x49   :  { %1178 = vmatpush3.bf16.msra.mxu1 %v1501_v40  ;;  %1050 = vmatprep.subr.bf16.mxu0 %v1443_v25 }
  0x4a   :  { %1179 = vmatprep.subr.bf16.mxu1 %v1269_v39 }
  0x4c   :  { %1051 = vmatpush3.bf16.msra.mxu0 %v1455_v27 }
  0x4d   :  { %1180 = vmatpush3.bf16.msra.mxu1 %v1515_v43  ;;  %1052 = vmatprep.subr.bf16.mxu0 %v1467_v29 }
  0x4e   :  { %1181 = vmatprep.subr.bf16.mxu1 %v1269_v39 }
  0x50   :  { %1053 = vmatpush3.bf16.msra.mxu0 %v1479_v31 }
  0x51   :  { %1182 = vmatpush3.bf16.msra.mxu1 %v1524_v44  ;;  %1065 = vmatprep.subr.bf16.mxu0 %v1294_v0 }
  0x52   :  { %1087 = vmatprep.subr.bf16.mxu1 %v1299_v1 }
  0x53   :  { %544 = vmatmul.mubr.bf16.vlgmr.msra.gmra.mxu0 %v944_v49 }
  0x54   :  { %1184 = vmatmul.mubr.msk.bf16.vlgmr.msra.gmra.mxu1 %vm323_vm1, %v1258_v50  ;;  %1066 = vmatpush3.bf16.msra.mxu0 %v1305_v2 }
  0x55   :  { %1088 = vmatpush3.bf16.msra.mxu1 %v1311_v3  ;;  %1067 = vmatprep.subr.bf16.mxu0 %v1317_v4 }
  0x56   :  { %1089 = vmatprep.subr.bf16.mxu1 %v1323_v5  ;;  %648 = vmatprep.mubr.bf16.mxu0 %v952_v53 }
  0x57   :  { %688 = vmatprep.mubr.bf16.mxu1 %v954_v54 }
  0x58   :  { %1068 = vmatpush3.bf16.msra.mxu0 %v1329_v6 }
  0x59   :  { %1090 = vmatpush3.bf16.msra.mxu1 %v1335_v7  ;;  %1069 = vmatprep.subr.bf16.mxu0 %v1341_v8 }
  0x5a   :  { %1091 = vmatprep.subr.bf16.mxu1 %v1347_v9 }
  0x5c   :  { %1070 = vmatpush3.bf16.msra.mxu0 %v1353_v10 }
  0x5d   :  { %1092 = vmatpush3.bf16.msra.mxu1 %v1359_v11  ;;  %1071 = vmatprep.subr.bf16.mxu0 %v1365_v12 }
  0x5e   :  { %1093 = vmatprep.subr.bf16.mxu1 %v1371_v13 }
  0x60   :  { %1072 = vmatpush3.bf16.msra.mxu0 %v1377_v14 }
  0x61   :  { %1094 = vmatpush3.bf16.msra.mxu1 %v1383_v15  ;;  %1073 = vmatprep.subr.bf16.mxu0 %v1389_v16 }
  0x62   :  { %1095 = vmatprep.subr.bf16.mxu1 %v1395_v17 }
  0x64   :  { %1074 = vmatpush3.bf16.msra.mxu0 %v1401_v18 }
  0x65   :  { %1096 = vmatpush3.bf16.msra.mxu1 %v1407_v19  ;;  %1075 = vmatprep.subr.bf16.mxu0 %v1413_v20 }
  0x66   :  { %1097 = vmatprep.subr.bf16.mxu1 %v1419_v21 }
  0x68   :  { %1076 = vmatpush3.bf16.msra.mxu0 %v1425_v22 }
  0x69   :  { %1098 = vmatpush3.bf16.msra.mxu1 %v1431_v23  ;;  %1077 = vmatprep.subr.bf16.mxu0 %v1437_v24 }
  0x6a   :  { %1099 = vmatprep.subr.bf16.mxu1 %v1443_v25 }
  0x6c   :  { %1078 = vmatpush3.bf16.msra.mxu0 %v1449_v26 }
  0x6d   :  { %1100 = vmatpush3.bf16.msra.mxu1 %v1455_v27  ;;  %1079 = vmatprep.subr.bf16.mxu0 %v1461_v28 }
  0x6e   :  { %1101 = vmatprep.subr.bf16.mxu1 %v1467_v29 }
  0x70   :  { %1080 = vmatpush3.bf16.msra.mxu0 %v1473_v30 }
  0x71   :  { %1102 = vmatpush3.bf16.msra.mxu1 %v1479_v31  ;;  %1187 = vmatprep.subr.bf16.mxu0 %v1269_v39 }
  0x72   :  { %1114 = vmatprep.subr.bf16.mxu1 %v1294_v0  ;;  %v1268_v0 = vld [vmem:[%s1686_s0 + $0x4c] ss:$0 sps:$4 sm:$0xff]  }
  0x73   :  { %649 = vmatmul.mubr.bf16.vlgmr.msra.gmra.mxu0 %v951_v55 }
  0x74   :  { %689 = vmatmul.mubr.bf16.vlgmr.msra.gmra.mxu1 %v953_v56  ;;  %1188 = vmatpush3.bf16.msra.mxu0 %v1492_v38 }
  0x75   :  { %1115 = vmatpush3.bf16.msra.mxu1 %v1305_v2  ;;  %1189 = vmatprep.subr.bf16.mxu0 %v1269_v39 }
  0x76   :  { %1116 = vmatprep.subr.bf16.mxu1 %v1317_v4  ;;  %1195 = vmatprep.mubr.msk.bf16.mxu0 %vm1270_vm0, %v1269_v39 }
  0x77   :  { %793 = vmatprep.mubr.bf16.mxu1 %v961_v58 }
  0x78   :  { %1190 = vmatpush3.bf16.msra.mxu0 %v1501_v40 }
  0x79   :  { %1117 = vmatpush3.bf16.msra.mxu1 %v1329_v6  ;;  %1191 = vmatprep.subr.bf16.mxu0 %v1269_v39 }
  0x7a   :  { %1118 = vmatprep.subr.bf16.mxu1 %v1341_v8 }
  0x7c   :  { %1192 = vmatpush3.bf16.msra.mxu0 %v1515_v43 }
  0x7d   :  { %1119 = vmatpush3.bf16.msra.mxu1 %v1353_v10  ;;  %1193 = vmatprep.subr.bf16.mxu0 %v1269_v39 }
  0x7e   :  { %1120 = vmatprep.subr.bf16.mxu1 %v1365_v12 }
  0x80   :  { %1194 = vmatpush3.bf16.msra.mxu0 %v1524_v44 }
  0x81   :  { %1121 = vmatpush3.bf16.msra.mxu1 %v1377_v14  ;;  %1136 = vmatprep.subr.bf16.mxu0 %v1299_v1 }
  0x82   :  { %1122 = vmatprep.subr.bf16.mxu1 %v1389_v16 }
  0x83   :  { %1196 = vmatmul.mubr.msk.bf16.vlgmr.msra.gmra.mxu0 %vm323_vm1, %v1263_v59 }
  0x84   :  { %1137 = vmatpush3.bf16.msra.mxu0 %v1311_v3  ;;  %833 = vmatprep.mubr.bf16.mxu0 %v963_v61 }
  0x85   :  { %1123 = vmatpush3.bf16.msra.mxu1 %v1401_v18  ;;  %1138 = vmatprep.subr.bf16.mxu0 %v1323_v5 }
  0x86   :  { %1124 = vmatprep.subr.bf16.mxu1 %v1413_v20 }
  0x88   :  { %1139 = vmatpush3.bf16.msra.mxu0 %v1335_v7 }
  0x89   :  { %1125 = vmatpush3.bf16.msra.mxu1 %v1425_v22  ;;  %1140 = vmatprep.subr.bf16.mxu0 %v1347_v9 }
  0x8a   :  { %1126 = vmatprep.subr.bf16.mxu1 %v1437_v24 }
  0x8c   :  { %1141 = vmatpush3.bf16.msra.mxu0 %v1359_v11 }
  0x8d   :  { %1127 = vmatpush3.bf16.msra.mxu1 %v1449_v26  ;;  %1142 = vmatprep.subr.bf16.mxu0 %v1371_v13 }
  0x8e   :  { %1128 = vmatprep.subr.bf16.mxu1 %v1461_v28 }
  0x90   :  { %1143 = vmatpush3.bf16.msra.mxu0 %v1383_v15 }
  0x91   :  { %1129 = vmatpush3.bf16.msra.mxu1 %v1473_v30  ;;  %1144 = vmatprep.subr.bf16.mxu0 %v1395_v17 }
  0x92   :  { %1199 = vmatprep.subr.bf16.mxu1 %v1269_v39 }
  0x94   :  { %794 = vmatmul.mubr.bf16.vlgmr.msra.gmra.mxu1 %v960_v62  ;;  %1145 = vmatpush3.bf16.msra.mxu0 %v1407_v19 }
  0x95   :  { %1200 = vmatpush3.bf16.msra.mxu1 %v1492_v38  ;;  %1146 = vmatprep.subr.bf16.mxu0 %v1419_v21 }
  0x96   :  { %1201 = vmatprep.subr.bf16.mxu1 %v1269_v39  ;;  %1207 = vmatprep.mubr.msk.bf16.mxu1 %vm1270_vm0, %v1269_v39 }
  0x98   :  { %1147 = vmatpush3.bf16.msra.mxu0 %v1431_v23 }
  0x99   :  { %1202 = vmatpush3.bf16.msra.mxu1 %v1501_v40  ;;  %1148 = vmatprep.subr.bf16.mxu0 %v1443_v25 }
  0x9a   :  { %1203 = vmatprep.subr.bf16.mxu1 %v1269_v39 }
  0x9c   :  { %1149 = vmatpush3.bf16.msra.mxu0 %v1455_v27 }
  0x9d   :  { %1204 = vmatpush3.bf16.msra.mxu1 %v1515_v43  ;;  %1150 = vmatprep.subr.bf16.mxu0 %v1467_v29 }
  0x9e   :  { %1205 = vmatprep.subr.bf16.mxu1 %v1269_v39 }
  0xa0   :  { %1151 = vmatpush3.bf16.msra.mxu0 %v1479_v31 }
  0xa1   :  { %1206 = vmatpush3.bf16.msra.mxu1 %v1524_v44 }
  0xa3   :  { %834 = vmatmul.mubr.bf16.vlgmr.msra.gmra.mxu0 %v962_v63 }
  0xa4   :  { %1208 = vmatmul.mubr.msk.bf16.vlgmr.msra.gmra.mxu1 %vm323_vm1, %v1268_v0 }
  0xe3   :  { %v983_v1 = vpop.f32.mrf.mxu0 }
  0xe4   :  { %v1005_v2 = vpop.f32.mrf.mxu1 }
  0xe5   :  { %v984_v3 = vpop.f32.mrf.mxu0 }
  0xe6   :  { %v1006_v4 = vpop.f32.mrf.mxu1  ;;  %v985_v5 = vadd.f32 %v984_v3, %v983_v1  ;;  %v966_v3 = vld [vmem:[%s1687_s2] ss:$0 sm:$0xff] }
  0xe7   :  { %v1007_v6 = vadd.f32 %v1006_v4, %v1005_v2  ;;  %v986_v7 = vpop.f32.mrf.mxu0 }
  0xe8   :  { %v1008_v8 = vpop.f32.mrf.mxu1 }
  0xe9   :  { %v402_v9 = vadd.f32 %v1007_v6, %v985_v5  ;;  %v987_v10 = vpop.f32.mrf.mxu0 }
  0xea   :  { %v1009_v11 = vpop.f32.mrf.mxu1 }
  0xf3   :  { %v441_v12 = vpop.f32.mrf.mxu0 }
  0xf4   :  { %v442_v13 = vadd.f32 %v441_v12, %v402_v9 }
  0xf5   :  { %v1173_v14 = vpop.f32.mrf.mxu0 }
  0xf7   :  { %v444_v15 = vpop.f32.mrf.mxu0 }
  0xf9   :  { %v1174_v16 = vpop.f32.mrf.mxu0 }
 0x104   :  { %v1032_v17 = vpop.f32.mrf.mxu1 }
 0x106   :  { %v1033_v18 = vpop.f32.mrf.mxu1 }
 0x107   :  { %v1034_v19 = vadd.f32 %v1033_v18, %v1032_v17 }
 0x108   :  { %v1035_v20 = vpop.f32.mrf.mxu1 }
 0x10a   :  { %v1036_v21 = vpop.f32.mrf.mxu1 }
 0x113   :  { %v1054_v22 = vpop.f32.mrf.mxu0 }
 0x114   :  { %v585_v23 = vpop.f32.mrf.mxu1 }
 0x115   :  { %v1055_v24 = vpop.f32.mrf.mxu0 }
 0x116   :  { %v1185_v25 = vpop.f32.mrf.mxu1  ;;  %v1056_v26 = vadd.f32 %v1055_v24, %v1054_v22 }
 0x117   :  { %v1057_v27 = vpop.f32.mrf.mxu0 }
 0x118   :  { %v588_v28 = vpop.f32.mrf.mxu1  ;;  %v546_v29 = vadd.f32 %v1056_v26, %v1034_v19 }
 0x119   :  { %v1058_v30 = vpop.f32.mrf.mxu0 }
 0x11a   :  { %v1186_v31 = vpop.f32.mrf.mxu1  ;;  %v586_v32 = vadd.f32 %v585_v23, %v546_v29 }
 0x11c   :  { %v591_v33 = vmax.f32 %v442_v13, %v586_v32 }
 0x133   :  { %v1081_v34 = vpop.f32.mrf.mxu0 }
 0x134   :  { %v1103_v35 = vpop.f32.mrf.mxu1 }
 0x135   :  { %v1082_v36 = vpop.f32.mrf.mxu0 }
 0x136   :  { %v1104_v37 = vpop.f32.mrf.mxu1  ;;  %v1083_v50 = vadd.f32 %v1082_v36, %v1081_v34 }
 0x137   :  { %v1084_v38 = vpop.f32.mrf.mxu0  ;;  %v1105_v51 = vadd.f32 %v1104_v37, %v1103_v35 }
 0x138   :  { %v1106_v39 = vpop.f32.mrf.mxu1 }
 0x139   :  { %v1085_v40 = vpop.f32.mrf.mxu0  ;;  %v691_v54 = vadd.f32 %v1105_v51, %v1083_v50 }
 0x13a   :  { %v1107_v41 = vpop.f32.mrf.mxu1 }
 0x143   :  { %v730_v42 = vpop.f32.mrf.mxu0 }
 0x144   :  { %v731_v57 = vadd.f32 %v730_v42, %v691_v54 }
 0x145   :  { %v1197_v43 = vpop.f32.mrf.mxu0 }
 0x146   :  { %v736_v1 = vmax.f32 %v591_v33, %v731_v57 }
 0x147   :  { %v733_v44 = vpop.f32.mrf.mxu0 }
 0x149   :  { %v1198_v45 = vpop.f32.mrf.mxu0 }
 0x154   :  { %v1130_v46 = vpop.f32.mrf.mxu1 }
 0x156   :  { %v1131_v47 = vpop.f32.mrf.mxu1 }
 0x157   :  { %v1132_v58 = vadd.f32 %v1131_v47, %v1130_v46 }
 0x158   :  { %v1133_v48 = vpop.f32.mrf.mxu1 }
 0x15a   :  { %v1134_v49 = vpop.f32.mrf.mxu1 }
 0x163   :  { %v1152_v52 = vpop.f32.mrf.mxu0 }
 0x164   :  { %v875_v53 = vpop.f32.mrf.mxu1 }
 0x165   :  { %v1153_v55 = vpop.f32.mrf.mxu0 }
 0x166   :  { %v1209_v56 = vpop.f32.mrf.mxu1  ;;  %v1154_v59 = vadd.f32 %v1153_v55, %v1152_v52 }
 0x167   :  { %v1155_v60 = vpop.f32.mrf.mxu0 }
 0x168   :  { %v878_v61 = vpop.f32.mrf.mxu1  ;;  %v836_v62 = vadd.f32 %v1154_v59, %v1132_v58 }
 0x169   :  { %v1156_v63 = vpop.f32.mrf.mxu0 }
 0x16a   :  { %v1210_v0 = vpop.f32.mrf.mxu1  ;;  %v876_v2 = vadd.f32 %v875_v53, %v836_v62 }
 0x16c   :  { %v881_v4 = vmax.f32 %v736_v1, %v876_v2 }
 0x16e   :  { %v889_v5 = vadd.f32 %v966_v3, %v881_v4 }
 0x170   :  { %v890_v6 = vmax.f32 %v889_v5, 0.0 }
 0x172   :  { %v891_v7 = vpack.c.bf16 %v890_v6, %v890_v6 }
 0x174   :  { %892 = vst [vmem:[%s1688_s3] sm:$0xf] %v891_v7 }

// kernel: _lambda_.7
= control target key start
LH: loop header
LB: loop body
LE: loop exit
PB: predicated region body
PF: predicated region fallthrough
CT: control target
= control target key end

     0   :  { %v1860_v39 = vmov 1983009808   ;;  %v37_v41 = vlaneseq  ;;  %s2421_s0 = inlined_call_operand.vmem [shape: bf16[2,512], index: 0, kind: input, shape index: {}]   ;;  %s2422_s1 = inlined_call_operand.vmem [shape: f32[2,512], index: 1, kind: input, shape index: {}]   ;;  %s2423_s2 = inlined_call_operand.vmem [shape: bf16[512,512], index: 2, kind: input, shape index: {}]   ;;  %s2424_s3 = inlined_call_operand.vmem [shape: f32[1,512], index: 3, kind: input, shape index: {}]   ;;  %s2425_s4 = inlined_call_operand.vmem [shape: f32[2,512], index: 4, kind: input, shape index: {}]   ;;  %s2426_s5 = inlined_call_operand.vmem [shape: bf16[512,10], index: 5, kind: input, shape index: {}]   ;;  %s2427_s6 = inlined_call_operand.vmem [shape: f32[1,10], index: 6, kind: input, shape index: {}]   ;;  %s2428_s7 = inlined_call_operand.hbm [shape: f32[2,10], index: 7, kind: output, shape index: {}]  }
   0x1   :  { %v1613_v0 = vld [vmem:[%s2423_s2 + $0xe4] ss:$16 sps:$4 sm:$0xff]   ;;  %v1617_v2 = vld [vmem:[%s2423_s2 + $0xe0] ss:$16 sps:$4 sm:$0xff]   ;;  %v35_v40 = vunpack.c.l.s4 %v1860_v39  ;;  %v1741_v39 = vld [vmem:[%s2423_s2 + $0x4c] ss:$16 sps:$4 sm:$0xff]  }
   0x2   :  { %v1615_v1 = vld [vmem:[%s2423_s2 + $0x2e4] ss:$16 sps:$4 sm:$0xff]   ;;  %848 = vmatprep.subr.bf16.mxu0 %v1613_v0  ;;  %v1618_v3 = vld [vmem:[%s2423_s2 + $0x2e0] ss:$16 sps:$4 sm:$0xff]   ;;  %v2034_v48 = vshrl.u32 %v37_v41, 7 }
   0x3   :  { %889 = vmatprep.subr.bf16.mxu1 %v1615_v1  ;;  %v1619_v4 = vld [vmem:[%s2423_s2 + $0xc4] ss:$16 sps:$4 sm:$0xff]   ;;  %849 = vmatpush1.bf16.msra.mxu0 %v1617_v2  ;;  %v1623_v6 = vld [vmem:[%s2423_s2 + $0xc0] ss:$16 sps:$4 sm:$0xff]   ;;  %v36_v47 = vunpack.c.0.s8 %v35_v40  ;;  %v1744_v40 = vld [vmem:[%s2423_s2 + $0x24c] ss:$16 sps:$4 sm:$0xff]  }
   0x4   :  { %890 = vmatpush1.bf16.msra.mxu1 %v1618_v3  ;;  %v1621_v5 = vld [vmem:[%s2423_s2 + $0x2c4] ss:$16 sps:$4 sm:$0xff]   ;;  %850 = vmatprep.subr.bf16.mxu0 %v1619_v4  ;;  %v1624_v7 = vld [vmem:[%s2423_s2 + $0x2c0] ss:$16 sps:$4 sm:$0xff]   ;;  %v1739_v41 = vld [vmem:[%s2423_s2 + $0x48] ss:$16 sps:$4 sm:$0xff]  }
   0x5   :  { %891 = vmatprep.subr.bf16.mxu1 %v1621_v5  ;;  %v1625_v8 = vld [vmem:[%s2423_s2 + $0xa4] ss:$16 sps:$4 sm:$0xff]   ;;  %v1629_v10 = vld [vmem:[%s2423_s2 + $0xa0] ss:$16 sps:$4 sm:$0xff]   ;;  %v2049_v54 = vsub.s32 %v36_v47, %v2034_v48  ;;  %v1753_v47 = vld [vmem:[%s2423_s2 + $0xc] ss:$16 sps:$4 sm:$0xff]  }
   0x6   :  { %v1627_v9 = vld [vmem:[%s2423_s2 + $0x2a4] ss:$16 sps:$4 sm:$0xff]   ;;  %v1630_v11 = vld [vmem:[%s2423_s2 + $0x2a0] ss:$16 sps:$4 sm:$0xff]  }
   0x7   :  { %851 = vmatpush1.bf16.msra.mxu0 %v1623_v6  ;;  %v1631_v12 = vld [vmem:[%s2423_s2 + $0x84] ss:$16 sps:$4 sm:$0xff]   ;;  %v1635_v14 = vld [vmem:[%s2423_s2 + $0x80] ss:$16 sps:$4 sm:$0xff]  }
   0x8   :  { %892 = vmatpush1.bf16.msra.mxu1 %v1624_v7  ;;  %852 = vmatprep.subr.bf16.mxu0 %v1625_v8  ;;  %v1633_v13 = vld [vmem:[%s2423_s2 + $0x284] ss:$16 sps:$4 sm:$0xff]   ;;  %v1636_v15 = vld [vmem:[%s2423_s2 + $0x280] ss:$16 sps:$4 sm:$0xff]  }
   0x9   :  { %893 = vmatprep.subr.bf16.mxu1 %v1627_v9  ;;  %v1637_v16 = vld [vmem:[%s2423_s2 + $0x64] ss:$16 sps:$4 sm:$0xff]   ;;  %v1641_v18 = vld [vmem:[%s2423_s2 + $0x60] ss:$16 sps:$4 sm:$0xff]  }
   0xa   :  { %v1639_v17 = vld [vmem:[%s2423_s2 + $0x264] ss:$16 sps:$4 sm:$0xff]   ;;  %v1642_v19 = vld [vmem:[%s2423_s2 + $0x260] ss:$16 sps:$4 sm:$0xff]  }
   0xb   :  { %853 = vmatpush1.bf16.msra.mxu0 %v1629_v10  ;;  %v1643_v20 = vld [vmem:[%s2423_s2 + $0x44] ss:$16 sps:$4 sm:$0xff]   ;;  %v1647_v22 = vld [vmem:[%s2423_s2 + $0x40] ss:$16 sps:$4 sm:$0xff]  }
   0xc   :  { %894 = vmatpush1.bf16.msra.mxu1 %v1630_v11  ;;  %854 = vmatprep.subr.bf16.mxu0 %v1631_v12  ;;  %v1645_v21 = vld [vmem:[%s2423_s2 + $0x244] ss:$16 sps:$4 sm:$0xff]   ;;  %v1648_v23 = vld [vmem:[%s2423_s2 + $0x240] ss:$16 sps:$4 sm:$0xff]  }
   0xd   :  { %895 = vmatprep.subr.bf16.mxu1 %v1633_v13  ;;  %v1649_v24 = vld [vmem:[%s2423_s2 + $0x24] ss:$16 sps:$4 sm:$0xff]   ;;  %v1653_v26 = vld [vmem:[%s2423_s2 + $0x20] ss:$16 sps:$4 sm:$0xff]  }
   0xe   :  { %v1651_v25 = vld [vmem:[%s2423_s2 + $0x224] ss:$16 sps:$4 sm:$0xff]   ;;  %v1654_v27 = vld [vmem:[%s2423_s2 + $0x220] ss:$16 sps:$4 sm:$0xff]  }
   0xf   :  { %855 = vmatpush1.bf16.msra.mxu0 %v1635_v14  ;;  %v1655_v28 = vld [vmem:[%s2423_s2 + $0x4] ss:$16 sps:$4 sm:$0xff]   ;;  %v1659_v30 = vld [vmem:[%s2423_s2] ss:$16 sps:$4 sm:$0xff]  }
  0x10   :  { %896 = vmatpush1.bf16.msra.mxu1 %v1636_v15  ;;  %856 = vmatprep.subr.bf16.mxu0 %v1637_v16  ;;  %v1657_v29 = vld [vmem:[%s2423_s2 + $0x204] ss:$16 sps:$4 sm:$0xff]   ;;  %v1660_v31 = vld [vmem:[%s2423_s2 + $0x200] ss:$16 sps:$4 sm:$0xff]  }
  0x11   :  { %897 = vmatprep.subr.bf16.mxu1 %v1639_v17  ;;  %v1661_v32 = vld [vmem:[%s2423_s2 + $0x1e4] ss:$16 sps:$4 sm:$0xff]   ;;  %v1665_v34 = vld [vmem:[%s2423_s2 + $0x1e0] ss:$16 sps:$4 sm:$0xff]   ;;  %v1711_v17 = vld [vmem:[%s2423_s2 + $0xec] ss:$16 sps:$4 sm:$0xff]  }
  0x12   :  { %v1663_v33 = vld [vmem:[%s2423_s2 + $0x3e4] ss:$16 sps:$4 sm:$0xff]   ;;  %v1666_v35 = vld [vmem:[%s2423_s2 + $0x3e0] ss:$16 sps:$4 sm:$0xff]  }
  0x13   :  { %857 = vmatpush1.bf16.msra.mxu0 %v1641_v18  ;;  %v1667_v36 = vld [vmem:[%s2423_s2 + $0x1c4] ss:$16 sps:$4 sm:$0xff]   ;;  %v1671_v38 = vld [vmem:[%s2423_s2 + $0x1c0] ss:$16 sps:$4 sm:$0xff]   ;;  %v1714_v18 = vld [vmem:[%s2423_s2 + $0x2ec] ss:$16 sps:$4 sm:$0xff]  }
  0x14   :  { %898 = vmatpush1.bf16.msra.mxu1 %v1642_v19  ;;  %858 = vmatprep.subr.bf16.mxu0 %v1643_v20  ;;  %v1669_v37 = vld [vmem:[%s2423_s2 + $0x3c4] ss:$16 sps:$4 sm:$0xff]   ;;  %v1672_v42 = vld [vmem:[%s2423_s2 + $0x3c0] ss:$16 sps:$4 sm:$0xff]  }
  0x15   :  { %899 = vmatprep.subr.bf16.mxu1 %v1645_v21  ;;  %v1673_v43 = vld [vmem:[%s2423_s2 + $0x1a4] ss:$16 sps:$4 sm:$0xff]   ;;  %v1677_v45 = vld [vmem:[%s2423_s2 + $0x1a0] ss:$16 sps:$4 sm:$0xff]   ;;  %v1709_v21 = vld [vmem:[%s2423_s2 + $0xe8] ss:$16 sps:$4 sm:$0xff]  }
  0x16   :  { %v1675_v44 = vld [vmem:[%s2423_s2 + $0x3a4] ss:$16 sps:$4 sm:$0xff]   ;;  %v1678_v46 = vld [vmem:[%s2423_s2 + $0x3a0] ss:$16 sps:$4 sm:$0xff]  }
  0x17   :  { %859 = vmatpush1.bf16.msra.mxu0 %v1647_v22  ;;  %v1679_v49 = vld [vmem:[%s2423_s2 + $0x184] ss:$16 sps:$4 sm:$0xff]   ;;  %v28_v51 = vld [vmem:[%s2421_s0] sm:$0xf]  ;;  %v1712_v22 = vld [vmem:[%s2423_s2 + $0x2e8] ss:$16 sps:$4 sm:$0xff]  }
  0x18   :  { %900 = vmatpush1.bf16.msra.mxu1 %v1648_v23  ;;  %860 = vmatprep.subr.bf16.mxu0 %v1649_v24  ;;  %v1681_v50 = vld [vmem:[%s2423_s2 + $0x384] ss:$16 sps:$4 sm:$0xff]   ;;  %v30_v53 = vunpack.c.l.bf16 %v28_v51  ;;  %v1683_v55 = vld [vmem:[%s2423_s2 + $0x180] ss:$16 sps:$4 sm:$0xff]   ;;  %v1717_v23 = vld [vmem:[%s2423_s2 + $0xcc] ss:$16 sps:$4 sm:$0xff]  }
  0x19   :  { %901 = vmatprep.subr.bf16.mxu1 %v1651_v25  ;;  %v29_v52 = vld [vmem:[%s2422_s1] sm:$0xff]  ;;  %v1720_v24 = vld [vmem:[%s2423_s2 + $0x2cc] ss:$16 sps:$4 sm:$0xff]   ;;  %v1715_v25 = vld [vmem:[%s2423_s2 + $0xc8] ss:$16 sps:$4 sm:$0xff]  }
  0x1a   :  { %v1684_v56 = vld [vmem:[%s2423_s2 + $0x380] ss:$16 sps:$4 sm:$0xff]   ;;  %v1685_v57 = vld [vmem:[%s2423_s2 + $0x164] ss:$16 sps:$4 sm:$0xff]   ;;  %v31_v59 = vmul.f32 %v30_v53, %v29_v52  ;;  %v1754_v51 = vld [vmem:[%s2423_s2 + $0x208] ss:$16 sps:$4 sm:$0xff]  }
  0x1b   :  { %861 = vmatpush1.bf16.msra.mxu0 %v1653_v26  ;;  %v1687_v58 = vld [vmem:[%s2423_s2 + $0x364] ss:$16 sps:$4 sm:$0xff]   ;;  %v1689_v62 = vld [vmem:[%s2423_s2 + $0x160] ss:$16 sps:$4 sm:$0xff]   ;;  %v1718_v26 = vld [vmem:[%s2423_s2 + $0x2c8] ss:$16 sps:$4 sm:$0xff]  }
  0x1c   :  { %902 = vmatpush1.bf16.msra.mxu1 %v1654_v27  ;;  %862 = vmatprep.subr.bf16.mxu0 %v1655_v28  ;;  %v40_v60 = vrot.slane %v31_v59, %v2049_v54  ;;  %v33_v61 = vcombine.high %v31_v59, %v31_v59  ;;  %v1690_v63 = vld [vmem:[%s2423_s2 + $0x360] ss:$16 sps:$4 sm:$0xff]   ;;  %v1691_v0 = vld [vmem:[%s2423_s2 + $0x144] ss:$16 sps:$4 sm:$0xff]   ;;  %v1723_v27 = vld [vmem:[%s2423_s2 + $0xac] ss:$16 sps:$4 sm:$0xff]  }
  0x1d   :  { %903 = vmatprep.subr.bf16.mxu1 %v1657_v29  ;;  %v1693_v1 = vld [vmem:[%s2423_s2 + $0x344] ss:$16 sps:$4 sm:$0xff]   ;;  %v1695_v6 = vld [vmem:[%s2423_s2 + $0x140] ss:$16 sps:$4 sm:$0xff]   ;;  %v1726_v28 = vld [vmem:[%s2423_s2 + $0x2ac] ss:$16 sps:$4 sm:$0xff]  }
  0x1e   :  { %v48_v2 = vcombine.high %v40_v60, %v40_v60  ;;  %v47_v3 = vrot.slane %v33_v61, %v2049_v54  ;;  %v1696_v7 = vld [vmem:[%s2423_s2 + $0x340] ss:$16 sps:$4 sm:$0xff]   ;;  %v1697_v8 = vld [vmem:[%s2423_s2 + $0x124] ss:$16 sps:$4 sm:$0xff]   ;;  %v2113_v19 = vpack.c.bf16 %v40_v60, %v40_v60  ;;  %v1721_v29 = vld [vmem:[%s2423_s2 + $0xa8] ss:$16 sps:$4 sm:$0xff]  }
  0x1f   :  { %863 = vmatpush1.bf16.msra.mxu0 %v1659_v30  ;;  %v1699_v9 = vld [vmem:[%s2423_s2 + $0x324] ss:$16 sps:$4 sm:$0xff]   ;;  %v1701_v11 = vld [vmem:[%s2423_s2 + $0x120] ss:$16 sps:$4 sm:$0xff]   ;;  %v1724_v30 = vld [vmem:[%s2423_s2 + $0x2a8] ss:$16 sps:$4 sm:$0xff]  }
  0x20   :  { %904 = vmatpush1.bf16.msra.mxu1 %v1660_v31  ;;  %864 = vmatprep.subr.bf16.mxu0 %v1661_v32  ;;  %v55_v4 = vpack.c.bf16 %v48_v2, %v48_v2  ;;  %v49_v5 = vcombine.high %v47_v3, %v47_v3  ;;  %v1702_v12 = vld [vmem:[%s2423_s2 + $0x320] ss:$16 sps:$4 sm:$0xff]   ;;  %v1703_v13 = vld [vmem:[%s2423_s2 + $0x104] ss:$16 sps:$4 sm:$0xff]   ;;  %v2115_v20 = vpack.c.bf16 %v47_v3, %v47_v3  ;;  %v1729_v31 = vld [vmem:[%s2423_s2 + $0x8c] ss:$16 sps:$4 sm:$0xff]  }
  0x21   :  { %905 = vmatprep.subr.bf16.mxu1 %v1663_v33  ;;  %v1705_v14 = vld [vmem:[%s2423_s2 + $0x304] ss:$16 sps:$4 sm:$0xff]   ;;  %v1707_v15 = vld [vmem:[%s2423_s2 + $0x100] ss:$16 sps:$4 sm:$0xff]   ;;  %v1732_v32 = vld [vmem:[%s2423_s2 + $0x28c] ss:$16 sps:$4 sm:$0xff]  }
  0x22   :  { %v57_v10 = vpack.c.bf16 %v49_v5, %v49_v5  ;;  %880 = vmatprep.mubr.bf16.mxu0 %v55_v4  ;;  %v1708_v16 = vld [vmem:[%s2423_s2 + $0x300] ss:$16 sps:$4 sm:$0xff]   ;;  %v1727_v33 = vld [vmem:[%s2423_s2 + $0x88] ss:$16 sps:$4 sm:$0xff]   ;;  %v1759_v52 = vld [vmem:[%s2423_s2 + $0x1ec] ss:$16 sps:$4 sm:$0xff]  }
  0x23   :  { %865 = vmatpush2.bf16.msra.mxu0 %v1665_v34  ;;  %v1730_v34 = vld [vmem:[%s2423_s2 + $0x288] ss:$16 sps:$4 sm:$0xff]   ;;  %v1762_v53 = vld [vmem:[%s2423_s2 + $0x3ec] ss:$16 sps:$4 sm:$0xff]  }
  0x24   :  { %906 = vmatpush2.bf16.msra.mxu1 %v1666_v35  ;;  %866 = vmatprep.subr.bf16.mxu0 %v1667_v36  ;;  %v1735_v35 = vld [vmem:[%s2423_s2 + $0x6c] ss:$16 sps:$4 sm:$0xff]   ;;  %v1763_v59 = vld [vmem:[%s2423_s2 + $0x1c8] ss:$16 sps:$4 sm:$0xff]  }
  0x25   :  { %907 = vmatprep.subr.bf16.mxu1 %v1669_v37  ;;  %921 = vmatprep.mubr.bf16.mxu1 %v57_v10  ;;  %v1738_v36 = vld [vmem:[%s2423_s2 + $0x26c] ss:$16 sps:$4 sm:$0xff]   ;;  %v1733_v37 = vld [vmem:[%s2423_s2 + $0x68] ss:$16 sps:$4 sm:$0xff]  }
  0x26   :  { %v1766_v60 = vld [vmem:[%s2423_s2 + $0x3c8] ss:$16 sps:$4 sm:$0xff]   ;;  %v1771_v61 = vld [vmem:[%s2423_s2 + $0x1ac] ss:$16 sps:$4 sm:$0xff]  }
  0x27   :  { %867 = vmatpush2.bf16.msra.mxu0 %v1671_v38  ;;  %v1736_v38 = vld [vmem:[%s2423_s2 + $0x268] ss:$16 sps:$4 sm:$0xff]   ;;  %v1780_v2 = vld [vmem:[%s2423_s2 + $0x38c] ss:$16 sps:$4 sm:$0xff]  }
  0x28   :  { %908 = vmatpush2.bf16.msra.mxu1 %v1672_v42  ;;  %868 = vmatprep.subr.bf16.mxu0 %v1673_v43  ;;  %v1742_v42 = vld [vmem:[%s2423_s2 + $0x248] ss:$16 sps:$4 sm:$0xff]   ;;  %v1747_v43 = vld [vmem:[%s2423_s2 + $0x2c] ss:$16 sps:$4 sm:$0xff]  }
  0x29   :  { %909 = vmatprep.subr.bf16.mxu1 %v1675_v44  ;;  %v1750_v44 = vld [vmem:[%s2423_s2 + $0x22c] ss:$16 sps:$4 sm:$0xff]   ;;  %v1775_v3 = vld [vmem:[%s2423_s2 + $0x188] ss:$16 sps:$4 sm:$0xff]  }
  0x2a   :  { %v1783_v5 = vld [vmem:[%s2423_s2 + $0x16c] ss:$16 sps:$4 sm:$0xff]  }
  0x2b   :  { %869 = vmatpush2.bf16.msra.mxu0 %v1677_v45  ;;  %v1745_v45 = vld [vmem:[%s2423_s2 + $0x28] ss:$16 sps:$4 sm:$0xff]  }
  0x2c   :  { %910 = vmatpush2.bf16.msra.mxu1 %v1678_v46  ;;  %870 = vmatprep.subr.bf16.mxu0 %v1679_v49  ;;  %v1748_v46 = vld [vmem:[%s2423_s2 + $0x228] ss:$16 sps:$4 sm:$0xff]   ;;  %v1756_v49 = vld [vmem:[%s2423_s2 + $0x20c] ss:$16 sps:$4 sm:$0xff]  }
  0x2d   :  { %911 = vmatprep.subr.bf16.mxu1 %v1681_v50  ;;  %v1751_v50 = vld [vmem:[%s2423_s2 + $0x8] ss:$16 sps:$4 sm:$0xff]  }
  0x2f   :  { %871 = vmatpush2.bf16.msra.mxu0 %v1683_v55  ;;  %v1757_v55 = vld [vmem:[%s2423_s2 + $0x1e8] ss:$16 sps:$4 sm:$0xff]  }
  0x30   :  { %912 = vmatpush2.bf16.msra.mxu1 %v1684_v56  ;;  %872 = vmatprep.subr.bf16.mxu0 %v1685_v57  ;;  %v1760_v56 = vld [vmem:[%s2423_s2 + $0x3e8] ss:$16 sps:$4 sm:$0xff]   ;;  %v1765_v57 = vld [vmem:[%s2423_s2 + $0x1cc] ss:$16 sps:$4 sm:$0xff]  }
  0x31   :  { %913 = vmatprep.subr.bf16.mxu1 %v1687_v58  ;;  %v1768_v58 = vld [vmem:[%s2423_s2 + $0x3cc] ss:$16 sps:$4 sm:$0xff]  }
  0x33   :  { %873 = vmatpush2.bf16.msra.mxu0 %v1689_v62  ;;  %v1774_v62 = vld [vmem:[%s2423_s2 + $0x3ac] ss:$16 sps:$4 sm:$0xff]  }
  0x34   :  { %914 = vmatpush2.bf16.msra.mxu1 %v1690_v63  ;;  %874 = vmatprep.subr.bf16.mxu0 %v1691_v0  ;;  %v1769_v63 = vld [vmem:[%s2423_s2 + $0x1a8] ss:$16 sps:$4 sm:$0xff]  }
  0x35   :  { %915 = vmatprep.subr.bf16.mxu1 %v1693_v1  ;;  %v1772_v0 = vld [vmem:[%s2423_s2 + $0x3a8] ss:$16 sps:$4 sm:$0xff]   ;;  %v1777_v1 = vld [vmem:[%s2423_s2 + $0x18c] ss:$16 sps:$4 sm:$0xff]  }
  0x37   :  { %875 = vmatpush2.bf16.msra.mxu0 %v1695_v6  ;;  %v1786_v6 = vld [vmem:[%s2423_s2 + $0x36c] ss:$16 sps:$4 sm:$0xff]  }
  0x38   :  { %916 = vmatpush2.bf16.msra.mxu1 %v1696_v7  ;;  %876 = vmatprep.subr.bf16.mxu0 %v1697_v8 }
  0x39   :  { %917 = vmatprep.subr.bf16.mxu1 %v1699_v9 }
  0x3b   :  { %877 = vmatpush2.bf16.msra.mxu0 %v1701_v11 }
  0x3c   :  { %918 = vmatpush2.bf16.msra.mxu1 %v1702_v12  ;;  %878 = vmatprep.subr.bf16.mxu0 %v1703_v13 }
  0x3d   :  { %919 = vmatprep.subr.bf16.mxu1 %v1705_v14 }
  0x3f   :  { %879 = vmatpush2.bf16.msra.mxu0 %v1707_v15 }
  0x40   :  { %920 = vmatpush2.bf16.msra.mxu1 %v1708_v16  ;;  %930 = vmatprep.subr.bf16.mxu0 %v1711_v17 }
  0x41   :  { %971 = vmatprep.subr.bf16.mxu1 %v1714_v18 }
  0x42   :  { %881 = vmatmul.mubr.bf16.vlgmr.msra.gmra.mxu0 %v2113_v19 }
  0x43   :  { %922 = vmatmul.mubr.bf16.vlgmr.msra.gmra.mxu1 %v2115_v20  ;;  %931 = vmatpush1.bf16.msra.mxu0 %v1709_v21 }
  0x44   :  { %972 = vmatpush1.bf16.msra.mxu1 %v1712_v22  ;;  %932 = vmatprep.subr.bf16.mxu0 %v1717_v23 }
  0x45   :  { %973 = vmatprep.subr.bf16.mxu1 %v1720_v24  ;;  %962 = vmatprep.mubr.bf16.mxu0 %v55_v4  ;;  %v1778_v4 = vld [vmem:[%s2423_s2 + $0x388] ss:$16 sps:$4 sm:$0xff]  }
  0x46   :  { %1003 = vmatprep.mubr.bf16.mxu1 %v57_v10 }
  0x47   :  { %933 = vmatpush1.bf16.msra.mxu0 %v1715_v25 }
  0x48   :  { %974 = vmatpush1.bf16.msra.mxu1 %v1718_v26  ;;  %934 = vmatprep.subr.bf16.mxu0 %v1723_v27 }
  0x49   :  { %975 = vmatprep.subr.bf16.mxu1 %v1726_v28 }
  0x4b   :  { %935 = vmatpush1.bf16.msra.mxu0 %v1721_v29 }
  0x4c   :  { %976 = vmatpush1.bf16.msra.mxu1 %v1724_v30  ;;  %936 = vmatprep.subr.bf16.mxu0 %v1729_v31 }
  0x4d   :  { %977 = vmatprep.subr.bf16.mxu1 %v1732_v32 }
  0x4f   :  { %937 = vmatpush1.bf16.msra.mxu0 %v1727_v33 }
  0x50   :  { %978 = vmatpush1.bf16.msra.mxu1 %v1730_v34  ;;  %938 = vmatprep.subr.bf16.mxu0 %v1735_v35 }
  0x51   :  { %979 = vmatprep.subr.bf16.mxu1 %v1738_v36 }
  0x53   :  { %939 = vmatpush1.bf16.msra.mxu0 %v1733_v37 }
  0x54   :  { %980 = vmatpush1.bf16.msra.mxu1 %v1736_v38  ;;  %940 = vmatprep.subr.bf16.mxu0 %v1741_v39 }
  0x55   :  { %981 = vmatprep.subr.bf16.mxu1 %v1744_v40 }
  0x57   :  { %941 = vmatpush1.bf16.msra.mxu0 %v1739_v41 }
  0x58   :  { %982 = vmatpush1.bf16.msra.mxu1 %v1742_v42  ;;  %942 = vmatprep.subr.bf16.mxu0 %v1747_v43 }
  0x59   :  { %983 = vmatprep.subr.bf16.mxu1 %v1750_v44 }
  0x5b   :  { %943 = vmatpush1.bf16.msra.mxu0 %v1745_v45 }
  0x5c   :  { %984 = vmatpush1.bf16.msra.mxu1 %v1748_v46  ;;  %944 = vmatprep.subr.bf16.mxu0 %v1753_v47 }
  0x5d   :  { %985 = vmatprep.subr.bf16.mxu1 %v1756_v49 }
  0x5f   :  { %945 = vmatpush1.bf16.msra.mxu0 %v1751_v50 }
  0x60   :  { %986 = vmatpush1.bf16.msra.mxu1 %v1754_v51  ;;  %946 = vmatprep.subr.bf16.mxu0 %v1759_v52 }
  0x61   :  { %987 = vmatprep.subr.bf16.mxu1 %v1762_v53 }
  0x63   :  { %947 = vmatpush2.bf16.msra.mxu0 %v1757_v55 }
  0x64   :  { %988 = vmatpush2.bf16.msra.mxu1 %v1760_v56  ;;  %948 = vmatprep.subr.bf16.mxu0 %v1765_v57 }
  0x65   :  { %989 = vmatprep.subr.bf16.mxu1 %v1768_v58 }
  0x67   :  { %949 = vmatpush2.bf16.msra.mxu0 %v1763_v59 }
  0x68   :  { %990 = vmatpush2.bf16.msra.mxu1 %v1766_v60  ;;  %950 = vmatprep.subr.bf16.mxu0 %v1771_v61 }
  0x69   :  { %991 = vmatprep.subr.bf16.mxu1 %v1774_v62 }
  0x6b   :  { %951 = vmatpush2.bf16.msra.mxu0 %v1769_v63 }
  0x6c   :  { %992 = vmatpush2.bf16.msra.mxu1 %v1772_v0  ;;  %952 = vmatprep.subr.bf16.mxu0 %v1777_v1 }
  0x6d   :  { %993 = vmatprep.subr.bf16.mxu1 %v1780_v2 }
  0x6e   :  { %12 = vsyncpa [#allocation3], 0  ;;  %v1781_v7 = vld [vmem:[%s2423_s2 + $0x168] ss:$16 sps:$4 sm:$0xff]   ;;  %v1789_v9 = vld [vmem:[%s2423_s2 + $0x14c] ss:$16 sps:$4 sm:$0xff]  }
  0x6f   :  { %953 = vmatpush2.bf16.msra.mxu0 %v1775_v3  ;;  %v1784_v8 = vld [vmem:[%s2423_s2 + $0x368] ss:$16 sps:$4 sm:$0xff]   ;;  %v1792_v10 = vld [vmem:[%s2423_s2 + $0x34c] ss:$16 sps:$4 sm:$0xff]   ;;  %v1807_v25 = vld [vmem:[%s2426_s5 + $0x70] sm:$0xff]   ;;  %v190_v55 = vsub.s32 0, %v2034_v48 }
  0x70   :  { %994 = vmatpush2.bf16.msra.mxu1 %v1778_v4  ;;  %954 = vmatprep.subr.bf16.mxu0 %v1783_v5  ;;  %v1787_v11 = vld [vmem:[%s2423_s2 + $0x148] ss:$16 sps:$4 sm:$0xff]   ;;  %v1795_v13 = vld [vmem:[%s2423_s2 + $0x12c] ss:$16 sps:$4 sm:$0xff]   ;;  %v1808_v26 = vld [vmem:[%s2426_s5 + $0x30] sm:$0xff]   ;;  %v194_v57 = vsub.s32 1, %v2034_v48 }
  0x71   :  { %995 = vmatprep.subr.bf16.mxu1 %v1786_v6  ;;  %v1790_v12 = vld [vmem:[%s2423_s2 + $0x348] ss:$16 sps:$4 sm:$0xff]   ;;  %v1798_v14 = vld [vmem:[%s2423_s2 + $0x32c] ss:$16 sps:$4 sm:$0xff]   ;;  %v1815_v31 = vld [vmem:[%s2426_s5 + $0x50] sm:$0xff]   ;;  %vm1390_vm0 = vcmask 74752  }
  0x72   :  { %v1793_v15 = vld [vmem:[%s2423_s2 + $0x128] ss:$16 sps:$4 sm:$0xff]   ;;  %v1801_v17 = vld [vmem:[%s2423_s2 + $0x10c] ss:$16 sps:$4 sm:$0xff]   ;;  %v1823_v34 = vld [vmem:[%s2426_s5 + $0xf0] sm:$0xff]  }
  0x73   :  { %955 = vmatpush2.bf16.msra.mxu0 %v1781_v7  ;;  %v1796_v16 = vld [vmem:[%s2423_s2 + $0x328] ss:$16 sps:$4 sm:$0xff]   ;;  %v1804_v18 = vld [vmem:[%s2423_s2 + $0x30c] ss:$16 sps:$4 sm:$0xff]   ;;  %v1816_v35 = vld [vmem:[%s2426_s5 + $0x10] sm:$0xff]  }
  0x74   :  { %996 = vmatpush2.bf16.msra.mxu1 %v1784_v8  ;;  %956 = vmatprep.subr.bf16.mxu0 %v1789_v9  ;;  %v1799_v21 = vld [vmem:[%s2423_s2 + $0x108] ss:$16 sps:$4 sm:$0xff]   ;;  %v1824_v36 = vld [vmem:[%s2426_s5 + $0xb0] sm:$0xff]   ;;  %v1819_v41 = vld [vmem:[%s2426_s5 + $0x40] sm:$0xff]  }
  0x75   :  { %997 = vmatprep.subr.bf16.mxu1 %v1792_v10  ;;  %v1802_v22 = vld [vmem:[%s2423_s2 + $0x308] ss:$16 sps:$4 sm:$0xff]   ;;  %v1827_v42 = vld [vmem:[%s2426_s5 + $0xe0] sm:$0xff]   ;;  %v1832_v47 = vld [vmem:[%s2426_s5 + $0xd0] sm:$0xff]  }
  0x76   :  { %v1805_v23 = vld [vmem:[%s2426_s5 + $0x78] sm:$0xff]   ;;  %v1809_v27 = vld [vmem:[%s2426_s5 + $0x68] sm:$0xff]   ;;  %v1820_v43 = vld [vmem:[%s2426_s5] sm:$0xff]  }
  0x77   :  { %957 = vmatpush2.bf16.msra.mxu0 %v1787_v11  ;;  %v1806_v24 = vld [vmem:[%s2426_s5 + $0x38] sm:$0xff]   ;;  %v1810_v28 = vld [vmem:[%s2426_s5 + $0x28] sm:$0xff]   ;;  %v1828_v44 = vld [vmem:[%s2426_s5 + $0xa0] sm:$0xff]  }
  0x78   :  { %998 = vmatpush2.bf16.msra.mxu1 %v1790_v12  ;;  %958 = vmatprep.subr.bf16.mxu0 %v1795_v13  ;;  %v1813_v29 = vld [vmem:[%s2426_s5 + $0x58] sm:$0xff]   ;;  %v1817_v37 = vld [vmem:[%s2426_s5 + $0x48] sm:$0xff]   ;;  %v1833_v49 = vld [vmem:[%s2426_s5 + $0x90] sm:$0xff]  }
  0x79   :  { %999 = vmatprep.subr.bf16.mxu1 %v1798_v14  ;;  %v1814_v30 = vld [vmem:[%s2426_s5 + $0x18] sm:$0xff]   ;;  %v1825_v38 = vld [vmem:[%s2426_s5 + $0xe8] sm:$0xff]   ;;  %v1836_v52 = vld [vmem:[%s2426_s5 + $0xc0] sm:$0xff]  }
  0x7a   :  { %v1821_v32 = vld [vmem:[%s2426_s5 + $0xf8] sm:$0xff]   ;;  %v1818_v39 = vld [vmem:[%s2426_s5 + $0x8] sm:$0xff]   ;;  %v1837_v53 = vld [vmem:[%s2426_s5 + $0x80] sm:$0xff]  }
  0x7b   :  { %959 = vmatpush2.bf16.msra.mxu0 %v1793_v15  ;;  %v1822_v33 = vld [vmem:[%s2426_s5 + $0xb8] sm:$0xff]   ;;  %v1826_v40 = vld [vmem:[%s2426_s5 + $0xa8] sm:$0xff]   ;;  %v186_v56 = vld [vmem:[%s2424_s3] sm:$0xf] }
  0x7c   :  { %1000 = vmatpush2.bf16.msra.mxu1 %v1796_v16  ;;  %960 = vmatprep.subr.bf16.mxu0 %v1801_v17  ;;  %v1829_v45 = vld [vmem:[%s2426_s5 + $0xd8] sm:$0xff]   ;;  %v1834_v50 = vld [vmem:[%s2426_s5 + $0xc8] sm:$0xff]   ;;  %v191_v58 = vrot.slane %v186_v56, %v190_v55  ;;  %v1016_v59 = vld [vmem:[%s2425_s4] sm:$0xff]  ;;  %v195_v60 = vrot.slane %v186_v56, %v194_v57  ;;  %v198_v17 = vsub.s32 2, %v2034_v48 }
  0x7d   :  { %1001 = vmatprep.subr.bf16.mxu1 %v1804_v18  ;;  %v1830_v46 = vld [vmem:[%s2426_s5 + $0x98] sm:$0xff]   ;;  %v1835_v51 = vld [vmem:[%s2426_s5 + $0x88] sm:$0xff]   ;;  %v1025_v0 = vrot.slane %v1016_v59, %v2049_v54  ;;  %v202_v18 = vsub.s32 3, %v2034_v48 }
  0x7f   :  { %961 = vmatpush2.bf16.msra.mxu0 %v1799_v21  ;;  %v1033_v9 = vcombine.high %v1025_v0, %v1025_v0  ;;  %v199_v21 = vrot.slane %v186_v56, %v198_v17 }
  0x80   :  { %1002 = vmatpush2.bf16.msra.mxu1 %v1802_v22  ;;  %1567 = vmatprep.subr.bf16.mxu0 %v1805_v23  ;;  %v1018_v22 = vcombine.high %v1016_v59, %v1016_v59  ;;  %v203_v23 = vrot.slane %v186_v56, %v202_v18 }
  0x81   :  { %1589 = vmatprep.subr.bf16.mxu1 %v1821_v32 }
  0x82   :  { %963 = vmatmul.mubr.bf16.vlgmr.msra.gmra.mxu0 %v2113_v19  ;;  %v1811_v19 = vld [vmem:[%s2426_s5 + $0x60] sm:$0xff]  }
  0x83   :  { %1004 = vmatmul.mubr.bf16.vlgmr.msra.gmra.mxu1 %v2115_v20  ;;  %1568 = vmatpush3.bf16.msra.mxu0 %v1806_v24  ;;  %v1812_v20 = vld [vmem:[%s2426_s5 + $0x20] sm:$0xff]   ;;  %s1861_s5 = smov [#allocation2]  }
  0x84   :  { %1569 = vmatprep.subr.bf16.mxu0 %v1807_v25  ;;  %1590 = vmatpush3.bf16.msra.mxu1 %v1822_v33  ;;  %s1398_s0 = sshll.u32 %s1861_s5, 4  ;;  %s1399_s0 = int_to_ptr.vmem [resolvable:$true] %s1398_s0 }
  0x85   :  { %1591 = vmatprep.subr.bf16.mxu1 %v1823_v34  ;;  %s1838_s9 = scalar_lea.vmem %s1399_s0, 32  ;;  %p1843_p1 = scmp.lt.s32.totalorder %s1399_s0, %s1399_s0 }
  0x86   :  { %p1839_p0 = scmp.ne.s32.totalorder %s1399_s0, %s1838_s9  ;;  %p1844_p2 = scmp.lt.s32.totalorder %s1838_s9, %s1838_s9 }
  0x87   :  { %1570 = vmatpush3.bf16.msra.mxu0 %v1808_v26 }
  0x88   :  { %1571 = vmatprep.subr.bf16.mxu0 %v1809_v27  ;;  %1592 = vmatpush3.bf16.msra.mxu1 %v1824_v36  ;;  %v1032_v27 = vrot.slane %v1018_v22, %v2049_v54  ;;  %p1845_p3 = por %p1844_p2, %p1843_p1 }
  0x89   :  { %1593 = vmatprep.subr.bf16.mxu1 %v1825_v38 }
  0x8a   :  { %v1034_v34 = vcombine.high %v1032_v27, %v1032_v27  ;;  %p1846_p4 = pnand %p1845_p3, %p1839_p0 }
  0x8b   :  { %1572 = vmatpush3.bf16.msra.mxu0 %v1810_v28 }
  0x8c   :  { %1573 = vmatprep.subr.bf16.mxu0 %v1811_v19  ;;  %1594 = vmatpush3.bf16.msra.mxu1 %v1826_v40 }
  0x8d   :  { %1595 = vmatprep.subr.bf16.mxu1 %v1827_v42 }
  0x8f   :  { %1574 = vmatpush3.bf16.msra.mxu0 %v1812_v20 }
  0x90   :  { %1575 = vmatprep.subr.bf16.mxu0 %v1813_v29  ;;  %1596 = vmatpush3.bf16.msra.mxu1 %v1828_v44 }
  0x91   :  { %1597 = vmatprep.subr.bf16.mxu1 %v1829_v45  ;;  %v1534_v45 = vld [vmem:[%s2427_s6] ss:$0 sm:$0xff] }
  0x93   :  { %1576 = vmatpush3.bf16.msra.mxu0 %v1814_v30 }
  0x94   :  { %1577 = vmatprep.subr.bf16.mxu0 %v1815_v31  ;;  %1598 = vmatpush3.bf16.msra.mxu1 %v1830_v46 }
  0x95   :  { %1599 = vmatprep.subr.bf16.mxu1 %v1832_v47 }
  0x97   :  { %1578 = vmatpush3.bf16.msra.mxu0 %v1816_v35 }
  0x98   :  { %1579 = vmatprep.subr.bf16.mxu0 %v1817_v37  ;;  %1600 = vmatpush3.bf16.msra.mxu1 %v1833_v49 }
  0x99   :  { %1601 = vmatprep.subr.bf16.mxu1 %v1834_v50 }
  0x9b   :  { %1580 = vmatpush3.bf16.msra.mxu0 %v1818_v39 }
  0x9c   :  { %1581 = vmatprep.subr.bf16.mxu0 %v1819_v41  ;;  %1602 = vmatpush3.bf16.msra.mxu1 %v1835_v51 }
  0x9d   :  { %1603 = vmatprep.subr.bf16.mxu1 %v1836_v52 }
  0x9f   :  { %1582 = vmatpush3.bf16.msra.mxu0 %v1820_v43 }
  0xa0   :  { %1604 = vmatpush3.bf16.msra.mxu1 %v1837_v53 }
 0x102   :  { %v882_v61 = vpop.f32.mrf.mxu0 }
 0x103   :  { %v923_v62 = vpop.f32.mrf.mxu1  ;;  %v883_v63 = vadd.f32 %v882_v61, %v191_v58 }
 0x104   :  { %v884_v1 = vpop.f32.mrf.mxu0 }
 0x105   :  { %v925_v2 = vpop.f32.mrf.mxu1  ;;  %v924_v3 = vadd.f32 %v923_v62, %v883_v63  ;;  %v885_v4 = vadd.f32 %v884_v1, %v195_v60 }
 0x106   :  { %v886_v5 = vpop.f32.mrf.mxu0 }
 0x107   :  { %v927_v6 = vpop.f32.mrf.mxu1  ;;  %v1012_v7 = vmax.f32 %v924_v3, 0.0  ;;  %v926_v8 = vadd.f32 %v925_v2, %v885_v4 }
 0x108   :  { %v887_v10 = vpop.f32.mrf.mxu0 }
 0x109   :  { %v928_v11 = vpop.f32.mrf.mxu1  ;;  %v1013_v12 = vmax.f32 %v926_v8, 0.0  ;;  %v1039_v13 = vmul.f32 %v1025_v0, %v1012_v7 }
 0x10b   :  { %v1040_v14 = vmul.f32 %v1033_v9, %v1013_v12  ;;  %v1043_v16 = vpack.c.bf16 %v1039_v13, %v1039_v13 }
 0x10d   :  { %v1044_v15 = vpack.c.bf16 %v1040_v14, %v1040_v14 }
 0x10f   :  { %1342 = vmatprep.mubr.bf16.mxu0 %v1044_v15 }
 0x110   :  { %1343 = vmatmul.mubr.bf16.vlgmr.msra.gmra.mxu0 %v1043_v16 }
 0x142   :  { %v964_v24 = vpop.f32.mrf.mxu0 }
 0x143   :  { %v1005_v25 = vpop.f32.mrf.mxu1  ;;  %v965_v26 = vadd.f32 %v964_v24, %v199_v21 }
 0x144   :  { %v966_v28 = vpop.f32.mrf.mxu0 }
 0x145   :  { %v1007_v19 = vpop.f32.mrf.mxu1  ;;  %v1006_v20 = vadd.f32 %v1005_v25, %v965_v26  ;;  %v967_v29 = vadd.f32 %v966_v28, %v203_v23 }
 0x146   :  { %v968_v30 = vpop.f32.mrf.mxu0 }
 0x147   :  { %v1009_v31 = vpop.f32.mrf.mxu1  ;;  %v1014_v32 = vmax.f32 %v1006_v20, 0.0  ;;  %v1008_v33 = vadd.f32 %v1007_v19, %v967_v29 }
 0x148   :  { %v969_v35 = vpop.f32.mrf.mxu0 }
 0x149   :  { %v1010_v36 = vpop.f32.mrf.mxu1  ;;  %v1015_v48 = vmax.f32 %v1008_v33, 0.0  ;;  %v1041_v37 = vmul.f32 %v1032_v27, %v1014_v32 }
 0x14b   :  { %v1042_v38 = vmul.f32 %v1034_v34, %v1015_v48  ;;  %v1045_v40 = vpack.c.bf16 %v1041_v37, %v1041_v37 }
 0x14d   :  { %v1046_v39 = vpack.c.bf16 %v1042_v38, %v1042_v38 }
 0x14f   :  { %1382 = vmatprep.mubr.bf16.mxu1 %v1046_v39 }
 0x150   :  { %1383 = vmatmul.mubr.bf16.vlgmr.msra.gmra.mxu1 %v1045_v40 }
 0x1d0   :  { %v1583_v41 = vpop.f32.mrf.mxu0 }
 0x1d2   :  { %v1584_v54 = vpop.f32.mrf.mxu0 }
 0x1d3   :  { %v1585_v44 = vadd.f32 %v1584_v54, %v1583_v41 }
 0x1d4   :  { %v1586_v42 = vpop.f32.mrf.mxu0 }
 0x1d5   :  { %v1345_v49 = vadd.f32 %v1585_v44, %v1534_v45 }
 0x1d6   :  { %v1587_v43 = vpop.f32.mrf.mxu0 }
 0x210   :  { %v1605_v46 = vpop.f32.mrf.mxu1 }
 0x212   :  { %v1606_v47 = vpop.f32.mrf.mxu1 }
 0x213   :  { %v1607_v50 = vadd.f32 %v1606_v47, %v1605_v46 }
 0x214   :  { %v1608_v51 = vpop.f32.mrf.mxu1 }
 0x215   :  { %v1385_v52 = vadd.f32 %v1607_v50, %v1345_v49 }
 0x216   :  { %v1609_v53 = vpop.f32.mrf.mxu1 }
 0x217   :  { %1391 = vst.msk [vmem:[#allocation2] sm:$0x3] %vm1390_vm0, %v1385_v52 }
 0x218   :  { %1849 = shalt.err (!%p1846_p4)
}
 0x219   :  { %1401 = dma.vmem_to_hbm [thread:$0]  %s1399_s0, 32, %s2428_s7, [#allocation3]  }
 0x21a   :  { %1858 = dma.done.wait [#allocation3], 32  }
 0x21b   :  { %1859 = vsyncadd [#allocation3], 4294967264 }
 0x21c   :  { %1405 = vsyncpa [#allocation3], 1 }

</bundles_post_ra>
